<compile_context>
chip_gen: v5e
topology: v5e:2x2
jax: 0.10.0
libtpu: 0.0.40
codegen_flags: <defaults>
</compile_context>

<pallas_src>
import math
from functools import partial

import numpy as np
import jax
import jax.numpy as jnp
from jax import lax
from jax.experimental import pallas as pl
from jax.experimental.pallas import tpu as pltpu

K = 4
SIGMAS = (1.0, 2.0, 3.0, 4.0)
KSIZE = 5
DILATIONS = tuple(max(1, int(s // 1)) for s in SIGMAS)      # (1, 2, 3, 4)
PMAX = 2 * max(DILATIONS)                                   # autopad = 2*d, max = 8
BN_EPS = 1e-5
GN_EPS = 1e-5

# Static correctness guards: the roll-with-wrap scheme is only valid when the
# halo covers the largest dilated tap reach exactly.
assert len(SIGMAS) == K
assert KSIZE == 5 and KSIZE % 2 == 1
assert PMAX >= (KSIZE // 2) * max(DILATIONS)


def _gaussian_1d():
    """Separable 1-D tap weights per scale (the 2-D kernel is their outer product)."""
    ax = np.arange(-(KSIZE // 2), KSIZE // 2 + 1, dtype=np.float64)
    out = []
    for s in SIGMAS:
        g = np.exp(-(ax ** 2) / (2.0 * s * s))
        out.append(g / g.sum())
    return out


def _gaussian_2d():
    ax = np.arange(-(KSIZE // 2), KSIZE // 2 + 1, dtype=np.float32)
    xx, yy = np.meshgrid(ax, ax, indexing="ij")
    ks = []
    for s in SIGMAS:
        k = np.exp(-(xx ** 2 + yy ** 2) / (2.0 * s * s))
        ks.append(k / k.sum())
    return np.stack(ks)


G1D = _gaussian_1d()      # used by the Pallas kernel (trace-time scalar constants)
GK = _gaussian_2d()       # used by the pure-JAX reference


# ----------------------------------------------------------------------------
# Fused Pallas kernel (one grid step per batch block):
#   1x1 conv + BN (block-diagonal fused weights, VPU broadcast FMAs, no MXU)
#   -> multi-scale separable Gaussian radial attention via lane rolls (XLU)
#   -> sigmoid gate + residual multiply + final SiLU (tanh-based sigmoids, EUP)
#
# Layout: spatial dims are zero-padded by PMAX and flattened to a single
# lane-dense axis Np = Hp*Wp (multiple of 128).  The zero halo + symmetric taps
# guarantee that roll wrap-around only contaminates halo outputs, which are
# never written back (only the H interior rows are stored).
# ----------------------------------------------------------------------------
def _msgra_fused_kernel(w_ref, b_ref, gam_ref, mask_ref, xp_ref, out_ref, *, Wp, H):
    rows_in, Np = xp_ref.shape          # (BBLK*Cin, Np)
    rows_out = out_ref.shape[0]         # BBLK*Cout

    # ---- fused 1x1 conv + eval-mode BN ---------------------------------------
    # Block-diagonal weights cover the whole batch block in one (rows_out, Np)
    # tile.  Broadcast FMAs on the VPU keep the MXU (shared vector-extended slot
    # with the rolls) free.
    # TODO(synk): a stride-0 sublane-broadcast load (xp_ref[pl.ds(r, rows_out,
    # stride=0), :]) would move the sublane broadcast into the vld slot.
    w = w_ref[...]
    y = jnp.broadcast_to(b_ref[...], (rows_out, Np))
    for r in range(rows_in):
        y = y + w[:, r:r + 1] * xp_ref[r:r + 1, :]

    # ---- zero the PMAX halo: the depthwise convs see zero-padded y -----------
    y = y * mask_ref[...]                               # (1, Np) of {0, 1}

    # ---- horizontal 5-tap passes, de-duplicated across scales ----------------
    # Required lane offsets are only +/-{1,2,3,4,6,8}: compute each unique roll
    # of y once and fold it immediately into every per-scale accumulator.
    t = [float(G1D[i][2]) * y for i in range(K)]        # center taps
    uniq = sorted({(a - 2) * d for d in set(DILATIONS)
                   for a in range(KSIZE) if a != 2})
    for off in uniq:
        r_y = pltpu.roll(y, (-off) % Np, axis=1)        # r_y[n] = y[n + off]
        for i in range(K):
            d = DILATIONS[i]
            if off % d == 0 and abs(off) // d in (1, 2):
                a = 2 + off // d
                t[i] = t[i] + float(G1D[i][a]) * r_y

    # ---- vertical 5-tap passes + per-row gamma --------------------------------
    radial = jnp.zeros((rows_out, Np), jnp.float32)
    for i in range(K):
        d = DILATIONS[i]
        g = G1D[i]
        v = float(g[2]) * t[i]
        for a in (0, 1, 3, 4):
            shift = (-(a - 2) * d * Wp) % Np
            v = v + float(g[a]) * pltpu.roll(t[i], shift, axis=1)
        radial = radial + gam_ref[:, i:i + 1] * v       # per-row (per-batch) gamma

    # ---- sigmoid gate + residual multiply + final SiLU ------------------------
    # sigmoid(x) = 0.5*(1 + tanh(x/2)): one EUP push per vreg instead of two.
    z = y * (1.5 + 0.5 * jnp.tanh(0.5 * radial))        # halo: y == 0 -> z == 0
    out_full = z * (0.5 + 0.5 * jnp.tanh(0.5 * z))

    # Only the H interior rows go back to HBM (vreg-aligned 128-multiple slice).
    lo = PMAX * Wp
    out_ref[...] = out_full[:, lo:lo + H * Wp].astype(out_ref.dtype)


# ----------------------------------------------------------------------------
# Glue: BN fusion and the tiny per-sample "scale" MLP (operates on (B, C) only).
# ----------------------------------------------------------------------------
def fuse_bn(conv_w, bn_g, bn_b, bn_m, bn_v):
    s = bn_g / jnp.sqrt(bn_v + BN_EPS)
    return conv_w * s[:, None], (bn_b - bn_m * s)[:, None]


def scale_mlp(gap, params, num_groups):
    # gap: (B, C) -> gamma: (B, K).  Conv1x1 -> GroupNorm -> SiLU -> Conv1x1(+bias).
    w1, gn_w, gn_b, w2, b2 = params
    h = gap @ w1.T
    Bsz, hidden = h.shape
    g = h.reshape(Bsz, num_groups, hidden // num_groups)
    mu = g.mean(-1, keepdims=True)
    var = g.var(-1, keepdims=True)                           # biased, like PyTorch GN
    g = (g - mu) / jnp.sqrt(var + GN_EPS)
    h = g.reshape(Bsz, hidden) * gn_w[None, :] + gn_b[None, :]
    h = h * jax.nn.sigmoid(h)                                # SiLU
    return h @ w2.T + b2[None, :]


def msgra_conv_forward(x, conv_w, bn_params, scale_params, num_groups):
    # TODO(synk): only the module-default Conv path (k=1, s=1, g=1, d=1, act=SiLU)
    # is implemented; the fixed Gaussian radial weights are trace-time constants.
    B, Cin, H, W = x.shape
    w_fused, b_fused = fuse_bn(conv_w, *bn_params)           # (Cout, Cin), (Cout, 1)
    Cout = w_fused.shape[0]

    # GAP(BN(conv1x1(x))) == w_fused @ GAP(x) + b_fused exactly, so gamma needs
    # only a tiny XLA reduce + the small scale MLP (no extra y pass).
    gap = x.mean(axis=(2, 3)) @ w_fused.T + b_fused[:, 0][None, :]     # (B, Cout)
    gamma = scale_mlp(gap, scale_params, num_groups)                   # (B, K)

    Hp, Wp = H + 2 * PMAX, W + 2 * PMAX
    Np = Hp * Wp
    assert Np % 128 == 0, "padded spatial extent must be lane-dense"
    assert (PMAX * Wp) % 128 == 0 and (H * Wp) % 128 == 0, \
        "interior-row output slice must be vreg-aligned"

    # Batch block: all of B in one grid step here (amortizes per-step overhead).
    # For large B pick a divisor (e.g. 8) and let the grid cover B // BBLK.
    BBLK = B
    assert B % BBLK == 0
    nblk = B // BBLK
    ROWS_IN, ROWS_OUT = BBLK * Cin, BBLK * Cout

    # TODO(synk): for production, avoid this XLA-side pad (DMA x into a zeroed
    # VMEM scratch at the interior offset) or keep the padded layout end-to-end.
    xpad = jnp.pad(x, ((0, 0), (0, 0), (PMAX, PMAX), (PMAX, PMAX)))
    xpad = xpad.reshape(B * Cin, Np)                         # lane-dense flattened

    # Block-diagonal fused 1x1 weights + tiled bias + per-row gamma columns.
    w_blk = jnp.kron(jnp.eye(BBLK, dtype=w_fused.dtype), w_fused)   # (ROWS_OUT, ROWS_IN)
    b_rows = jnp.tile(b_fused, (BBLK, 1))                           # (ROWS_OUT, 1)
    gamma_rows = jnp.repeat(gamma, Cout, axis=0)                    # (B*Cout, K)

    # Precomputed {0,1} interior mask (compile-time constant, passed as input).
    interior = np.zeros((Hp, Wp), np.float32)
    interior[PMAX:PMAX + H, PMAX:PMAX + W] = 1.0
    interior = jnp.asarray(interior.reshape(1, Np))

    # TODO(synk): on v6e/v7x a bf16 working set / output would halve vreg, roll
    # and HBM traffic; kept f32 here because v5e has no bf16 VALU/EUP.
    out_rows = pl.pallas_call(
        partial(_msgra_fused_kernel, Wp=Wp, H=H),
        out_shape=jax.ShapeDtypeStruct((B * Cout, H * Wp), x.dtype),
        grid_spec=pltpu.PrefetchScalarGridSpec(
            num_scalar_prefetch=0,
            grid=(nblk,),
            in_specs=[
                pl.BlockSpec((ROWS_OUT, ROWS_IN), lambda nb: (0, 0)),   # block-diag w
                pl.BlockSpec((ROWS_OUT, 1), lambda nb: (0, 0)),         # fused bias
                pl.BlockSpec((ROWS_OUT, K), lambda nb: (nb, 0)),        # per-row gamma
                pl.BlockSpec((1, Np), lambda nb: (0, 0)),               # interior mask
                pl.BlockSpec((ROWS_IN, Np), lambda nb: (nb, 0)),        # padded x rows
            ],
            out_specs=pl.BlockSpec((ROWS_OUT, H * Wp), lambda nb: (nb, 0)),
        ),
        compiler_params=pltpu.CompilerParams(
            dimension_semantics=("parallel",),
            vmem_limit_bytes=32 * 1024 * 1024),
    )(w_blk, b_rows, gamma_rows, interior, xpad)

    # Only the left/right halo columns remain to slice off (rows already interior).
    out = out_rows.reshape(B, Cout, H, Wp)[:, :, :, PMAX:PMAX + W]
    return out


# ----------------------------------------------------------------------------
# Pure-JAX reference (for correctness check only).
# ----------------------------------------------------------------------------
def reference_forward(x, conv_w, bn_params, scale_params, num_groups):
    bn_g, bn_b, bn_m, bn_v = bn_params
    y = jnp.einsum("oc,bchw->bohw", conv_w, x, precision=lax.Precision.HIGHEST)
    s = bn_g / jnp.sqrt(bn_v + BN_EPS)
    y = y * s[None, :, None, None] + (bn_b - bn_m * s)[None, :, None, None]
    gap = y.mean(axis=(2, 3))
    gamma = scale_mlp(gap, scale_params, num_groups)
    C = y.shape[1]
    radial = jnp.zeros_like(y)
    for i in range(K):
        d = DILATIONS[i]
        w = jnp.broadcast_to(jnp.asarray(GK[i]), (C, 1, KSIZE, KSIZE))
        conv_out = lax.conv_general_dilated(
            y, w, window_strides=(1, 1),
            padding=[(2 * d, 2 * d), (2 * d, 2 * d)],
            rhs_dilation=(d, d),
            dimension_numbers=("NCHW", "OIHW", "NCHW"),
            feature_group_count=C,
            precision=lax.Precision.HIGHEST)
        radial = radial + gamma[:, i][:, None, None, None] * conv_out
    out = y * (1.0 + jax.nn.sigmoid(radial))
    return out * jax.nn.sigmoid(out)


if __name__ == "__main__":
    B, Cin, H, W = 2, 4, 16, 16
    Cout = 8
    hidden = max(8, Cout // 8)                 # 8  (attn channels = Cout, attn_first=False)
    num_groups = min(4, hidden)                # 4

    key = jax.random.PRNGKey(0)
    ks = jax.random.split(key, 10)
    x = jax.random.normal(ks[0], (B, Cin, H, W), jnp.float32)

    # Deterministic synthetic parameters (shapes from the module's __init__).
    conv_w = jax.random.normal(ks[1], (Cout, Cin), jnp.float32) / math.sqrt(Cin)
    bn_g = 1.0 + 0.1 * jax.random.normal(ks[2], (Cout,), jnp.float32)
    bn_b = 0.1 * jax.random.normal(ks[3], (Cout,), jnp.float32)
    bn_m = 0.1 * jax.random.normal(ks[4], (Cout,), jnp.float32)
    bn_v = 1.0 + 0.1 * jax.random.uniform(ks[5], (Cout,), jnp.float32)
    w1 = jax.random.normal(ks[6], (hidden, Cout), jnp.float32) / math.sqrt(Cout)
    gn_w = jnp.ones((hidden,), jnp.float32)
    gn_b = jnp.zeros((hidden,), jnp.float32)
    w2 = jax.random.normal(ks[7], (K, hidden), jnp.float32) / math.sqrt(hidden)
    b2 = 0.1 * jax.random.normal(ks[8], (K,), jnp.float32)

    bn_params = (bn_g, bn_b, bn_m, bn_v)
    scale_params = (w1, gn_w, gn_b, w2, b2)

    out = msgra_conv_forward(x, conv_w, bn_params, scale_params, num_groups)
    out = jax.block_until_ready(out)

    ref = reference_forward(x, conv_w, bn_params, scale_params, num_groups)
    assert out.shape == (B, Cout, H, W) and out.dtype == jnp.float32
    err = float(jnp.max(jnp.abs(out - ref)))
    assert err < 1e-2, f"max abs error {err}"
    print("KERNEL_OK")
</pallas_src>

<mosaic_0001>
module attributes {stable_mosaic.version = 11 : i64} {
  func.func @_msgra_fused_kernel(%arg0: i32, %arg1: memref<16x8xf32, #tpu.memory_space<vmem>>, %arg2: memref<16x1xf32, #tpu.memory_space<vmem>>, %arg3: memref<16x4xf32, #tpu.memory_space<vmem>>, %arg4: memref<1x1024xf32, #tpu.memory_space<vmem>>, %arg5: memref<8x1024xf32, #tpu.memory_space<vmem>>, %arg6: memref<16x512xf32, #tpu.memory_space<vmem>>) attributes {dimension_semantics = [#tpu.dimension_semantics<parallel>], iteration_bounds = array<i64: 1>, scalar_prefetch = 0 : i64, scratch_operands = 0 : i64, tpu.core_type = #tpu.core_type<tc>, window_params = [{pipeline_mode = #tpu.pipeline_mode<synchronous>, transform_indices = @transform_0, window_bounds = array<i64: 16, 8>}, {pipeline_mode = #tpu.pipeline_mode<synchronous>, transform_indices = @transform_1, window_bounds = array<i64: 16, 1>}, {transform_indices = @transform_2, window_bounds = array<i64: 16, 4>}, {pipeline_mode = #tpu.pipeline_mode<synchronous>, transform_indices = @transform_3, window_bounds = array<i64: 1, 1024>}, {transform_indices = @transform_4, window_bounds = array<i64: 8, 1024>}, {transform_indices = @transform_5, window_bounds = array<i64: 16, 512>}]} {
    %c0 = arith.constant 0 : index
    %c0_0 = arith.constant 0 : index
    %0 = vector.load %arg1[%c0, %c0_0] : memref<16x8xf32, #tpu.memory_space<vmem>>, vector<16x8xf32>
    %c0_1 = arith.constant 0 : index
    %c0_2 = arith.constant 0 : index
    %1 = vector.load %arg2[%c0_1, %c0_2] : memref<16x1xf32, #tpu.memory_space<vmem>>, vector<16x1xf32>
    %2 = vector.shape_cast %1 : vector<16x1xf32> to vector<16x1xf32>
    %3 = vector.broadcast %2 : vector<16x1xf32> to vector<16x1024xf32>
    %4 = vector.extract_strided_slice %0 {offsets = [0, 0], sizes = [16, 1], strides = [1, 1]} : vector<16x8xf32> to vector<16x1xf32>
    %c0_3 = arith.constant 0 : index
    %c0_4 = arith.constant 0 : index
    %5 = vector.load %arg5[%c0_3, %c0_4] : memref<8x1024xf32, #tpu.memory_space<vmem>>, vector<1x1024xf32>
    %6 = vector.broadcast %4 : vector<16x1xf32> to vector<16x1024xf32>
    %7 = vector.broadcast %5 : vector<1x1024xf32> to vector<16x1024xf32>
    %8 = arith.mulf %6, %7 : vector<16x1024xf32>
    %9 = arith.addf %3, %8 : vector<16x1024xf32>
    %10 = vector.extract_strided_slice %0 {offsets = [0, 1], sizes = [16, 1], strides = [1, 1]} : vector<16x8xf32> to vector<16x1xf32>
    %c1 = arith.constant 1 : index
    %c0_5 = arith.constant 0 : index
    %11 = vector.load %arg5[%c1, %c0_5] : memref<8x1024xf32, #tpu.memory_space<vmem>>, vector<1x1024xf32>
    %12 = vector.broadcast %10 : vector<16x1xf32> to vector<16x1024xf32>
    %13 = vector.broadcast %11 : vector<1x1024xf32> to vector<16x1024xf32>
    %14 = arith.mulf %12, %13 : vector<16x1024xf32>
    %15 = arith.addf %9, %14 : vector<16x1024xf32>
    %16 = vector.extract_strided_slice %0 {offsets = [0, 2], sizes = [16, 1], strides = [1, 1]} : vector<16x8xf32> to vector<16x1xf32>
    %c2 = arith.constant 2 : index
    %c0_6 = arith.constant 0 : index
    %17 = vector.load %arg5[%c2, %c0_6] : memref<8x1024xf32, #tpu.memory_space<vmem>>, vector<1x1024xf32>
    %18 = vector.broadcast %16 : vector<16x1xf32> to vector<16x1024xf32>
    %19 = vector.broadcast %17 : vector<1x1024xf32> to vector<16x1024xf32>
    %20 = arith.mulf %18, %19 : vector<16x1024xf32>
    %21 = arith.addf %15, %20 : vector<16x1024xf32>
    %22 = vector.extract_strided_slice %0 {offsets = [0, 3], sizes = [16, 1], strides = [1, 1]} : vector<16x8xf32> to vector<16x1xf32>
    %c3 = arith.constant 3 : index
    %c0_7 = arith.constant 0 : index
    %23 = vector.load %arg5[%c3, %c0_7] : memref<8x1024xf32, #tpu.memory_space<vmem>>, vector<1x1024xf32>
    %24 = vector.broadcast %22 : vector<16x1xf32> to vector<16x1024xf32>
    %25 = vector.broadcast %23 : vector<1x1024xf32> to vector<16x1024xf32>
    %26 = arith.mulf %24, %25 : vector<16x1024xf32>
    %27 = arith.addf %21, %26 : vector<16x1024xf32>
    %28 = vector.extract_strided_slice %0 {offsets = [0, 4], sizes = [16, 1], strides = [1, 1]} : vector<16x8xf32> to vector<16x1xf32>
    %c4 = arith.constant 4 : index
    %c0_8 = arith.constant 0 : index
    %29 = vector.load %arg5[%c4, %c0_8] : memref<8x1024xf32, #tpu.memory_space<vmem>>, vector<1x1024xf32>
    %30 = vector.broadcast %28 : vector<16x1xf32> to vector<16x1024xf32>
    %31 = vector.broadcast %29 : vector<1x1024xf32> to vector<16x1024xf32>
    %32 = arith.mulf %30, %31 : vector<16x1024xf32>
    %33 = arith.addf %27, %32 : vector<16x1024xf32>
    %34 = vector.extract_strided_slice %0 {offsets = [0, 5], sizes = [16, 1], strides = [1, 1]} : vector<16x8xf32> to vector<16x1xf32>
    %c5 = arith.constant 5 : index
    %c0_9 = arith.constant 0 : index
    %35 = vector.load %arg5[%c5, %c0_9] : memref<8x1024xf32, #tpu.memory_space<vmem>>, vector<1x1024xf32>
    %36 = vector.broadcast %34 : vector<16x1xf32> to vector<16x1024xf32>
    %37 = vector.broadcast %35 : vector<1x1024xf32> to vector<16x1024xf32>
    %38 = arith.mulf %36, %37 : vector<16x1024xf32>
    %39 = arith.addf %33, %38 : vector<16x1024xf32>
    %40 = vector.extract_strided_slice %0 {offsets = [0, 6], sizes = [16, 1], strides = [1, 1]} : vector<16x8xf32> to vector<16x1xf32>
    %c6 = arith.constant 6 : index
    %c0_10 = arith.constant 0 : index
    %41 = vector.load %arg5[%c6, %c0_10] : memref<8x1024xf32, #tpu.memory_space<vmem>>, vector<1x1024xf32>
    %42 = vector.broadcast %40 : vector<16x1xf32> to vector<16x1024xf32>
    %43 = vector.broadcast %41 : vector<1x1024xf32> to vector<16x1024xf32>
    %44 = arith.mulf %42, %43 : vector<16x1024xf32>
    %45 = arith.addf %39, %44 : vector<16x1024xf32>
    %46 = vector.extract_strided_slice %0 {offsets = [0, 7], sizes = [16, 1], strides = [1, 1]} : vector<16x8xf32> to vector<16x1xf32>
    %c7 = arith.constant 7 : index
    %c0_11 = arith.constant 0 : index
    %47 = vector.load %arg5[%c7, %c0_11] : memref<8x1024xf32, #tpu.memory_space<vmem>>, vector<1x1024xf32>
    %48 = vector.broadcast %46 : vector<16x1xf32> to vector<16x1024xf32>
    %49 = vector.broadcast %47 : vector<1x1024xf32> to vector<16x1024xf32>
    %50 = arith.mulf %48, %49 : vector<16x1024xf32>
    %51 = arith.addf %45, %50 : vector<16x1024xf32>
    %c0_12 = arith.constant 0 : index
    %c0_13 = arith.constant 0 : index
    %52 = vector.load %arg4[%c0_12, %c0_13] : memref<1x1024xf32, #tpu.memory_space<vmem>>, vector<1x1024xf32>
    %53 = vector.broadcast %52 : vector<1x1024xf32> to vector<16x1024xf32>
    %54 = arith.mulf %51, %53 : vector<16x1024xf32>
    %cst = arith.constant 0.402619958 : f32
    %55 = vector.broadcast %cst : f32 to vector<16x1024xf32>
    %56 = arith.mulf %55, %54 : vector<16x1024xf32>
    %cst_14 = arith.constant 0.251379132 : f32
    %57 = vector.broadcast %cst_14 : f32 to vector<16x1024xf32>
    %58 = arith.mulf %57, %54 : vector<16x1024xf32>
    %cst_15 = arith.constant 0.222548932 : f32
    %59 = vector.broadcast %cst_15 : f32 to vector<16x1024xf32>
    %60 = arith.mulf %59, %54 : vector<16x1024xf32>
    %cst_16 = arith.constant 0.212609425 : f32
    %61 = vector.broadcast %cst_16 : f32 to vector<16x1024xf32>
    %62 = arith.mulf %61, %54 : vector<16x1024xf32>
    %c8_i32 = arith.constant 8 : i32
    %63 = tpu.dynamic_rotate %54 by %c8_i32 dim 1 : vector<16x1024xf32>, i32 -> vector<16x1024xf32>
    %cst_17 = arith.constant 0.187627167 : f32
    %64 = vector.broadcast %cst_17 : f32 to vector<16x1024xf32>
    %65 = arith.mulf %64, %63 : vector<16x1024xf32>
    %66 = arith.addf %62, %65 : vector<16x1024xf32>
    %c6_i32 = arith.constant 6 : i32
    %67 = tpu.dynamic_rotate %54 by %c6_i32 dim 1 : vector<16x1024xf32>, i32 -> vector<16x1024xf32>
    %cst_18 = arith.constant 0.178203255 : f32
    %68 = vector.broadcast %cst_18 : f32 to vector<16x1024xf32>
    %69 = arith.mulf %68, %67 : vector<16x1024xf32>
    %70 = arith.addf %60, %69 : vector<16x1024xf32>
    %c4_i32 = arith.constant 4 : i32
    %71 = tpu.dynamic_rotate %54 by %c4_i32 dim 1 : vector<16x1024xf32>, i32 -> vector<16x1024xf32>
    %cst_19 = arith.constant 0.152469143 : f32
    %72 = vector.broadcast %cst_19 : f32 to vector<16x1024xf32>
    %73 = arith.mulf %72, %71 : vector<16x1024xf32>
    %74 = arith.addf %58, %73 : vector<16x1024xf32>
    %cst_20 = arith.constant 0.206068128 : f32
    %75 = vector.broadcast %cst_20 : f32 to vector<16x1024xf32>
    %76 = arith.mulf %75, %71 : vector<16x1024xf32>
    %77 = arith.addf %66, %76 : vector<16x1024xf32>
    %c3_i32 = arith.constant 3 : i32
    %78 = tpu.dynamic_rotate %54 by %c3_i32 dim 1 : vector<16x1024xf32>, i32 -> vector<16x1024xf32>
    %cst_21 = arith.constant 0.210522279 : f32
    %79 = vector.broadcast %cst_21 : f32 to vector<16x1024xf32>
    %80 = arith.mulf %79, %78 : vector<16x1024xf32>
    %81 = arith.addf %70, %80 : vector<16x1024xf32>
    %c2_i32 = arith.constant 2 : i32
    %82 = tpu.dynamic_rotate %54 by %c2_i32 dim 1 : vector<16x1024xf32>, i32 -> vector<16x1024xf32>
    %cst_22 = arith.constant 0.054488685 : f32
    %83 = vector.broadcast %cst_22 : f32 to vector<16x1024xf32>
    %84 = arith.mulf %83, %82 : vector<16x1024xf32>
    %85 = arith.addf %56, %84 : vector<16x1024xf32>
    %cst_23 = arith.constant 0.221841291 : f32
    %86 = vector.broadcast %cst_23 : f32 to vector<16x1024xf32>
    %87 = arith.mulf %86, %82 : vector<16x1024xf32>
    %88 = arith.addf %74, %87 : vector<16x1024xf32>
    %c1_i32 = arith.constant 1 : i32
    %89 = tpu.dynamic_rotate %54 by %c1_i32 dim 1 : vector<16x1024xf32>, i32 -> vector<16x1024xf32>
    %cst_24 = arith.constant 0.244201347 : f32
    %90 = vector.broadcast %cst_24 : f32 to vector<16x1024xf32>
    %91 = arith.mulf %90, %89 : vector<16x1024xf32>
    %92 = arith.addf %85, %91 : vector<16x1024xf32>
    %c1023_i32 = arith.constant 1023 : i32
    %93 = tpu.dynamic_rotate %54 by %c1023_i32 dim 1 : vector<16x1024xf32>, i32 -> vector<16x1024xf32>
    %cst_25 = arith.constant 0.244201347 : f32
    %94 = vector.broadcast %cst_25 : f32 to vector<16x1024xf32>
    %95 = arith.mulf %94, %93 : vector<16x1024xf32>
    %96 = arith.addf %92, %95 : vector<16x1024xf32>
    %c1022_i32 = arith.constant 1022 : i32
    %97 = tpu.dynamic_rotate %54 by %c1022_i32 dim 1 : vector<16x1024xf32>, i32 -> vector<16x1024xf32>
    %cst_26 = arith.constant 0.054488685 : f32
    %98 = vector.broadcast %cst_26 : f32 to vector<16x1024xf32>
    %99 = arith.mulf %98, %97 : vector<16x1024xf32>
    %100 = arith.addf %96, %99 : vector<16x1024xf32>
    %cst_27 = arith.constant 0.221841291 : f32
    %101 = vector.broadcast %cst_27 : f32 to vector<16x1024xf32>
    %102 = arith.mulf %101, %97 : vector<16x1024xf32>
    %103 = arith.addf %88, %102 : vector<16x1024xf32>
    %c1021_i32 = arith.constant 1021 : i32
    %104 = tpu.dynamic_rotate %54 by %c1021_i32 dim 1 : vector<16x1024xf32>, i32 -> vector<16x1024xf32>
    %cst_28 = arith.constant 0.210522279 : f32
    %105 = vector.broadcast %cst_28 : f32 to vector<16x1024xf32>
    %106 = arith.mulf %105, %104 : vector<16x1024xf32>
    %107 = arith.addf %81, %106 : vector<16x1024xf32>
    %c1020_i32 = arith.constant 1020 : i32
    %108 = tpu.dynamic_rotate %54 by %c1020_i32 dim 1 : vector<16x1024xf32>, i32 -> vector<16x1024xf32>
    %cst_29 = arith.constant 0.152469143 : f32
    %109 = vector.broadcast %cst_29 : f32 to vector<16x1024xf32>
    %110 = arith.mulf %109, %108 : vector<16x1024xf32>
    %111 = arith.addf %103, %110 : vector<16x1024xf32>
    %cst_30 = arith.constant 0.206068128 : f32
    %112 = vector.broadcast %cst_30 : f32 to vector<16x1024xf32>
    %113 = arith.mulf %112, %108 : vector<16x1024xf32>
    %114 = arith.addf %77, %113 : vector<16x1024xf32>
    %c1018_i32 = arith.constant 1018 : i32
    %115 = tpu.dynamic_rotate %54 by %c1018_i32 dim 1 : vector<16x1024xf32>, i32 -> vector<16x1024xf32>
    %cst_31 = arith.constant 0.178203255 : f32
    %116 = vector.broadcast %cst_31 : f32 to vector<16x1024xf32>
    %117 = arith.mulf %116, %115 : vector<16x1024xf32>
    %118 = arith.addf %107, %117 : vector<16x1024xf32>
    %c1016_i32 = arith.constant 1016 : i32
    %119 = tpu.dynamic_rotate %54 by %c1016_i32 dim 1 : vector<16x1024xf32>, i32 -> vector<16x1024xf32>
    %cst_32 = arith.constant 0.187627167 : f32
    %120 = vector.broadcast %cst_32 : f32 to vector<16x1024xf32>
    %121 = arith.mulf %120, %119 : vector<16x1024xf32>
    %122 = arith.addf %114, %121 : vector<16x1024xf32>
    %cst_33 = arith.constant 0.000000e+00 : f32
    %123 = vector.broadcast %cst_33 : f32 to vector<16x1024xf32>
    %cst_34 = arith.constant 0.402619958 : f32
    %124 = vector.broadcast %cst_34 : f32 to vector<16x1024xf32>
    %125 = arith.mulf %124, %100 : vector<16x1024xf32>
    %c64_i32 = arith.constant 64 : i32
    %126 = tpu.dynamic_rotate %100 by %c64_i32 dim 1 : vector<16x1024xf32>, i32 -> vector<16x1024xf32>
    %cst_35 = arith.constant 0.054488685 : f32
    %127 = vector.broadcast %cst_35 : f32 to vector<16x1024xf32>
    %128 = arith.mulf %127, %126 : vector<16x1024xf32>
    %129 = arith.addf %125, %128 : vector<16x1024xf32>
    %c32_i32 = arith.constant 32 : i32
    %130 = tpu.dynamic_rotate %100 by %c32_i32 dim 1 : vector<16x1024xf32>, i32 -> vector<16x1024xf32>
    %cst_36 = arith.constant 0.244201347 : f32
    %131 = vector.broadcast %cst_36 : f32 to vector<16x1024xf32>
    %132 = arith.mulf %131, %130 : vector<16x1024xf32>
    %133 = arith.addf %129, %132 : vector<16x1024xf32>
    %c992_i32 = arith.constant 992 : i32
    %134 = tpu.dynamic_rotate %100 by %c992_i32 dim 1 : vector<16x1024xf32>, i32 -> vector<16x1024xf32>
    %cst_37 = arith.constant 0.244201347 : f32
    %135 = vector.broadcast %cst_37 : f32 to vector<16x1024xf32>
    %136 = arith.mulf %135, %134 : vector<16x1024xf32>
    %137 = arith.addf %133, %136 : vector<16x1024xf32>
    %c960_i32 = arith.constant 960 : i32
    %138 = tpu.dynamic_rotate %100 by %c960_i32 dim 1 : vector<16x1024xf32>, i32 -> vector<16x1024xf32>
    %cst_38 = arith.constant 0.054488685 : f32
    %139 = vector.broadcast %cst_38 : f32 to vector<16x1024xf32>
    %140 = arith.mulf %139, %138 : vector<16x1024xf32>
    %141 = arith.addf %137, %140 : vector<16x1024xf32>
    %c0_39 = arith.constant 0 : index
    %c0_40 = arith.constant 0 : index
    %142 = vector.load %arg3[%c0_39, %c0_40] : memref<16x4xf32, #tpu.memory_space<vmem>>, vector<16x1xf32>
    %143 = vector.broadcast %142 : vector<16x1xf32> to vector<16x1024xf32>
    %144 = arith.mulf %143, %141 : vector<16x1024xf32>
    %145 = arith.addf %123, %144 : vector<16x1024xf32>
    %cst_41 = arith.constant 0.251379132 : f32
    %146 = vector.broadcast %cst_41 : f32 to vector<16x1024xf32>
    %147 = arith.mulf %146, %111 : vector<16x1024xf32>
    %c128_i32 = arith.constant 128 : i32
    %148 = tpu.dynamic_rotate %111 by %c128_i32 dim 1 : vector<16x1024xf32>, i32 -> vector<16x1024xf32>
    %cst_42 = arith.constant 0.152469143 : f32
    %149 = vector.broadcast %cst_42 : f32 to vector<16x1024xf32>
    %150 = arith.mulf %149, %148 : vector<16x1024xf32>
    %151 = arith.addf %147, %150 : vector<16x1024xf32>
    %c64_i32_43 = arith.constant 64 : i32
    %152 = tpu.dynamic_rotate %111 by %c64_i32_43 dim 1 : vector<16x1024xf32>, i32 -> vector<16x1024xf32>
    %cst_44 = arith.constant 0.221841291 : f32
    %153 = vector.broadcast %cst_44 : f32 to vector<16x1024xf32>
    %154 = arith.mulf %153, %152 : vector<16x1024xf32>
    %155 = arith.addf %151, %154 : vector<16x1024xf32>
    %c960_i32_45 = arith.constant 960 : i32
    %156 = tpu.dynamic_rotate %111 by %c960_i32_45 dim 1 : vector<16x1024xf32>, i32 -> vector<16x1024xf32>
    %cst_46 = arith.constant 0.221841291 : f32
    %157 = vector.broadcast %cst_46 : f32 to vector<16x1024xf32>
    %158 = arith.mulf %157, %156 : vector<16x1024xf32>
    %159 = arith.addf %155, %158 : vector<16x1024xf32>
    %c896_i32 = arith.constant 896 : i32
    %160 = tpu.dynamic_rotate %111 by %c896_i32 dim 1 : vector<16x1024xf32>, i32 -> vector<16x1024xf32>
    %cst_47 = arith.constant 0.152469143 : f32
    %161 = vector.broadcast %cst_47 : f32 to vector<16x1024xf32>
    %162 = arith.mulf %161, %160 : vector<16x1024xf32>
    %163 = arith.addf %159, %162 : vector<16x1024xf32>
    %c0_48 = arith.constant 0 : index
    %c1_49 = arith.constant 1 : index
    %164 = vector.load %arg3[%c0_48, %c1_49] : memref<16x4xf32, #tpu.memory_space<vmem>>, vector<16x1xf32>
    %165 = vector.broadcast %164 : vector<16x1xf32> to vector<16x1024xf32>
    %166 = arith.mulf %165, %163 : vector<16x1024xf32>
    %167 = arith.addf %145, %166 : vector<16x1024xf32>
    %cst_50 = arith.constant 0.222548932 : f32
    %168 = vector.broadcast %cst_50 : f32 to vector<16x1024xf32>
    %169 = arith.mulf %168, %118 : vector<16x1024xf32>
    %c192_i32 = arith.constant 192 : i32
    %170 = tpu.dynamic_rotate %118 by %c192_i32 dim 1 : vector<16x1024xf32>, i32 -> vector<16x1024xf32>
    %cst_51 = arith.constant 0.178203255 : f32
    %171 = vector.broadcast %cst_51 : f32 to vector<16x1024xf32>
    %172 = arith.mulf %171, %170 : vector<16x1024xf32>
    %173 = arith.addf %169, %172 : vector<16x1024xf32>
    %c96_i32 = arith.constant 96 : i32
    %174 = tpu.dynamic_rotate %118 by %c96_i32 dim 1 : vector<16x1024xf32>, i32 -> vector<16x1024xf32>
    %cst_52 = arith.constant 0.210522279 : f32
    %175 = vector.broadcast %cst_52 : f32 to vector<16x1024xf32>
    %176 = arith.mulf %175, %174 : vector<16x1024xf32>
    %177 = arith.addf %173, %176 : vector<16x1024xf32>
    %c928_i32 = arith.constant 928 : i32
    %178 = tpu.dynamic_rotate %118 by %c928_i32 dim 1 : vector<16x1024xf32>, i32 -> vector<16x1024xf32>
    %cst_53 = arith.constant 0.210522279 : f32
    %179 = vector.broadcast %cst_53 : f32 to vector<16x1024xf32>
    %180 = arith.mulf %179, %178 : vector<16x1024xf32>
    %181 = arith.addf %177, %180 : vector<16x1024xf32>
    %c832_i32 = arith.constant 832 : i32
    %182 = tpu.dynamic_rotate %118 by %c832_i32 dim 1 : vector<16x1024xf32>, i32 -> vector<16x1024xf32>
    %cst_54 = arith.constant 0.178203255 : f32
    %183 = vector.broadcast %cst_54 : f32 to vector<16x1024xf32>
    %184 = arith.mulf %183, %182 : vector<16x1024xf32>
    %185 = arith.addf %181, %184 : vector<16x1024xf32>
    %c0_55 = arith.constant 0 : index
    %c2_56 = arith.constant 2 : index
    %186 = vector.load %arg3[%c0_55, %c2_56] : memref<16x4xf32, #tpu.memory_space<vmem>>, vector<16x1xf32>
    %187 = vector.broadcast %186 : vector<16x1xf32> to vector<16x1024xf32>
    %188 = arith.mulf %187, %185 : vector<16x1024xf32>
    %189 = arith.addf %167, %188 : vector<16x1024xf32>
    %cst_57 = arith.constant 0.212609425 : f32
    %190 = vector.broadcast %cst_57 : f32 to vector<16x1024xf32>
    %191 = arith.mulf %190, %122 : vector<16x1024xf32>
    %c256_i32 = arith.constant 256 : i32
    %192 = tpu.dynamic_rotate %122 by %c256_i32 dim 1 : vector<16x1024xf32>, i32 -> vector<16x1024xf32>
    %cst_58 = arith.constant 0.187627167 : f32
    %193 = vector.broadcast %cst_58 : f32 to vector<16x1024xf32>
    %194 = arith.mulf %193, %192 : vector<16x1024xf32>
    %195 = arith.addf %191, %194 : vector<16x1024xf32>
    %c128_i32_59 = arith.constant 128 : i32
    %196 = tpu.dynamic_rotate %122 by %c128_i32_59 dim 1 : vector<16x1024xf32>, i32 -> vector<16x1024xf32>
    %cst_60 = arith.constant 0.206068128 : f32
    %197 = vector.broadcast %cst_60 : f32 to vector<16x1024xf32>
    %198 = arith.mulf %197, %196 : vector<16x1024xf32>
    %199 = arith.addf %195, %198 : vector<16x1024xf32>
    %c896_i32_61 = arith.constant 896 : i32
    %200 = tpu.dynamic_rotate %122 by %c896_i32_61 dim 1 : vector<16x1024xf32>, i32 -> vector<16x1024xf32>
    %cst_62 = arith.constant 0.206068128 : f32
    %201 = vector.broadcast %cst_62 : f32 to vector<16x1024xf32>
    %202 = arith.mulf %201, %200 : vector<16x1024xf32>
    %203 = arith.addf %199, %202 : vector<16x1024xf32>
    %c768_i32 = arith.constant 768 : i32
    %204 = tpu.dynamic_rotate %122 by %c768_i32 dim 1 : vector<16x1024xf32>, i32 -> vector<16x1024xf32>
    %cst_63 = arith.constant 0.187627167 : f32
    %205 = vector.broadcast %cst_63 : f32 to vector<16x1024xf32>
    %206 = arith.mulf %205, %204 : vector<16x1024xf32>
    %207 = arith.addf %203, %206 : vector<16x1024xf32>
    %c0_64 = arith.constant 0 : index
    %c3_65 = arith.constant 3 : index
    %208 = vector.load %arg3[%c0_64, %c3_65] : memref<16x4xf32, #tpu.memory_space<vmem>>, vector<16x1xf32>
    %209 = vector.broadcast %208 : vector<16x1xf32> to vector<16x1024xf32>
    %210 = arith.mulf %209, %207 : vector<16x1024xf32>
    %211 = arith.addf %189, %210 : vector<16x1024xf32>
    %cst_66 = arith.constant 5.000000e-01 : f32
    %212 = vector.broadcast %cst_66 : f32 to vector<16x1024xf32>
    %213 = arith.mulf %212, %211 : vector<16x1024xf32>
    %214 = math.tanh %213 : vector<16x1024xf32>
    %cst_67 = arith.constant 5.000000e-01 : f32
    %215 = vector.broadcast %cst_67 : f32 to vector<16x1024xf32>
    %216 = arith.mulf %215, %214 : vector<16x1024xf32>
    %cst_68 = arith.constant 1.500000e+00 : f32
    %217 = vector.broadcast %cst_68 : f32 to vector<16x1024xf32>
    %218 = arith.addf %217, %216 : vector<16x1024xf32>
    %219 = arith.mulf %54, %218 : vector<16x1024xf32>
    %cst_69 = arith.constant 5.000000e-01 : f32
    %220 = vector.broadcast %cst_69 : f32 to vector<16x1024xf32>
    %221 = arith.mulf %220, %219 : vector<16x1024xf32>
    %222 = math.tanh %221 : vector<16x1024xf32>
    %cst_70 = arith.constant 5.000000e-01 : f32
    %223 = vector.broadcast %cst_70 : f32 to vector<16x1024xf32>
    %224 = arith.mulf %223, %222 : vector<16x1024xf32>
    %cst_71 = arith.constant 5.000000e-01 : f32
    %225 = vector.broadcast %cst_71 : f32 to vector<16x1024xf32>
    %226 = arith.addf %225, %224 : vector<16x1024xf32>
    %227 = arith.mulf %219, %226 : vector<16x1024xf32>
    %228 = vector.extract_strided_slice %227 {offsets = [0, 256], sizes = [16, 512], strides = [1, 1]} : vector<16x1024xf32> to vector<16x512xf32>
    %c0_72 = arith.constant 0 : index
    %c0_73 = arith.constant 0 : index
    %229 = vector.load %arg6[%c0_72, %c0_73] : memref<16x512xf32, #tpu.memory_space<vmem>>, vector<16x512xf32>
    tpu.vector_store %arg6[%c0_72, %c0_73], %228 {strides = array<i32>} : memref<16x512xf32, #tpu.memory_space<vmem>>, vector<16x512xf32>,
    return
  }
  func.func @transform_0(%arg0: i32) -> (i32, i32) {
    %c0_i32 = arith.constant 0 : i32
    %c0_i32_0 = arith.constant 0 : i32
    %c0_i32_1 = arith.constant 0 : i32
    return %c0_i32, %c0_i32_0 : i32, i32
  }
  func.func @transform_1(%arg0: i32) -> (i32, i32) {
    %c0_i32 = arith.constant 0 : i32
    %c0_i32_0 = arith.constant 0 : i32
    %c0_i32_1 = arith.constant 0 : i32
    return %c0_i32, %c0_i32_0 : i32, i32
  }
  func.func @transform_2(%arg0: i32) -> (i32, i32) {
    %c0_i32 = arith.constant 0 : i32
    %c0_i32_0 = arith.constant 0 : i32
    return %arg0, %c0_i32 : i32, i32
  }
  func.func @transform_3(%arg0: i32) -> (i32, i32) {
    %c0_i32 = arith.constant 0 : i32
    %c0_i32_0 = arith.constant 0 : i32
    %c0_i32_1 = arith.constant 0 : i32
    return %c0_i32, %c0_i32_0 : i32, i32
  }
  func.func @transform_4(%arg0: i32) -> (i32, i32) {
    %c0_i32 = arith.constant 0 : i32
    %c0_i32_0 = arith.constant 0 : i32
    return %arg0, %c0_i32 : i32, i32
  }
  func.func @transform_5(%arg0: i32) -> (i32, i32) {
    %c0_i32 = arith.constant 0 : i32
    %c0_i32_0 = arith.constant 0 : i32
    return %arg0, %c0_i32 : i32, i32
  }
}

</mosaic_0001>

<bundles_post_ra>
// kernel: tpu_custom_call.1
= control target key start
LH: loop header
LB: loop body
LE: loop exit
PB: predicated region body
PF: predicated region fallthrough
CT: control target
= control target key end

     0   :  { %10 = vsyncpa [#allocation3], 0  ;;  %s5648_s0 = inlined_call_operand.vmem [shape: f32[16,8], index: 0, kind: input, shape index: {}]   ;;  %s5649_s1 = inlined_call_operand.vmem [shape: f32[16,1], index: 1, kind: input, shape index: {}]   ;;  %s5650_s2 = inlined_call_operand.vmem [shape: f32[16,4], index: 2, kind: input, shape index: {}]   ;;  %s5651_s3 = inlined_call_operand.vmem [shape: f32[1,1024], index: 3, kind: input, shape index: {}]   ;;  %s5652_s4 = inlined_call_operand.hbm [shape: f32[8,1024], index: 4, kind: input, shape index: {}]   ;;  %s5653_s5 = inlined_call_operand.hbm [shape: f32[16,512], index: 5, kind: output, shape index: {}]  }
   0x1   :  { %11 = vsyncpa [#allocation4], 0  ;;  %s25_s20 = sshll.u32 %s5652_s4, 4  ;;  %s2469_s21 = smov [#allocation2]   ;;  %s26_s20 = int_to_ptr.hbm [resolvable:$true] %s25_s20 }
   0x2   :  { %s27_s22 = sshll.u32 %s2469_s21, 4  ;;  %s28_s22 = int_to_ptr.vmem [resolvable:$true] %s27_s22 }
   0x3   :  { %30 = dma.hbm_to_vmem [thread:$0]  %s26_s20, 1024, %s28_s22, [#allocation3]  }
   0x4   :  { %2465 = dma.done.wait [#allocation3], 1024  }
   0x5   :  { %2466 = vsyncadd [#allocation3], 4294966272  ;;  %v5656_v0 = vmov 2   ;;  %v2471_v1 = vmov 0   ;;  %v5658_v2 = vmov 1   ;;  %v35_v3 = vld [vmem:[%s5648_s0] sm:$0xff] }
   0x6   :  { %2364 = vset.pattern.permute.xlu0 %v5656_v0  ;;  %2362 = vset.pattern.permute.xlu1 %v2471_v1  ;;  %v36_v4 = vld [vmem:[%s5648_s0 + $0x8] sm:$0xff]  ;;  %v2473_v5 = vmov 4   ;;  %v2474_v6 = vmov 7   ;;  %v5654_v7 = vmov 3   ;;  %v37_v8 = vld [vmem:[%s5649_s1] sm:$0xff]  ;;  %v2476_v10 = vmov 5  }
   0x7   :  { %2363 = vset.pattern.permute.xlu2 %v5658_v2  ;;  %177 = vperm.xlu0 %2364, %v35_v3   ;;  %v38_v9 = vld [vmem:[%s5649_s1 + $0x8] sm:$0xff]  ;;  %v2477_v11 = vmov 6   ;;  %s2479_s30 = smov 6   ;;  %s2480_s6 = smov 4  }
   0x8   :  { %54 = vperm.xlu1 %2362, %v35_v3   ;;  %116 = vperm.xlu2 %2363, %v35_v3   ;;  %v112_v12 = vld [vmem:[#allocation2 + $0x1] ss:$8 sm:$0xf]  ;;  %v49_v17 = vld [vmem:[#allocation2] ss:$8 sm:$0xf] }
   0x9   :  { %v113_v13 = vld [vmem:[#allocation2 + $0x1] ss:$8 sm:$0xf0]  ;;  %v50_v18 = vld [vmem:[#allocation2] ss:$8 sm:$0xf0] }
   0xa   :  { %v2548_v15 = vor.u32 %v113_v13, %v112_v12  ;;  %v2552_v20 = vor.u32 %v50_v18, %v49_v17  ;;  %v173_v21 = vld [vmem:[#allocation2 + $0x2] ss:$8 sm:$0xf]  ;;  %v295_v36 = vld [vmem:[#allocation2 + $0x4] ss:$8 sm:$0xf] }
   0xb   :  { %v174_v22 = vld [vmem:[#allocation2 + $0x2] ss:$8 sm:$0xf0]  ;;  %v296_v37 = vld [vmem:[#allocation2 + $0x4] ss:$8 sm:$0xf0] }
   0xc   :  { %v124_v23 = vperm.slane %v2548_v15, 0  ;;  %v125_v24 = vperm.slane %v2548_v15, 1  ;;  %v126_v25 = vperm.slane %v2548_v15, 2  ;;  %v127_v26 = vperm.slane %v2548_v15, 3  ;;  %s2481_s7 = smov 3   ;;  %s2482_s8 = smov 2  }
   0xd   :  { %v128_v27 = vperm.slane %v2548_v15, 4  ;;  %v129_v28 = vperm.slane %v2548_v15, 5  ;;  %v130_v29 = vperm.slane %v2548_v15, 6  ;;  %v131_v30 = vperm.slane %v2548_v15, 7  ;;  %s2483_s9 = smov 1   ;;  %s2484_s10 = smov 127  }
   0xe   :  { %v2562_v31 = vor.u32 %v174_v22, %v173_v21  ;;  %v5682_v32 = vperm.slane %v2552_v20, 0  ;;  %v5680_v33 = vperm.slane %v2552_v20, 1  ;;  %v5679_v34 = vperm.slane %v2552_v20, 2  ;;  %v234_v53 = vld [vmem:[#allocation2 + $0x3] ss:$8 sm:$0xf] }
   0xf   :  { %2369 = vset.pattern.permute.xlu0 %v2473_v5  ;;  %v5677_v35 = vperm.slane %v2552_v20, 3  ;;  %v5674_v39 = vperm.slane %v2552_v20, 4  ;;  %v5672_v40 = vperm.slane %v2552_v20, 5  ;;  %v5668_v41 = vperm.slane %v2552_v20, 6  ;;  %s2485_s11 = smov 126   ;;  %s2486_s12 = smov 125  }
  0x10   :  { %59 = vperm.xlu1 %2362, %v36_v4   ;;  %303 = vperm.xlu0 %2369, %v36_v4   ;;  %v5671_v42 = vperm.slane %v2552_v20, 7  ;;  %v5669_v43 = vperm.slane %v2562_v31, 0  ;;  %v5670_v44 = vperm.slane %v2562_v31, 1  ;;  %v5673_v45 = vperm.slane %v2562_v31, 2  ;;  %s2487_s13 = smov 124   ;;  %s2488_s14 = smov 122  }
  0x11   :  { %120 = vperm.xlu2 %2363, %v36_v4   ;;  %v5675_v46 = vperm.slane %v2562_v31, 3  ;;  %v5676_v49 = vperm.slane %v2562_v31, 4  ;;  %v5678_v50 = vperm.slane %v2562_v31, 5  ;;  %v5681_v51 = vperm.slane %v2562_v31, 6  ;;  %s2489_s15 = smov 120   ;;  %s2490_s16 = smov 64  }
  0x12   :  { %v2583_v52 = vor.u32 %v296_v37, %v295_v36  ;;  %v235_v54 = vld [vmem:[#allocation2 + $0x3] ss:$8 sm:$0xf0]  ;;  %v5683_v58 = vperm.slane %v2562_v31, 7  ;;  %s2491_s17 = smov 32   ;;  %s2492_s18 = smov 96  }
  0x13   :  { %v478_v63 = vld [vmem:[#allocation2 + $0x7] ss:$8 sm:$0xf]  ;;  %s2323_s24 = sshll.u32 %s5653_s5, 4  ;;  %s2493_s4 = smov [#allocation5]   ;;  %s2324_s24 = int_to_ptr.hbm [resolvable:$true] %s2323_s24 }
  0x14   :  { %5833 = vst [vmem:[#allocation9_spill] sm:$0xff] %v2583_v52  ;;  %s2321_s25 = sshll.u32 %s2493_s4, 4  ;;  %s2494_s26 = smov 512   ;;  %s2322_s25 = int_to_ptr.vmem [resolvable:$true] %s2321_s25 }
  0x18   :  { %2365 = vset.pattern.permute.xlu1 %v5656_v0  ;;  %2374 = vset.pattern.permute.xlu0 %v2474_v6 }
  0x19   :  { %181 = vperm.xlu1 %2365, %v36_v4   ;;  %482 = vperm.xlu0 %2374, %v35_v3  }
  0x1a   :  { %2366 = vset.pattern.permute.xlu2 %v5654_v7 }
  0x1b   :  { %238 = vperm.xlu2 %2366, %v35_v3  }
  0x21   :  { %2367 = vset.pattern.permute.xlu1 %v5654_v7  ;;  %2375 = vset.pattern.permute.xlu0 %v2471_v1 }
  0x22   :  { %242 = vperm.xlu1 %2367, %v36_v4   ;;  %41 = vperm.xlu0 %2375, %v37_v8   ;;  %v5686_v8 = vperm.slane %v2583_v52, 2 }
  0x23   :  { %2368 = vset.pattern.permute.xlu2 %v2473_v5  ;;  %v5685_v5 = vperm.slane %v2583_v52, 1 }
  0x24   :  { %299 = vperm.xlu2 %2368, %v35_v3  }
  0x2a   :  { %2370 = vset.pattern.permute.xlu1 %v2476_v10  ;;  %46 = vperm.xlu0 %2375, %v38_v9  }
  0x2b   :  { %360 = vperm.xlu1 %2370, %v35_v3  }
  0x2c   :  { %2371 = vset.pattern.permute.xlu2 %v2476_v10 }
  0x2d   :  { %364 = vperm.xlu2 %2371, %v36_v4  }
  0x33   :  { %2372 = vset.pattern.permute.xlu1 %v2477_v11 }
  0x34   :  { %421 = vperm.xlu1 %2372, %v35_v3  }
  0x35   :  { %2373 = vset.pattern.permute.xlu2 %v2477_v11 }
  0x36   :  { %425 = vperm.xlu2 %2373, %v36_v4  }
  0x3c   :  { %2376 = vset.pattern.permute.xlu1 %v2474_v6  ;;  %v2604_v6 = vor.u32 %v235_v54, %v234_v53 }
  0x3d   :  { %486 = vperm.xlu1 %2376, %v36_v4   ;;  %v5684_v4 = vperm.slane %v2583_v52, 0 }
  0x3e   :  { %2382 = vset.pattern.permute.xlu2 %v5654_v7  ;;  %v5665_v54 = vperm.slane %v2604_v6, 0  ;;  %v5666_v0 = vperm.slane %v2604_v6, 7 }
  0x45   :  { %2377 = vset.pattern.permute.xlu1 %v2471_v1  ;;  %v479_v1 = vld [vmem:[#allocation2 + $0x7] ss:$8 sm:$0xf0] }
  0x62   :  { %v117_v16 = vpop.permute.xlu2 %116 }
  0x63   :  { %v2585_v55 = vmul.f32 %v124_v23, %v117_v16  ;;  %v2587_v56 = vmul.f32 %v125_v24, %v117_v16  ;;  %v2589_v57 = vmul.f32 %v126_v25, %v117_v16  ;;  %v2592_v59 = vmul.f32 %v127_v26, %v117_v16 }
  0x64   :  { %v2594_v60 = vmul.f32 %v128_v27, %v117_v16  ;;  %v2596_v61 = vmul.f32 %v129_v28, %v117_v16  ;;  %v2598_v62 = vmul.f32 %v130_v29, %v117_v16  ;;  %v2600_v3 = vmul.f32 %v131_v30, %v117_v16 }
  0x65   :  { %v2614_v16 = vor.u32 %v479_v1, %v478_v63  ;;  %v5660_v63 = vperm.slane %v2604_v6, 1 }
  0x66   :  { %5834 = vst [vmem:[#allocation10_spill] sm:$0xff] %v2600_v3 }
  0x67   :  { %5835 = vst [vmem:[#allocation11_spill] sm:$0xff] %v2614_v16  ;;  %v5894_v3 = vperm.slane %v2614_v16, 2 }
  0x6b   :  { %v121_v47 = vpop.permute.xlu2 %120 }
  0x6c   :  { %v2610_v12 = vmul.f32 %v124_v23, %v121_v47  ;;  %v2616_v17 = vmul.f32 %v125_v24, %v121_v47  ;;  %v2618_v18 = vmul.f32 %v126_v25, %v121_v47  ;;  %v2620_v21 = vmul.f32 %v127_v26, %v121_v47 }
  0x6d   :  { %v2622_v22 = vmul.f32 %v128_v27, %v121_v47  ;;  %v2626_v53 = vmul.f32 %v129_v28, %v121_v47  ;;  %v2628_v23 = vmul.f32 %v130_v29, %v121_v47  ;;  %v5661_v24 = vperm.slane %v2604_v6, 2 }
  0x6e   :  { %v5662_v25 = vperm.slane %v2604_v6, 3  ;;  %v5663_v26 = vperm.slane %v2604_v6, 4  ;;  %v5664_v27 = vperm.slane %v2604_v6, 5  ;;  %v2638_v7 = vmul.f32 %v131_v30, %v121_v47 }
  0x6f   :  { %5837 = vst [vmem:[#allocation13_spill] sm:$0xff] %v2626_v53  ;;  %v5667_v29 = vperm.slane %v2604_v6, 6 }
  0x70   :  { %5838 = vst [vmem:[#allocation14_spill] sm:$0xff] %v2628_v23  ;;  %v5853_v23 = vperm.slane %v2583_v52, 6 }
  0x71   :  { %5839 = vst [vmem:[#allocation15_spill] sm:$0xff] %v2638_v7 }
  0x75   :  { %v239_v37 = vpop.permute.xlu2 %238 }
  0x76   :  { %v2651_v30 = vmul.f32 %v5665_v54, %v239_v37  ;;  %v2655_v47 = vmul.f32 %v5660_v63, %v239_v37  ;;  %v2659_v2 = vmul.f32 %v5661_v24, %v239_v37  ;;  %v2663_v13 = vmul.f32 %v5662_v25, %v239_v37 }
  0x77   :  { %v2667_v10 = vmul.f32 %v5663_v26, %v239_v37  ;;  %v2671_v9 = vmul.f32 %v5664_v27, %v239_v37  ;;  %v2681_v25 = vmul.f32 %v5667_v29, %v239_v37  ;;  %v2685_v26 = vmul.f32 %v5666_v0, %v239_v37 }
  0x79   :  { %v2546_v14 = vpop.permute.xlu0 %177  ;;  %5840 = vst [vmem:[#allocation16_spill] sm:$0xff] %v2667_v10 }
  0x7a   :  { %v2550_v19 = vpop.permute.xlu1 %54  ;;  %5841 = vst [vmem:[#allocation17_spill] sm:$0xff] %v2671_v9  ;;  %v2720_v15 = vmul.f32 %v5669_v43, %v2546_v14  ;;  %v2725_v28 = vmul.f32 %v5670_v44, %v2546_v14  ;;  %v2740_v43 = vmul.f32 %v5676_v49, %v2546_v14  ;;  %v2745_v44 = vmul.f32 %v5678_v50, %v2546_v14 }
  0x7b   :  { %v79_v63 = vmul.f32 %v5682_v32, %v2550_v19  ;;  %v80_v24 = vmul.f32 %v5680_v33, %v2550_v19  ;;  %5842 = vst [vmem:[#allocation18_spill] sm:$0xff] %v2681_v25  ;;  %v2690_v27 = vmul.f32 %v5679_v34, %v2550_v19  ;;  %v2695_v54 = vmul.f32 %v5677_v35, %v2550_v19 }
  0x7c   :  { %5843 = vst [vmem:[#allocation19_spill] sm:$0xff] %v2685_v26  ;;  %v2700_v11 = vmul.f32 %v5674_v39, %v2550_v19  ;;  %v2705_v37 = vmul.f32 %v5672_v40, %v2550_v19  ;;  %v2710_v0 = vmul.f32 %v5668_v41, %v2550_v19  ;;  %v2715_v29 = vmul.f32 %v5671_v42, %v2550_v19  ;;  %v357_v39 = vld [vmem:[#allocation2 + $0x5] ss:$8 sm:$0xf0] }
  0x7d   :  { %v2730_v41 = vmul.f32 %v5673_v45, %v2546_v14  ;;  %v2735_v19 = vmul.f32 %v5675_v46, %v2546_v14  ;;  %v356_v45 = vld [vmem:[#allocation2 + $0x5] ss:$8 sm:$0xf]  ;;  %v2752_v46 = vmul.f32 %v5681_v51, %v2546_v14  ;;  %v2757_v49 = vmul.f32 %v5683_v58, %v2546_v14 }
  0x7e   :  { %v300_v40 = vpop.permute.xlu2 %299  ;;  %v5846_v51 = vperm.slane %v2583_v52, 3  ;;  %v5848_v14 = vperm.slane %v2583_v52, 4  ;;  %v5855_v25 = vperm.slane %v2583_v52, 7 }
  0x7f   :  { %5844 = vst [vmem:[#allocation20_spill] sm:$0xff] %v2752_v46  ;;  %v2761_v35 = vmul.f32 %v5684_v4, %v300_v40  ;;  %v2765_v50 = vmul.f32 %v5685_v5, %v300_v40  ;;  %v2771_v33 = vmul.f32 %v5686_v8, %v300_v40  ;;  %v5850_v4 = vperm.slane %v2583_v52, 5  ;;  %v418_v46 = vld [vmem:[#allocation2 + $0x6] ss:$8 sm:$0xf0] }
  0x80   :  { %5845 = vst [vmem:[#allocation21_spill] sm:$0xff] %v2757_v49  ;;  %v2775_v32 = vmul.f32 %v5846_v51, %v300_v40  ;;  %v2779_v58 = vmul.f32 %v5848_v14, %v300_v40  ;;  %v5852_v5 = vperm.slane %v2552_v20, 0  ;;  %v2790_v8 = vmul.f32 %v5853_v23, %v300_v40 }
  0x81   :  { %v2783_v26 = vmul.f32 %v5850_v4, %v300_v40  ;;  %v2794_v51 = vmul.f32 %v5855_v25, %v300_v40  ;;  %v2796_v49 = vor.u32 %v357_v39, %v356_v45  ;;  %v5857_v14 = vperm.slane %v2552_v20, 1 }
  0x82   :  { %v2568_v38 = vpop.permute.xlu0 %303  ;;  %v2578_v48 = vpop.permute.xlu1 %59  ;;  %5847 = vst [vmem:[#allocation22_spill] sm:$0xff] %v2775_v32  ;;  %v5858_v4 = vperm.slane %v2552_v20, 2  ;;  %v5860_v23 = vperm.slane %v2552_v20, 4  ;;  %v5861_v39 = vperm.slane %v2552_v20, 5  ;;  %v5862_v25 = vperm.slane %v2552_v20, 6 }
  0x83   :  { %5832 = vst [vmem:[#allocation8_spill] sm:$0xff] %v2568_v38  ;;  %v87_v7 = vmul.f32 %v5852_v5, %v2578_v48  ;;  %v5859_v5 = vperm.slane %v2552_v20, 3  ;;  %v368_v32 = vperm.slane %v2796_v49, 0 }
  0x84   :  { %5849 = vst [vmem:[#allocation23_spill] sm:$0xff] %v2779_v58  ;;  %v88_v58 = vmul.f32 %v5857_v14, %v2578_v48  ;;  %v2812_v40 = vmul.f32 %v5860_v23, %v2578_v48  ;;  %v2817_v45 = vmul.f32 %v5861_v39, %v2578_v48  ;;  %v2822_v14 = vmul.f32 %v5862_v25, %v2578_v48 }
  0x85   :  { %5851 = vst [vmem:[#allocation24_spill] sm:$0xff] %v2783_v26  ;;  %v89_v26 = vmul.f32 %v5858_v4, %v2578_v48  ;;  %v2807_v53 = vmul.f32 %v5859_v5, %v2578_v48  ;;  %v5864_v4 = vperm.slane %v2552_v20, 7  ;;  %v5866_v23 = vperm.slane %v2583_v52, 0 }
  0x86   :  { %5854 = vst [vmem:[#allocation25_spill] sm:$0xff] %v2790_v8  ;;  %v5867_v39 = vperm.slane %v2583_v52, 1  ;;  %v5868_v25 = vperm.slane %v2583_v52, 2  ;;  %v5870_v20 = vperm.slane %v2583_v52, 3 }
  0x87   :  { %5856 = vst [vmem:[#allocation26_spill] sm:$0xff] %v2794_v51  ;;  %v2827_v5 = vmul.f32 %v5864_v4, %v2578_v48  ;;  %v2833_v8 = vmul.f32 %v5866_v23, %v2568_v38  ;;  %v5874_v23 = vperm.slane %v2583_v52, 5 }
  0x88   :  { %5863 = vst [vmem:[#allocation27_spill] sm:$0xff] %v2822_v14  ;;  %v2838_v9 = vmul.f32 %v5867_v39, %v2568_v38  ;;  %v2843_v14 = vmul.f32 %v5868_v25, %v2568_v38  ;;  %v2848_v48 = vmul.f32 %v5870_v20, %v2568_v38 }
  0x89   :  { %5865 = vst [vmem:[#allocation28_spill] sm:$0xff] %v2827_v5  ;;  %v2858_v39 = vmul.f32 %v5874_v23, %v2568_v38  ;;  %v5876_v5 = vperm.slane %v2583_v52, 6 }
  0x8a   :  { %5869 = vst [vmem:[#allocation29_spill] sm:$0xff] %v2843_v14  ;;  %v5880_v14 = vperm.slane %v2562_v31, 2 }
  0x8b   :  { %v2624_v36 = vpop.permute.xlu0 %482  ;;  %v2632_v1 = vpop.permute.xlu1 %181  ;;  %5871 = vst [vmem:[#allocation30_spill] sm:$0xff] %v2848_v48  ;;  %v2863_v25 = vmul.f32 %v5876_v5, %v2568_v38  ;;  %v5878_v5 = vperm.slane %v2562_v31, 0 }
  0x8c   :  { %5836 = vst [vmem:[#allocation12_spill] sm:$0xff] %v2624_v36 }
  0x8d   :  { %5875 = vst [vmem:[#allocation32_spill] sm:$0xff] %v2858_v39 }
  0x8e   :  { %5877 = vst [vmem:[#allocation33_spill] sm:$0xff] %v2863_v25  ;;  %v209_v25 = vmul.f32 %v5878_v5, %v2632_v1  ;;  %v5883_v5 = vperm.slane %v2562_v31, 4 }
  0x90   :  { %v2896_v23 = vmul.f32 %v5883_v5, %v2632_v1  ;;  %v5891_v5 = vperm.slane %v2614_v16, 0 }
  0x92   :  { %5884 = vst [vmem:[#allocation35_spill] sm:$0xff] %v2896_v23  ;;  %v2916_v23 = vmul.f32 %v5891_v5, %v2624_v36 }
  0x94   :  { %v2747_v42 = vpop.permute.xlu0 %41  ;;  %v2767_v34 = vpop.permute.xlu1 %242 }
  0x95   :  { %v95_v51 = vadd.f32 %v79_v63, %v2747_v42  ;;  %v5872_v63 = vperm.slane %v2583_v52, 4  ;;  %v96_v20 = vadd.f32 %v80_v24, %v2747_v42  ;;  %v5879_v24 = vperm.slane %v2562_v31, 1 }
  0x96   :  { %v5881_v52 = vperm.slane %v2562_v31, 3 }
  0x97   :  { %v2853_v4 = vmul.f32 %v5872_v63, %v2568_v38  ;;  %v210_v48 = vmul.f32 %v5879_v24, %v2632_v1  ;;  %v2883_v63 = vmul.f32 %v5880_v14, %v2632_v1  ;;  %v5885_v24 = vperm.slane %v2562_v31, 5 }
  0x98   :  { %v2891_v39 = vmul.f32 %v5881_v52, %v2632_v1  ;;  %v5887_v14 = vperm.slane %v2562_v31, 6  ;;  %v5889_v52 = vperm.slane %v2562_v31, 7  ;;  %v2929_v31 = vmul.f32 %v5894_v3, %v2624_v36 }
  0x99   :  { %5873 = vst [vmem:[#allocation31_spill] sm:$0xff] %v2853_v4  ;;  %v156_v4 = vadd.f32 %v2585_v55, %v95_v51  ;;  %v2901_v38 = vmul.f32 %v5885_v24, %v2632_v1  ;;  %v417_v51 = vld [vmem:[#allocation2 + $0x6] ss:$8 sm:$0xf]  ;;  %v5892_v24 = vperm.slane %v2614_v16, 1  ;;  %v97_v3 = vadd.f32 %v2690_v27, %v2747_v42 }
  0x9a   :  { %5882 = vst [vmem:[#allocation34_spill] sm:$0xff] %v2891_v39  ;;  %v2906_v10 = vmul.f32 %v5887_v14, %v2632_v1  ;;  %v2911_v39 = vmul.f32 %v5889_v52, %v2632_v1  ;;  %v157_v14 = vadd.f32 %v2587_v56, %v96_v20  ;;  %v5898_v56 = vperm.slane %v2614_v16, 4 }
  0x9b   :  { %5886 = vst [vmem:[#allocation36_spill] sm:$0xff] %v2901_v38  ;;  %v2921_v38 = vmul.f32 %v5892_v24, %v2624_v36  ;;  %v217_v1 = vadd.f32 %v2720_v15, %v156_v4  ;;  %v2948_v15 = vor.u32 %v418_v46, %v417_v51  ;;  %v5901_v4 = vperm.slane %v2796_v49, 1 }
  0x9c   :  { %v2885_v55 = vpop.permute.xlu0 %46  ;;  %5888 = vst [vmem:[#allocation37_spill] sm:$0xff] %v2906_v10  ;;  %v2942_v20 = vmul.f32 %v5898_v56, %v2624_v36  ;;  %v5902_v27 = vperm.slane %v2796_v49, 2  ;;  %v5904_v46 = vperm.slane %v2796_v49, 3 }
  0x9d   :  { %5890 = vst [vmem:[#allocation38_spill] sm:$0xff] %v2911_v39  ;;  %v2924_v10 = vpop.permute.xlu1 %360  ;;  %v103_v52 = vadd.f32 %v87_v7, %v2885_v55  ;;  %v104_v5 = vadd.f32 %v88_v58, %v2885_v55  ;;  %v5896_v39 = vperm.slane %v2614_v16, 3  ;;  %v2953_v7 = vld [vmem:[%s5651_s3] sm:$0xff]  ;;  %s2478_s3 = smov 8  }
  0x9e   :  { %5893 = vst [vmem:[#allocation39_spill] sm:$0xff] %v2921_v38 }
  0x9f   :  { %5895 = vst [vmem:[#allocation40_spill] sm:$0xff] %v2929_v31  ;;  %v2937_v24 = vmul.f32 %v5896_v39, %v2624_v36  ;;  %v2946_v31 = vpop.permute.xlu2 %364  ;;  %v218_v36 = vadd.f32 %v2725_v28, %v157_v14  ;;  %v158_v14 = vadd.f32 %v2589_v57, %v97_v3  ;;  %v100_v57 = vadd.f32 %v2705_v37, %v2747_v42 }
  0xa0   :  { %5899 = vst [vmem:[#allocation42_spill] sm:$0xff] %v2942_v20  ;;  %v2956_v58 = vmul.f32 %v368_v32, %v2946_v31  ;;  %v2961_v39 = vmul.f32 %v5901_v4, %v2946_v31  ;;  %v2966_v56 = vmul.f32 %v5902_v27, %v2946_v31  ;;  %v2971_v51 = vmul.f32 %v5904_v46, %v2946_v31 }
  0xa1   :  { %5897 = vst [vmem:[#allocation41_spill] sm:$0xff] %v2937_v24  ;;  %v105_v20 = vadd.f32 %v89_v26, %v2885_v55  ;;  %v5905_v24 = vperm.slane %v2796_v49, 4  ;;  %v5907_v4 = vperm.slane %v2796_v49, 5  ;;  %v278_v27 = vadd.f32 %v2651_v30, %v217_v1 }
  0xa2   :  { %5900 = vst [vmem:[#allocation43_spill] sm:$0xff] %v2946_v31  ;;  %v165_v46 = vadd.f32 %v2616_v17, %v104_v5  ;;  %v98_v26 = vadd.f32 %v2695_v54, %v2747_v42  ;;  %v430_v30 = vperm.slane %v2948_v15, 1  ;;  %v5908_v1 = vperm.slane %v2604_v6, 0 }
  0xa3   :  { %5903 = vst [vmem:[#allocation44_spill] sm:$0xff] %v2966_v56  ;;  %v2978_v16 = vmul.f32 %v5905_v24, %v2946_v31  ;;  %v2983_v38 = vmul.f32 %v5907_v4, %v2946_v31  ;;  %v164_v56 = vadd.f32 %v2610_v12, %v103_v52  ;;  %v429_v24 = vperm.slane %v2948_v15, 0 }
  0xa4   :  { %v99_v4 = vadd.f32 %v2700_v11, %v2747_v42  ;;  %v270_v52 = vmul.f32 %v5908_v1, %v2767_v34  ;;  %v279_v54 = vadd.f32 %v2655_v47, %v218_v36  ;;  %v166_v5 = vadd.f32 %v2618_v18, %v105_v20 }
  0xa5   :  { %5906 = vst [vmem:[#allocation45_spill] sm:$0xff] %v2978_v16  ;;  %v339_v3 = vadd.f32 %v2761_v35, %v278_v27  ;;  %v225_v11 = vadd.f32 %v209_v25, %v164_v56  ;;  %v226_v16 = vadd.f32 %v210_v48, %v165_v46  ;;  %v384_v28 = vmul.f32 %v368_v32, %v2924_v10 }
  0xa6   :  { %v5909_v17 = vperm.slane %v2604_v6, 1  ;;  %v5910_v1 = vperm.slane %v2604_v6, 2  ;;  %v159_v37 = vadd.f32 %v2592_v59, %v98_v26  ;;  %v219_v36 = vadd.f32 %v2730_v41, %v158_v14  ;;  %v3016_v47 = vpop.permute.xlu1 %421 }
  0xa7   :  { %v5911_v35 = vperm.slane %v2604_v6, 3  ;;  %v5912_v32 = vperm.slane %v2604_v6, 4  ;;  %v101_v25 = vadd.f32 %v2710_v0, %v2747_v42  ;;  %v160_v20 = vadd.f32 %v2594_v60, %v99_v4 }
  0xa8   :  { %v271_v12 = vmul.f32 %v5909_v17, %v2767_v34  ;;  %v272_v31 = vmul.f32 %v5910_v1, %v2767_v34  ;;  %v161_v59 = vadd.f32 %v2596_v61, %v100_v57  ;;  %v340_v41 = vadd.f32 %v2765_v50, %v279_v54 }
  0xa9   :  { %v3021_v18 = vmul.f32 %v5911_v35, %v2767_v34  ;;  %v3026_v48 = vmul.f32 %v5912_v32, %v2767_v34  ;;  %v227_v56 = vadd.f32 %v2883_v63, %v166_v5  ;;  %v5913_v27 = vperm.slane %v2796_v49, 1 }
  0xaa   :  { %v400_v26 = vadd.f32 %v384_v28, %v339_v3  ;;  %v286_v14 = vadd.f32 %v270_v52, %v225_v11  ;;  %v287_v17 = vadd.f32 %v271_v12, %v226_v16  ;;  %v445_v1 = vmul.f32 %v429_v24, %v3016_v47  ;;  %v3062_v3 = vpop.permute.xlu2 %425  ;;  %v5919_v11 = vld [vmem:[#allocation20_spill] sm:$0xff] }
  0xab   :  { %v385_v46 = vmul.f32 %v5913_v27, %v2924_v10  ;;  %v220_v35 = vadd.f32 %v2735_v19, %v159_v37  ;;  %v280_v0 = vadd.f32 %v2659_v2, %v219_v36  ;;  %v106_v60 = vadd.f32 %v2807_v53, %v2885_v55  ;;  %v5920_v37 = vld [vmem:[#allocation16_spill] sm:$0xff]  ;;  %v5921_v36 = vld [vmem:[#allocation29_spill] sm:$0xff]  ;;  %v5923_v27 = vld [vmem:[#allocation34_spill] sm:$0xff] }
  0xac   :  { %v107_v50 = vadd.f32 %v2812_v40, %v2885_v55  ;;  %v5914_v61 = vperm.slane %v2604_v6, 5  ;;  %v102_v16 = vadd.f32 %v2715_v29, %v2747_v42  ;;  %v446_v28 = vmul.f32 %v430_v30, %v3016_v47 }
  0xad   :  { %v461_v4 = vadd.f32 %v445_v1, %v400_v26  ;;  %v162_v19 = vadd.f32 %v2598_v62, %v101_v25  ;;  %v221_v2 = vadd.f32 %v2740_v43, %v160_v20  ;;  %v222_v53 = vadd.f32 %v2745_v44, %v161_v59  ;;  %v5924_v26 = vld [vmem:[#allocation35_spill] sm:$0xff] }
  0xae   :  { %v3047_v63 = vmul.f32 %v5914_v61, %v2767_v34  ;;  %v288_v12 = vadd.f32 %v272_v31, %v227_v56  ;;  %v401_v52 = vadd.f32 %v385_v46, %v340_v41  ;;  %v347_v40 = vadd.f32 %v2833_v8, %v286_v14  ;;  %v5922_v41 = vld [vmem:[#allocation22_spill] sm:$0xff]  ;;  %v5929_v61 = vld [vmem:[#allocation44_spill] sm:$0xff] }
  0xaf   :  { %v348_v57 = vadd.f32 %v2838_v9, %v287_v17  ;;  %v522_v54 = vadd.f32 %v2916_v23, %v461_v4  ;;  %v281_v5 = vadd.f32 %v2663_v13, %v220_v35  ;;  %v341_v42 = vadd.f32 %v2771_v33, %v280_v0  ;;  %v5918_v13 = vld [vmem:[#allocation10_spill] sm:$0xff]  ;;  %v3089_v1 = vpop.permute.xlu1 %486  ;;  %v5927_v35 = vld [vmem:[#allocation13_spill] sm:$0xff] }
  0xb0   :  { %v167_v29 = vadd.f32 %v2620_v21, %v106_v60  ;;  %v168_v62 = vadd.f32 %v2622_v22, %v107_v50  ;;  %v108_v43 = vadd.f32 %v2817_v45, %v2885_v55  ;;  %v5915_v44 = vperm.slane %v2796_v49, 2  ;;  %v5928_v60 = vld [vmem:[#allocation39_spill] sm:$0xff] }
  0xb1   :  { %v462_v9 = vadd.f32 %v446_v28, %v401_v52  ;;  %v5916_v23 = vperm.slane %v2953_v7, 0  ;;  %v163_v33 = vadd.f32 %v5918_v13, %v102_v16  ;;  %v223_v21 = vadd.f32 %v5919_v11, %v162_v19 }
  0xb2   :  { %v386_v8 = vmul.f32 %v5915_v44, %v2924_v10  ;;  %v282_v22 = vadd.f32 %v5920_v37, %v221_v2  ;;  %v349_v32 = vadd.f32 %v5921_v36, %v288_v12  ;;  %v408_v25 = vadd.f32 %v2956_v58, %v347_v40 }
  0xb3   :  { %v3071_v31 = vmul.f32 %v5916_v23, %v522_v54  ;;  %v409_v45 = vadd.f32 %v2961_v39, %v348_v57  ;;  %v453_v20 = vmul.f32 %v429_v24, %v3062_v3  ;;  %v454_v59 = vmul.f32 %v430_v30, %v3062_v3  ;;  %v5926_v39 = vld [vmem:[#allocation17_spill] sm:$0xff]  ;;  %v5933_v57 = vld [vmem:[#allocation11_spill] sm:$0xff] }
  0xb4   :  { %v342_v56 = vadd.f32 %v5922_v41, %v281_v5  ;;  %v228_v46 = vadd.f32 %v5923_v27, %v167_v29  ;;  %v229_v14 = vadd.f32 %v5924_v26, %v168_v62  ;;  %v5925_v17 = vperm.slane %v2796_v49, 3 }
  0xb5   :  { %5917 = vst [vmem:[#allocation46_spill] sm:$0xff] %v3071_v31  ;;  %628 = vrot.lane.b32.xlu2 %v3071_v31, %s2478_s3  ;;  %v283_v24 = vadd.f32 %v5926_v39, %v222_v53  ;;  %v169_v30 = vadd.f32 %v5927_v35, %v108_v43  ;;  %v402_v0 = vadd.f32 %v386_v8, %v341_v42  ;;  %v5930_v28 = vperm.slane %v2948_v15, 2  ;;  %v5947_v35 = vld [vmem:[#allocation30_spill] sm:$0xff] }
  0xb6   :  { %v387_v58 = vmul.f32 %v5925_v17, %v2924_v10  ;;  %v523_v50 = vadd.f32 %v5928_v60, %v462_v9  ;;  %v410_v16 = vadd.f32 %v5929_v61, %v349_v32  ;;  %v5931_v19 = vperm.slane %v2948_v15, 3  ;;  %v5939_v32 = vld [vmem:[#allocation23_spill] sm:$0xff] }
  0xb7   :  { %v447_v4 = vmul.f32 %v5930_v28, %v3016_v47  ;;  %v5932_v12 = vmov %v5930_v28  ;;  %v469_v53 = vadd.f32 %v453_v20, %v408_v25  ;;  %v470_v40 = vadd.f32 %v454_v59, %v409_v45  ;;  %v5940_v45 = vld [vmem:[#allocation36_spill] sm:$0xff] }
  0xb8   :  { %v448_v2 = vmul.f32 %v5931_v19, %v3016_v47  ;;  %v455_v52 = vmul.f32 %v5932_v12, %v3062_v3  ;;  %v5934_v54 = vperm.slane %v5933_v57, 0  ;;  %v5935_v42 = vperm.slane %v5933_v57, 1  ;;  %v5950_v19 = vld [vmem:[#allocation21_spill] sm:$0xff]  ;;  %v5951_v12 = vld [vmem:[#allocation18_spill] sm:$0xff] }
  0xb9   :  { %v403_v62 = vadd.f32 %v387_v58, %v342_v56  ;;  %v289_v43 = vadd.f32 %v3021_v18, %v228_v46  ;;  %v290_v44 = vadd.f32 %v3026_v48, %v229_v14  ;;  %v433_v8 = vperm.slane %v2948_v15, 4  ;;  %v5946_v58 = vld [vmem:[#allocation28_spill] sm:$0xff] }
  0xba   :  { %v514_v5 = vmul.f32 %v5934_v54, %v3089_v1  ;;  %v515_v29 = vmul.f32 %v5935_v42, %v3089_v1  ;;  %v5936_v9 = vperm.slane %v2953_v7, 1  ;;  %v5938_v13 = vperm.slane %v5933_v57, 2  ;;  %v5953_v42 = vld [vmem:[#allocation40_spill] sm:$0xff] }
  0xbb   :  { %v343_v25 = vadd.f32 %v5939_v32, %v282_v22  ;;  %v230_v20 = vadd.f32 %v5940_v45, %v169_v30  ;;  %v5941_v18 = vperm.slane %v2796_v49, 4  ;;  %v463_v59 = vadd.f32 %v447_v4, %v402_v0  ;;  %v5945_v22 = vld [vmem:[#allocation27_spill] sm:$0xff]  ;;  %v5960_v45 = vld [vmem:[#allocation25_spill] sm:$0xff] }
  0xbc   :  { %v3115_v23 = vmul.f32 %v5936_v9, %v523_v50  ;;  %v516_v11 = vmul.f32 %v5938_v13, %v3089_v1  ;;  %v530_v37 = vadd.f32 %v514_v5, %v469_v53  ;;  %v531_v36 = vadd.f32 %v515_v29, %v470_v40  ;;  %v5948_v0 = vld [vmem:[#allocation31_spill] sm:$0xff]  ;;  %v5952_v40 = vld [vmem:[#allocation24_spill] sm:$0xff] }
  0xbd   :  { %v388_v48 = vmul.f32 %v5941_v18, %v2924_v10  ;;  %v464_v41 = vadd.f32 %v448_v2, %v403_v62  ;;  %v471_v56 = vadd.f32 %v455_v52, %v410_v16  ;;  %v5942_v27 = vperm.slane %v2953_v7, 0  ;;  %v5954_v62 = vld [vmem:[#allocation41_spill] sm:$0xff]  ;;  %v5956_v13 = vld [vmem:[#allocation15_spill] sm:$0xff]  ;;  %v5961_v18 = vld [vmem:[#allocation32_spill] sm:$0xff] }
  0xbe   :  { %5937 = vst [vmem:[#allocation10_spill] sm:$0xff] %v3115_v23  ;;  %v5943_v26 = vmov %v5936_v9  ;;  %632 = vrot.lane.b32.xlu2 %v3115_v23, %s2478_s3  ;;  %v109_v17 = vadd.f32 %v5945_v22, %v2885_v55  ;;  %v110_v39 = vadd.f32 %v5946_v58, %v2885_v55  ;;  %v350_v30 = vadd.f32 %v5947_v35, %v289_v43 }
  0xbf   :  { %v3127_v46 = vmul.f32 %v5942_v27, %v530_v37  ;;  %v3131_v14 = vmul.f32 %v5943_v26, %v531_v36  ;;  %v351_v60 = vadd.f32 %v5948_v0, %v290_v44  ;;  %v542_v50 = vperm.slane %v2953_v7, 2  ;;  %v5955_v44 = vld [vmem:[#allocation14_spill] sm:$0xff]  ;;  %v5957_v36 = vld [vmem:[#allocation45_spill] sm:$0xff] }
  0xc0   :  { %v543_v61 = vperm.slane %v2953_v7, 3  ;;  %v449_v16 = vmul.f32 %v433_v8, %v3016_v47  ;;  %v532_v28 = vadd.f32 %v516_v11, %v471_v56  ;;  %v5949_v55 = vperm.slane %v2604_v6, 6 }
  0xc1   :  { %5944 = vst [vmem:[#allocation20_spill] sm:$0xff] %v3131_v14  ;;  %634 = vrot.lane.b32.xlu0 %v3131_v14, %s2478_s3  ;;  %630 = vrot.lane.b32.xlu1 %v3127_v46, %s2478_s3  ;;  %v224_v2 = vadd.f32 %v5950_v19, %v163_v33  ;;  %v284_v52 = vadd.f32 %v5951_v12, %v223_v21  ;;  %v5958_v21 = vperm.slane %v2948_v15, 3  ;;  %v5964_v27 = vperm.slane %v5933_v57, 3 }
  0xc2   :  { %v276_v4 = vmul.f32 %v5949_v55, %v2767_v34  ;;  %v291_v53 = vadd.f32 %v3047_v63, %v230_v20  ;;  %v344_v54 = vadd.f32 %v5952_v40, %v283_v24  ;;  %v404_v5 = vadd.f32 %v388_v48, %v343_v25  ;;  %v5972_v40 = vld [vmem:[#allocation19_spill] sm:$0xff] }
  0xc3   :  { %v524_v29 = vadd.f32 %v5953_v42, %v463_v59  ;;  %v525_v43 = vadd.f32 %v5954_v62, %v464_v41  ;;  %v170_v9 = vadd.f32 %v5955_v44, %v109_v17  ;;  %v171_v11 = vadd.f32 %v5956_v13, %v110_v39  ;;  %v5966_v17 = vld [vmem:[#allocation37_spill] sm:$0xff]  ;;  %v5967_v39 = vld [vmem:[#allocation38_spill] sm:$0xff]  ;;  %v5973_v13 = vld [vmem:[#allocation8_spill] sm:$0xff] }
  0xc4   :  { %v411_v37 = vadd.f32 %v2971_v51, %v350_v30  ;;  %v412_v32 = vadd.f32 %v5957_v36, %v351_v60  ;;  %v465_v33 = vadd.f32 %v449_v16, %v404_v5  ;;  %v456_v63 = vmul.f32 %v5958_v21, %v3062_v3 }
  0xc5   :  { %v457_v24 = vmul.f32 %v433_v8, %v3062_v3  ;;  %v3165_v25 = vmul.f32 %v542_v50, %v532_v28  ;;  %v345_v20 = vadd.f32 %v5960_v45, %v284_v52  ;;  %v352_v48 = vadd.f32 %v5961_v18, %v291_v53  ;;  %v5970_v28 = vld [vmem:[#allocation42_spill] sm:$0xff] }
  0xc6   :  { %v434_v59 = vperm.slane %v2948_v15, 5  ;;  %v435_v41 = vperm.slane %v2948_v15, 6  ;;  %v3171_v51 = vmul.f32 %v542_v50, %v524_v29  ;;  %v3173_v56 = vmul.f32 %v543_v61, %v525_v43 }
  0xc7   :  { %5959 = vst [vmem:[#allocation16_spill] sm:$0xff] %v3165_v25  ;;  %v517_v26 = vmul.f32 %v5964_v27, %v3089_v1  ;;  %v5965_v8 = vperm.slane %v5933_v57, 4  ;;  %638 = vrot.lane.b32.xlu2 %v3165_v25, %s2478_s3  ;;  %v231_v58 = vadd.f32 %v5966_v17, %v170_v9  ;;  %v232_v35 = vadd.f32 %v5967_v39, %v171_v11  ;;  %v5974_v11 = vld [vmem:[#allocation9_spill] sm:$0xff]  ;;  %v5985_v39 = vld [vmem:[#allocation43_spill] sm:$0xff] }
  0xc8   :  { %5962 = vst [vmem:[#allocation29_spill] sm:$0xff] %v3171_v51  ;;  %v5968_v30 = vperm.slane %v2796_v49, 5  ;;  %v5969_v60 = vperm.slane %v2796_v49, 6  ;;  %v544_v16 = vperm.slane %v2953_v7, 4  ;;  %v526_v55 = vadd.f32 %v5970_v28, %v465_v33 }
  0xc9   :  { %5963 = vst [vmem:[#allocation22_spill] sm:$0xff] %v3173_v56  ;;  %v518_v22 = vmul.f32 %v5965_v8, %v3089_v1  ;;  %v472_v19 = vadd.f32 %v456_v63, %v411_v37  ;;  %v473_v12 = vadd.f32 %v457_v24, %v412_v32  ;;  %640 = vrot.lane.b32.xlu0 %v3173_v56, %s2478_s3  ;;  %v5971_v52 = vperm.slane %v2604_v6, 7  ;;  %v5978_v24 = vld [vmem:[#allocation12_spill] sm:$0xff] }
  0xca   :  { %v389_v0 = vmul.f32 %v5968_v30, %v2924_v10  ;;  %v390_v50 = vmul.f32 %v5969_v60, %v2924_v10  ;;  %636 = vrot.lane.b32.xlu1 %v3171_v51, %s2478_s3  ;;  %v285_v5 = vadd.f32 %v5972_v40, %v224_v2  ;;  %v413_v42 = vadd.f32 %v2983_v38, %v352_v48  ;;  %v5980_v48 = vld [vmem:[#allocation26_spill] sm:$0xff] }
  0xcb   :  { %v277_v53 = vmul.f32 %v5971_v52, %v2767_v34  ;;  %v450_v29 = vmul.f32 %v434_v59, %v3016_v47  ;;  %v451_v62 = vmul.f32 %v435_v41, %v3016_v47  ;;  %v458_v43 = vmul.f32 %v434_v59, %v3062_v3 }
  0xcc   :  { %v533_v44 = vadd.f32 %v517_v26, %v472_v19  ;;  %v534_v9 = vadd.f32 %v518_v22, %v473_v12  ;;  %v5975_v37 = vperm.slane %v5974_v11, 7  ;;  %v405_v32 = vadd.f32 %v389_v0, %v344_v54  ;;  %v5984_v22 = vld [vmem:[#allocation33_spill] sm:$0xff] }
  0xcd   :  { %v292_v33 = vadd.f32 %v276_v4, %v231_v58  ;;  %v293_v6 = vadd.f32 %v277_v53, %v232_v35  ;;  %v406_v34 = vadd.f32 %v390_v50, %v345_v20  ;;  %v436_v2 = vperm.slane %v2948_v15, 7 }
  0xce   :  { %v338_v36 = vmul.f32 %v5975_v37, %v5973_v13  ;;  %v3209_v21 = vmul.f32 %v544_v16, %v526_v55  ;;  %v5977_v38 = vperm.slane %v5933_v57, 5  ;;  %v346_v59 = vadd.f32 %v5980_v48, %v285_v5 }
  0xcf   :  { %v5981_v54 = vperm.slane %v2796_v49, 7  ;;  %v466_v27 = vadd.f32 %v450_v29, %v405_v32  ;;  %v467_v20 = vadd.f32 %v451_v62, %v406_v34  ;;  %v474_v26 = vadd.f32 %v458_v43, %v413_v42 }
  0xd0   :  { %5976 = vst [vmem:[#allocation34_spill] sm:$0xff] %v3209_v21  ;;  %v519_v63 = vmul.f32 %v5977_v38, %v3089_v1  ;;  %v5979_v45 = vmov %v5977_v38  ;;  %v3221_v15 = vmul.f32 %v543_v61, %v533_v44  ;;  %v3223_v8 = vmul.f32 %v544_v16, %v534_v9  ;;  %644 = vrot.lane.b32.xlu2 %v3209_v21, %s2478_s3 }
  0xd1   :  { %v511_v18 = vmul.f32 %v5979_v45, %v5978_v24  ;;  %v391_v4 = vmul.f32 %v5981_v54, %v2924_v10  ;;  %v353_v17 = vadd.f32 %v5984_v22, %v292_v33  ;;  %v354_v58 = vadd.f32 %v338_v36, %v293_v6 }
  0xd2   :  { %5982 = vst [vmem:[#allocation35_spill] sm:$0xff] %v3221_v15  ;;  %v5986_v35 = vmov %v5969_v60  ;;  %v5987_v10 = vmov %v5981_v54  ;;  %v5988_v61 = vperm.slane %v5933_v57, 6  ;;  %v452_v50 = vmul.f32 %v436_v2, %v3016_v47  ;;  %646 = vrot.lane.b32.xlu0 %v3223_v8, %s2478_s3  ;;  %642 = vrot.lane.b32.xlu1 %v3221_v15, %s2478_s3 }
  0xd3   :  { %5983 = vst [vmem:[#allocation17_spill] sm:$0xff] %v3223_v8  ;;  %v398_v30 = vmul.f32 %v5986_v35, %v5985_v39  ;;  %v399_v0 = vmul.f32 %v5987_v10, %v5985_v39  ;;  %v535_v16 = vadd.f32 %v519_v63, %v474_v26  ;;  %v497_v28 = vperm.slane %v5933_v57, 7 }
  0xd4   :  { %v512_v60 = vmul.f32 %v5988_v61, %v5978_v24  ;;  %v545_v55 = vperm.slane %v2953_v7, 5  ;;  %v407_v19 = vadd.f32 %v391_v4, %v346_v59  ;;  %v546_v49 = vperm.slane %v2953_v7, 6 }
  0xd5   :  { %v527_v12 = vadd.f32 %v511_v18, %v466_v27  ;;  %v414_v53 = vadd.f32 %v398_v30, %v353_v17  ;;  %v415_v40 = vadd.f32 %v399_v0, %v354_v58  ;;  %v459_v47 = vmul.f32 %v435_v41, %v3062_v3 }
  0xd6   :  { %v528_v52 = vadd.f32 %v512_v60, %v467_v20  ;;  %v468_v5 = vadd.f32 %v452_v50, %v407_v19  ;;  %v460_v42 = vmul.f32 %v436_v2, %v3062_v3  ;;  %v3247_v29 = vmul.f32 %v545_v55, %v535_v16 }
  0xd7   :  { %v513_v62 = vmul.f32 %v497_v28, %v5978_v24  ;;  %v3250_v43 = vmul.f32 %v545_v55, %v527_v12  ;;  %v5992_v9 = vmov %v5988_v61  ;;  %v521_v11 = vmul.f32 %v497_v28, %v3089_v1 }
  0xd8   :  { %5989 = vst [vmem:[#allocation13_spill] sm:$0xff] %v3247_v29  ;;  %v3252_v44 = vmul.f32 %v546_v49, %v528_v52  ;;  %v520_v13 = vmul.f32 %v5992_v9, %v3089_v1  ;;  %650 = vrot.lane.b32.xlu2 %v3247_v29, %s2478_s3  ;;  %v547_v41 = vperm.slane %v2953_v7, 7  ;;  %v475_v37 = vadd.f32 %v459_v47, %v414_v53 }
  0xd9   :  { %5990 = vst [vmem:[#allocation39_spill] sm:$0xff] %v3250_v43  ;;  %v529_v3 = vadd.f32 %v513_v62, %v468_v5  ;;  %v476_v36 = vadd.f32 %v460_v42, %v415_v40 }
  0xda   :  { %5991 = vst [vmem:[#allocation44_spill] sm:$0xff] %v3252_v44  ;;  %652 = vrot.lane.b32.xlu0 %v3252_v44, %s2478_s3  ;;  %648 = vrot.lane.b32.xlu1 %v3250_v43, %s2478_s3  ;;  %v536_v32 = vadd.f32 %v520_v13, %v475_v37 }
  0xdb   :  { %v537_v33 = vadd.f32 %v521_v11, %v476_v36  ;;  %v3265_v57 = vmul.f32 %v547_v41, %v529_v3 }
  0xdc   :  { %v3267_v6 = vmul.f32 %v546_v49, %v536_v32 }
  0xdd   :  { %5993 = vst [vmem:[#allocation11_spill] sm:$0xff] %v3265_v57  ;;  %v3269_v1 = vmul.f32 %v547_v41, %v537_v33 }
  0xde   :  { %5994 = vst [vmem:[#allocation23_spill] sm:$0xff] %v3267_v6 }
  0xdf   :  { %5995 = vst [vmem:[#allocation36_spill] sm:$0xff] %v3269_v1 }
  0xe0   :  { %656 = vrot.lane.b32.xlu2 %v3265_v57, %s2478_s3 }
  0xe2   :  { %658 = vrot.lane.b32.xlu0 %v3269_v1, %s2478_s3  ;;  %654 = vrot.lane.b32.xlu1 %v3267_v6, %s2478_s3 }
  0xe8   :  { %713 = vrot.lane.b32.xlu2 %v3127_v46, %s2479_s30 }
  0xea   :  { %715 = vrot.lane.b32.xlu0 %v3115_v23, %s2479_s30  ;;  %711 = vrot.lane.b32.xlu1 %v3071_v31, %s2479_s30 }
  0xf0   :  { %719 = vrot.lane.b32.xlu2 %v3171_v51, %s2479_s30 }
  0xf2   :  { %721 = vrot.lane.b32.xlu0 %v3165_v25, %s2479_s30  ;;  %717 = vrot.lane.b32.xlu1 %v3131_v14, %s2479_s30 }
  0xf8   :  { %725 = vrot.lane.b32.xlu2 %v3221_v15, %s2479_s30 }
  0xfa   :  { %727 = vrot.lane.b32.xlu0 %v3209_v21, %s2479_s30  ;;  %723 = vrot.lane.b32.xlu1 %v3173_v56, %s2479_s30 }
 0x100   :  { %731 = vrot.lane.b32.xlu2 %v3250_v43, %s2479_s30 }
 0x102   :  { %733 = vrot.lane.b32.xlu0 %v3247_v29, %s2479_s30  ;;  %729 = vrot.lane.b32.xlu1 %v3223_v8, %s2479_s30 }
 0x108   :  { %737 = vrot.lane.b32.xlu2 %v3267_v6, %s2479_s30 }
 0x10a   :  { %739 = vrot.lane.b32.xlu0 %v3265_v57, %s2479_s30  ;;  %735 = vrot.lane.b32.xlu1 %v3252_v44, %s2479_s30 }
 0x10f   :  { %v3295_v7 = vpop.permute.xlu2 %628 }
 0x110   :  { %792 = vrot.lane.b32.xlu2 %v3071_v31, %s2480_s6 }
 0x112   :  { %794 = vrot.lane.b32.xlu0 %v3127_v46, %s2480_s6  ;;  %741 = vrot.lane.b32.xlu1 %v3269_v1, %s2479_s30 }
 0x118   :  { %798 = vrot.lane.b32.xlu2 %v3131_v14, %s2480_s6  ;;  %v3300_v34 = vpop.permute.xlu2 %632 }
 0x11a   :  { %800 = vrot.lane.b32.xlu0 %v3171_v51, %s2480_s6  ;;  %796 = vrot.lane.b32.xlu1 %v3115_v23, %s2480_s6 }
 0x120   :  { %804 = vrot.lane.b32.xlu2 %v3173_v56, %s2480_s6 }
 0x121   :  { %v3305_v2 = vpop.permute.xlu2 %638 }
 0x122   :  { %806 = vrot.lane.b32.xlu0 %v3221_v15, %s2480_s6  ;;  %802 = vrot.lane.b32.xlu1 %v3165_v25, %s2480_s6 }
 0x128   :  { %810 = vrot.lane.b32.xlu2 %v3223_v8, %s2480_s6 }
 0x12a   :  { %812 = vrot.lane.b32.xlu0 %v3250_v43, %s2480_s6  ;;  %808 = vrot.lane.b32.xlu1 %v3209_v21, %s2480_s6  ;;  %v3310_v38 = vpop.permute.xlu2 %644 }
 0x12b   :  { %5996 = vst [vmem:[#allocation27_spill] sm:$0xff] %v3310_v38 }
 0x130   :  { %816 = vrot.lane.b32.xlu2 %v3252_v44, %s2480_s6 }
 0x132   :  { %818 = vrot.lane.b32.xlu0 %v3267_v6, %s2480_s6  ;;  %814 = vrot.lane.b32.xlu1 %v3247_v29, %s2480_s6  ;;  %v3315_v63 = vpop.permute.xlu2 %650 }
 0x133   :  { %5997 = vst [vmem:[#allocation28_spill] sm:$0xff] %v3315_v63  ;;  %v3317_v24 = vpop.permute.xlu0 %634  ;;  %v3319_v45 = vpop.permute.xlu1 %630 }
 0x134   :  { %5998 = vst [vmem:[#allocation30_spill] sm:$0xff] %v3317_v24 }
 0x135   :  { %5999 = vst [vmem:[#allocation31_spill] sm:$0xff] %v3319_v45 }
 0x138   :  { %822 = vrot.lane.b32.xlu2 %v3269_v1, %s2480_s6 }
 0x13a   :  { %897 = vrot.lane.b32.xlu0 %v3071_v31, %s2481_s7  ;;  %820 = vrot.lane.b32.xlu1 %v3265_v57, %s2480_s6  ;;  %v3325_v18 = vpop.permute.xlu2 %656 }
 0x13b   :  { %6000 = vst [vmem:[#allocation21_spill] sm:$0xff] %v3325_v18  ;;  %v3327_v48 = vpop.permute.xlu0 %640 }
 0x13c   :  { %6001 = vst [vmem:[#allocation18_spill] sm:$0xff] %v3327_v48  ;;  %v3329_v59 = vpop.permute.xlu1 %636 }
 0x13d   :  { %6002 = vst [vmem:[#allocation24_spill] sm:$0xff] %v3329_v59 }
 0x140   :  { %901 = vrot.lane.b32.xlu2 %v3115_v23, %s2481_s7 }
 0x142   :  { %903 = vrot.lane.b32.xlu0 %v3131_v14, %s2481_s7  ;;  %899 = vrot.lane.b32.xlu1 %v3127_v46, %s2481_s7  ;;  %v3337_v54 = vpop.permute.xlu2 %713 }
 0x143   :  { %6003 = vst [vmem:[#allocation40_spill] sm:$0xff] %v3337_v54 }
 0x144   :  { %v3339_v4 = vpop.permute.xlu0 %646  ;;  %v3341_v27 = vpop.permute.xlu1 %642 }
 0x145   :  { %6004 = vst [vmem:[#allocation41_spill] sm:$0xff] %v3339_v4 }
 0x146   :  { %6005 = vst [vmem:[#allocation14_spill] sm:$0xff] %v3341_v27 }
 0x148   :  { %907 = vrot.lane.b32.xlu2 %v3165_v25, %s2481_s7 }
 0x14a   :  { %909 = vrot.lane.b32.xlu0 %v3173_v56, %s2481_s7  ;;  %905 = vrot.lane.b32.xlu1 %v3171_v51, %s2481_s7  ;;  %v3349_v20 = vpop.permute.xlu2 %719 }
 0x14b   :  { %6006 = vst [vmem:[#allocation15_spill] sm:$0xff] %v3349_v20 }
 0x14c   :  { %v3351_v26 = vpop.permute.xlu0 %652  ;;  %v3353_v22 = vpop.permute.xlu1 %648 }
 0x14d   :  { %6007 = vst [vmem:[#allocation45_spill] sm:$0xff] %v3351_v26 }
 0x14e   :  { %6008 = vst [vmem:[#allocation25_spill] sm:$0xff] %v3353_v22 }
 0x150   :  { %913 = vrot.lane.b32.xlu2 %v3209_v21, %s2481_s7 }
 0x152   :  { %915 = vrot.lane.b32.xlu0 %v3223_v8, %s2481_s7  ;;  %911 = vrot.lane.b32.xlu1 %v3221_v15, %s2481_s7  ;;  %v3361_v17 = vpop.permute.xlu2 %725 }
 0x153   :  { %6009 = vst [vmem:[#allocation32_spill] sm:$0xff] %v3361_v17 }
 0x154   :  { %v3363_v58 = vpop.permute.xlu0 %658  ;;  %v3365_v39 = vpop.permute.xlu1 %654 }
 0x155   :  { %6010 = vst [vmem:[#allocation37_spill] sm:$0xff] %v3363_v58 }
 0x156   :  { %6011 = vst [vmem:[#allocation38_spill] sm:$0xff] %v3365_v39 }
 0x158   :  { %919 = vrot.lane.b32.xlu2 %v3247_v29, %s2481_s7 }
 0x15a   :  { %921 = vrot.lane.b32.xlu0 %v3252_v44, %s2481_s7  ;;  %917 = vrot.lane.b32.xlu1 %v3250_v43, %s2481_s7  ;;  %v3373_v35 = vpop.permute.xlu2 %731 }
 0x15b   :  { %6012 = vst [vmem:[#allocation42_spill] sm:$0xff] %v3373_v35 }
 0x15c   :  { %v3375_v30 = vpop.permute.xlu0 %715  ;;  %v3377_v10 = vpop.permute.xlu1 %711 }
 0x15d   :  { %6013 = vst [vmem:[#allocation19_spill] sm:$0xff] %v3375_v30 }
 0x15e   :  { %6014 = vst [vmem:[#allocation8_spill] sm:$0xff] %v3377_v10 }
 0x160   :  { %925 = vrot.lane.b32.xlu2 %v3265_v57, %s2481_s7 }
 0x162   :  { %927 = vrot.lane.b32.xlu0 %v3269_v1, %s2481_s7  ;;  %923 = vrot.lane.b32.xlu1 %v3267_v6, %s2481_s7  ;;  %v3385_v0 = vpop.permute.xlu2 %737 }
 0x164   :  { %v3387_v61 = vpop.permute.xlu0 %721  ;;  %v3389_v60 = vpop.permute.xlu1 %717 }
 0x165   :  { %6015 = vst [vmem:[#allocation9_spill] sm:$0xff] %v3387_v61 }
 0x166   :  { %6016 = vst [vmem:[#allocation12_spill] sm:$0xff] %v3389_v60 }
 0x168   :  { %980 = vrot.lane.b32.xlu2 %v3127_v46, %s2482_s8 }
 0x16a   :  { %982 = vrot.lane.b32.xlu0 %v3115_v23, %s2482_s8  ;;  %978 = vrot.lane.b32.xlu1 %v3071_v31, %s2482_s8  ;;  %v3394_v50 = vpop.permute.xlu2 %792 }
 0x16b   :  { %6017 = vst [vmem:[#allocation26_spill] sm:$0xff] %v3394_v50 }
 0x16c   :  { %v3396_v16 = vpop.permute.xlu0 %727  ;;  %v3398_v28 = vpop.permute.xlu1 %723 }
 0x16d   :  { %6018 = vst [vmem:[#allocation33_spill] sm:$0xff] %v3396_v16 }
 0x16e   :  { %6019 = vst [vmem:[#allocation43_spill] sm:$0xff] %v3398_v28 }
 0x170   :  { %986 = vrot.lane.b32.xlu2 %v3171_v51, %s2482_s8 }
 0x172   :  { %988 = vrot.lane.b32.xlu0 %v3165_v25, %s2482_s8  ;;  %984 = vrot.lane.b32.xlu1 %v3131_v14, %s2482_s8  ;;  %v3403_v55 = vpop.permute.xlu2 %798 }
 0x174   :  { %v3405_v19 = vpop.permute.xlu0 %733  ;;  %v3407_v49 = vpop.permute.xlu1 %729 }
 0x175   :  { %6020 = vst [vmem:[#allocation47_spill] sm:$0xff] %v3407_v49 }
 0x178   :  { %992 = vrot.lane.b32.xlu2 %v3221_v15, %s2482_s8 }
 0x17a   :  { %994 = vrot.lane.b32.xlu0 %v3209_v21, %s2482_s8  ;;  %990 = vrot.lane.b32.xlu1 %v3173_v56, %s2482_s8  ;;  %v3412_v12 = vpop.permute.xlu2 %804 }
 0x17c   :  { %v3414_v52 = vpop.permute.xlu0 %739  ;;  %v3416_v53 = vpop.permute.xlu1 %735 }
 0x17d   :  { %6021 = vst [vmem:[#allocation48_spill] sm:$0xff] %v3414_v52 }
 0x180   :  { %998 = vrot.lane.b32.xlu2 %v3250_v43, %s2482_s8 }
 0x182   :  { %1000 = vrot.lane.b32.xlu0 %v3247_v29, %s2482_s8  ;;  %996 = vrot.lane.b32.xlu1 %v3223_v8, %s2482_s8  ;;  %v3421_v40 = vpop.permute.xlu2 %810 }
 0x184   :  { %v3423_v5 = vpop.permute.xlu0 %794  ;;  %v3425_v47 = vpop.permute.xlu1 %741 }
 0x185   :  { %6022 = vst [vmem:[#allocation49_spill] sm:$0xff] %v3423_v5 }
 0x186   :  { %6023 = vst [vmem:[#allocation50_spill] sm:$0xff] %v3425_v47 }
 0x188   :  { %1004 = vrot.lane.b32.xlu2 %v3267_v6, %s2482_s8 }
 0x18a   :  { %1067 = vrot.lane.b32.xlu0 %v3071_v31, %s2483_s9  ;;  %1002 = vrot.lane.b32.xlu1 %v3252_v44, %s2482_s8  ;;  %v3431_v42 = vpop.permute.xlu2 %816 }
 0x18b   :  { %6024 = vst [vmem:[#allocation51_spill] sm:$0xff] %v3431_v42 }
 0x18c   :  { %v3433_v62 = vpop.permute.xlu0 %800  ;;  %v3435_v9 = vpop.permute.xlu1 %796 }
 0x190   :  { %1071 = vrot.lane.b32.xlu2 %v3115_v23, %s2483_s9 }
 0x192   :  { %1073 = vrot.lane.b32.xlu0 %v3131_v14, %s2483_s9  ;;  %1069 = vrot.lane.b32.xlu1 %v3127_v46, %s2483_s9  ;;  %v3443_v13 = vpop.permute.xlu2 %822 }
 0x193   :  { %6025 = vst [vmem:[#allocation52_spill] sm:$0xff] %v3443_v13 }
 0x194   :  { %v3445_v11 = vpop.permute.xlu0 %806  ;;  %v3447_v41 = vpop.permute.xlu1 %802 }
 0x198   :  { %1077 = vrot.lane.b32.xlu2 %v3165_v25, %s2483_s9 }
 0x19a   :  { %1079 = vrot.lane.b32.xlu0 %v3173_v56, %s2483_s9  ;;  %1075 = vrot.lane.b32.xlu1 %v3171_v51, %s2483_s9  ;;  %v3455_v3 = vpop.permute.xlu2 %901 }
 0x19b   :  { %6026 = vst [vmem:[#allocation53_spill] sm:$0xff] %v3455_v3 }
 0x19c   :  { %v3457_v37 = vpop.permute.xlu0 %812  ;;  %v3459_v36 = vpop.permute.xlu1 %808 }
 0x1a0   :  { %1083 = vrot.lane.b32.xlu2 %v3209_v21, %s2483_s9 }
 0x1a2   :  { %1085 = vrot.lane.b32.xlu0 %v3223_v8, %s2483_s9  ;;  %1081 = vrot.lane.b32.xlu1 %v3221_v15, %s2483_s9  ;;  %v3467_v32 = vpop.permute.xlu2 %907 }
 0x1a3   :  { %6027 = vst [vmem:[#allocation54_spill] sm:$0xff] %v3467_v32 }
 0x1a4   :  { %v3469_v33 = vpop.permute.xlu0 %818  ;;  %v3471_v28 = vpop.permute.xlu1 %814 }
 0x1a5   :  { %6028 = vst [vmem:[#allocation55_spill] sm:$0xff] %v3469_v33 }
 0x1a8   :  { %1089 = vrot.lane.b32.xlu2 %v3247_v29, %s2483_s9 }
 0x1aa   :  { %1091 = vrot.lane.b32.xlu0 %v3252_v44, %s2483_s9  ;;  %1087 = vrot.lane.b32.xlu1 %v3250_v43, %s2483_s9  ;;  %v3479_v16 = vpop.permute.xlu2 %913 }
 0x1ab   :  { %6029 = vst [vmem:[#allocation56_spill] sm:$0xff] %v3479_v16  ;;  %v660_v16 = vlaneseq }
 0x1ac   :  { %v3481_v60 = vpop.permute.xlu0 %897  ;;  %v3483_v3 = vpop.permute.xlu1 %820 }
 0x1ad   :  { %6030 = vst [vmem:[#allocation57_spill] sm:$0xff] %v3481_v60  ;;  %v3503_v10 = vand.u32 127, %v660_v16 }
 0x1ae   :  { %6031 = vst [vmem:[#allocation58_spill] sm:$0xff] %v3483_v3 }
 0x1af   :  { %vm743_vm0 = vcmp.lt.s32.totalorder %v3503_v10, 6  ;;  %vm929_vm1 = vcmp.lt.s32.totalorder %v3503_v10, 3  ;;  %vm1006_vm2 = vcmp.lt.s32.totalorder %v3503_v10, 2  ;;  %vm1095_vm3 = vcmp.lt.s32.totalorder %v3503_v10, 1 }
 0x1b0   :  { %1132 = vrot.lane.b32.xlu2 %v3115_v23, %s2484_s10  ;;  %v744_v13 = vsel %vm743_vm0, %v3416_v53, %v3414_v52  ;;  %v746_v39 = vsel %vm743_vm0, %v3373_v35, %v3416_v53  ;;  %v745_v26 = vsel %vm743_vm0, %v3385_v0, %v3425_v47  ;;  %vm1160_vm4 = vcmp.lt.s32.totalorder %v3503_v10, 127 }
 0x1b1   :  { %v767_v22 = vmul.f32 0.17820325, %v744_v13  ;;  %vm824_vm5 = vcmp.lt.s32.totalorder %v3503_v10, 4  ;;  %vm1225_vm6 = vcmp.lt.s32.totalorder %v3503_v10, 126  ;;  %vm662_vm7 = vcmp.lt.s32.totalorder %v3503_v10, 8 }
 0x1b2   :  { %1134 = vrot.lane.b32.xlu0 %v3131_v14, %s2484_s10  ;;  %1093 = vrot.lane.b32.xlu1 %v3267_v6, %s2483_s9  ;;  %v920_v32 = vpop.permute.xlu2 %919  ;;  %v3817_v45 = vsel %vm824_vm5, %v3447_v41, %v3445_v11  ;;  %v3823_v24 = vsel %vm824_vm5, %v3403_v55, %v3447_v41  ;;  %vm1318_vm8 = vcmp.lt.s32.totalorder %v3503_v10, 125  ;;  %vm1399_vm9 = vcmp.lt.s32.totalorder %v3503_v10, 124 }
 0x1b3   :  { %6074 = vst [vmem:[#allocation101_spill] sm:$0xff] %v3817_v45  ;;  %vm1504_vm10 = vcmp.lt.s32.totalorder %v3503_v10, 122  ;;  %vm1585_vm11 = vcmp.lt.s32.totalorder %v3503_v10, 120  ;;  %vm1662_vm12 = vcmp.lt.s32.totalorder %v3503_v10, 64  ;;  %vm1707_vm13 = vcmp.lt.s32.totalorder %v3503_v10, 32 }
 0x1b4   :  { %v3491_v61 = vpop.permute.xlu0 %903  ;;  %v3493_v17 = vpop.permute.xlu1 %899  ;;  %6075 = vst [vmem:[#allocation102_spill] sm:$0xff] %v3823_v24  ;;  %vm1752_vm14 = vcmp.lt.s32.totalorder %v3503_v10, 96 }
 0x1b5   :  { %6032 = vst [vmem:[#allocation59_spill] sm:$0xff] %v3491_v61  ;;  %v749_v61 = vsel %vm743_vm0, %v3407_v49, %v3405_v19 }
 0x1b6   :  { %6033 = vst [vmem:[#allocation60_spill] sm:$0xff] %v3493_v17  ;;  %v773_v17 = vmul.f32 0.17820325, %v749_v61 }
 0x1b8   :  { %1138 = vrot.lane.b32.xlu2 %v3165_v25, %s2484_s10 }
 0x1ba   :  { %1140 = vrot.lane.b32.xlu0 %v3173_v56, %s2484_s10  ;;  %1136 = vrot.lane.b32.xlu1 %v3171_v51, %s2484_s10  ;;  %v3501_v60 = vpop.permute.xlu2 %925 }
 0x1bb   :  { %6034 = vst [vmem:[#allocation61_spill] sm:$0xff] %v3501_v60 }
 0x1bc   :  { %v3505_v30 = vpop.permute.xlu0 %909  ;;  %v3507_v20 = vpop.permute.xlu1 %905 }
 0x1bd   :  { %6035 = vst [vmem:[#allocation62_spill] sm:$0xff] %v3505_v30  ;;  %v609_v30 = vmul.f32 0.22254893, %v3247_v29 }
 0x1be   :  { %6036 = vst [vmem:[#allocation63_spill] sm:$0xff] %v3507_v20 }
 0x1bf   :  { %v789_v49 = vadd.f32 %v773_v17, %v609_v30  ;;  %v602_v30 = vmul.f32 0.22254893, %v3252_v44 }
 0x1c0   :  { %1144 = vrot.lane.b32.xlu2 %v3209_v21, %s2484_s10 }
 0x1c2   :  { %1146 = vrot.lane.b32.xlu0 %v3223_v8, %s2484_s10  ;;  %1142 = vrot.lane.b32.xlu1 %v3221_v15, %s2484_s10  ;;  %v3520_v16 = vpop.permute.xlu2 %980 }
 0x1c4   :  { %v3524_v20 = vpop.permute.xlu0 %915  ;;  %v3526_v54 = vpop.permute.xlu1 %911 }
 0x1c5   :  { %6037 = vst [vmem:[#allocation64_spill] sm:$0xff] %v3524_v20  ;;  %v935_v61 = vsel %vm929_vm1, %v3524_v20, %v920_v32 }
 0x1c6   :  { %6038 = vst [vmem:[#allocation65_spill] sm:$0xff] %v3526_v54  ;;  %v959_v3 = vmul.f32 0.21052228, %v935_v61  ;;  %v766_v54 = vmul.f32 0.17820325, %v746_v39 }
 0x1c7   :  { %v603_v61 = vmul.f32 0.22254893, %v3265_v57 }
 0x1c8   :  { %v3539_v58 = vadd.f32 %v959_v3, %v789_v49  ;;  %1150 = vrot.lane.b32.xlu2 %v3247_v29, %s2484_s10  ;;  %v782_v3 = vadd.f32 %v766_v54, %v602_v30  ;;  %v610_v30 = vmul.f32 0.22254893, %v3267_v6 }
 0x1c9   :  { %v783_v20 = vadd.f32 %v767_v22, %v603_v61  ;;  %v775_v22 = vmul.f32 0.17820325, %v745_v26 }
 0x1ca   :  { %6039 = vst [vmem:[#allocation66_spill] sm:$0xff] %v3539_v58  ;;  %1152 = vrot.lane.b32.xlu0 %v3252_v44, %s2484_s10  ;;  %1148 = vrot.lane.b32.xlu1 %v3250_v43, %s2484_s10  ;;  %v3547_v17 = vpop.permute.xlu2 %986  ;;  %v747_v58 = vsel %vm743_vm0, %v3405_v19, %v3385_v0 }
 0x1cb   :  { %v774_v54 = vmul.f32 0.17820325, %v747_v58 }
 0x1cc   :  { %v922_v53 = vpop.permute.xlu0 %921  ;;  %v3551_v49 = vpop.permute.xlu1 %917 }
 0x1cd   :  { %6040 = vst [vmem:[#allocation67_spill] sm:$0xff] %v3551_v49  ;;  %v930_v39 = vsel %vm929_vm1, %v922_v53, %v3501_v60  ;;  %v932_v13 = vsel %vm929_vm1, %v3551_v49, %v922_v53 }
 0x1ce   :  { %v953_v35 = vmul.f32 0.21052228, %v930_v39  ;;  %v952_v52 = vmul.f32 0.21052228, %v932_v13 }
 0x1d0   :  { %v3567_v27 = vadd.f32 %v953_v35, %v783_v20  ;;  %v3569_v60 = vadd.f32 %v952_v52, %v782_v3  ;;  %1156 = vrot.lane.b32.xlu2 %v3265_v57, %s2484_s10  ;;  %v611_v20 = vmul.f32 0.22254893, %v3269_v1  ;;  %v790_v52 = vadd.f32 %v774_v54, %v610_v30 }
 0x1d2   :  { %6041 = vst [vmem:[#allocation68_spill] sm:$0xff] %v3567_v27  ;;  %1158 = vrot.lane.b32.xlu0 %v3269_v1, %s2484_s10  ;;  %1154 = vrot.lane.b32.xlu1 %v3267_v6, %s2484_s10  ;;  %v3577_v19 = vpop.permute.xlu2 %992  ;;  %v791_v61 = vadd.f32 %v775_v22, %v611_v20 }
 0x1d3   :  { %6042 = vst [vmem:[#allocation69_spill] sm:$0xff] %v3569_v60 }
 0x1d4   :  { %v3581_v35 = vpop.permute.xlu0 %927  ;;  %v924_v0 = vpop.permute.xlu1 %923 }
 0x1d5   :  { %6043 = vst [vmem:[#allocation70_spill] sm:$0xff] %v3581_v35  ;;  %v931_v58 = vsel %vm929_vm1, %v924_v0, %v3581_v35  ;;  %v933_v26 = vsel %vm929_vm1, %v920_v32, %v924_v0 }
 0x1d6   :  { %v960_v53 = vmul.f32 0.21052228, %v933_v26  ;;  %v961_v39 = vmul.f32 0.21052228, %v931_v58 }
 0x1d8   :  { %v3588_v13 = vadd.f32 %v960_v53, %v790_v52  ;;  %v3590_v3 = vadd.f32 %v961_v39, %v791_v61  ;;  %1199 = vrot.lane.b32.xlu2 %v3131_v14, %s2485_s11 }
 0x1da   :  { %6044 = vst [vmem:[#allocation71_spill] sm:$0xff] %v3588_v13  ;;  %1201 = vrot.lane.b32.xlu0 %v3171_v51, %s2485_s11  ;;  %1197 = vrot.lane.b32.xlu1 %v3115_v23, %s2485_s11  ;;  %v3595_v49 = vpop.permute.xlu2 %998 }
 0x1db   :  { %6045 = vst [vmem:[#allocation72_spill] sm:$0xff] %v3590_v3 }
 0x1dc   :  { %v3597_v35 = vpop.permute.xlu0 %982  ;;  %v3599_v32 = vpop.permute.xlu1 %978 }
 0x1e0   :  { %1205 = vrot.lane.b32.xlu2 %v3173_v56, %s2485_s11 }
 0x1e2   :  { %1207 = vrot.lane.b32.xlu0 %v3221_v15, %s2485_s11  ;;  %1203 = vrot.lane.b32.xlu1 %v3165_v25, %s2485_s11  ;;  %v1005_v54 = vpop.permute.xlu2 %1004 }
 0x1e4   :  { %v3604_v22 = vpop.permute.xlu0 %988  ;;  %v3606_v30 = vpop.permute.xlu1 %984 }
 0x1e5   :  { %v3846_v41 = vsel %vm1006_vm2, %v3520_v16, %v3606_v30  ;;  %v590_v16 = vmul.f32 0.25137913, %v3131_v14 }
 0x1e6   :  { %6079 = vst [vmem:[#allocation106_spill] sm:$0xff] %v3846_v41 }
 0x1e8   :  { %1211 = vrot.lane.b32.xlu2 %v3223_v8, %s2485_s11 }
 0x1ea   :  { %1213 = vrot.lane.b32.xlu0 %v3250_v43, %s2485_s11  ;;  %1209 = vrot.lane.b32.xlu1 %v3209_v21, %s2485_s11  ;;  %v3611_v20 = vpop.permute.xlu2 %1071 }
 0x1eb   :  { %6046 = vst [vmem:[#allocation73_spill] sm:$0xff] %v3611_v20 }
 0x1ec   :  { %v3613_v0 = vpop.permute.xlu0 %994  ;;  %v3615_v58 = vpop.permute.xlu1 %990 }
 0x1f0   :  { %1217 = vrot.lane.b32.xlu2 %v3252_v44, %s2485_s11 }
 0x1f2   :  { %1219 = vrot.lane.b32.xlu0 %v3267_v6, %s2485_s11  ;;  %1215 = vrot.lane.b32.xlu1 %v3247_v29, %s2485_s11  ;;  %v3620_v26 = vpop.permute.xlu2 %1077 }
 0x1f3   :  { %6047 = vst [vmem:[#allocation74_spill] sm:$0xff] %v3620_v26 }
 0x1f4   :  { %v3622_v52 = vpop.permute.xlu0 %1000  ;;  %v3624_v61 = vpop.permute.xlu1 %996 }
 0x1f5   :  { %v3695_v59 = vsel %vm1006_vm2, %v3622_v52, %v1005_v54 }
 0x1f8   :  { %1223 = vrot.lane.b32.xlu2 %v3269_v1, %s2485_s11 }
 0x1fa   :  { %1286 = vrot.lane.b32.xlu0 %v3071_v31, %s2486_s12  ;;  %1221 = vrot.lane.b32.xlu1 %v3265_v57, %s2485_s11  ;;  %v3630_v53 = vpop.permute.xlu2 %1083 }
 0x1fb   :  { %6048 = vst [vmem:[#allocation75_spill] sm:$0xff] %v3630_v53 }
 0x1fc   :  { %v3632_v39 = vpop.permute.xlu0 %1067  ;;  %v1003_v13 = vpop.permute.xlu1 %1002 }
 0x1fd   :  { %6049 = vst [vmem:[#allocation76_spill] sm:$0xff] %v3632_v39 }
 0x200   :  { %1290 = vrot.lane.b32.xlu2 %v3115_v23, %s2486_s12 }
 0x202   :  { %1292 = vrot.lane.b32.xlu0 %v3131_v14, %s2486_s12  ;;  %1288 = vrot.lane.b32.xlu1 %v3127_v46, %s2486_s12  ;;  %v3640_v3 = vpop.permute.xlu2 %1089 }
 0x203   :  { %6050 = vst [vmem:[#allocation77_spill] sm:$0xff] %v3640_v3 }
 0x204   :  { %v3642_v26 = vpop.permute.xlu0 %1073  ;;  %v3644_v20 = vpop.permute.xlu1 %1069 }
 0x205   :  { %6051 = vst [vmem:[#allocation78_spill] sm:$0xff] %v3642_v26 }
 0x206   :  { %6052 = vst [vmem:[#allocation79_spill] sm:$0xff] %v3644_v20 }
 0x208   :  { %1296 = vrot.lane.b32.xlu2 %v3165_v25, %s2486_s12 }
 0x20a   :  { %1298 = vrot.lane.b32.xlu0 %v3173_v56, %s2486_s12  ;;  %1294 = vrot.lane.b32.xlu1 %v3171_v51, %s2486_s12  ;;  %v3652_v53 = vpop.permute.xlu2 %1132 }
 0x20b   :  { %6053 = vst [vmem:[#allocation80_spill] sm:$0xff] %v3652_v53  ;;  %v3674_v53 = vsel %vm1006_vm2, %v3595_v49, %v1003_v13 }
 0x20c   :  { %v3654_v39 = vpop.permute.xlu0 %1079  ;;  %v3656_v60 = vpop.permute.xlu1 %1075 }
 0x20d   :  { %6054 = vst [vmem:[#allocation81_spill] sm:$0xff] %v3654_v39  ;;  %v1024_v39 = vmul.f32 0.054488685, %v3674_v53 }
 0x20e   :  { %6055 = vst [vmem:[#allocation82_spill] sm:$0xff] %v3656_v60 }
 0x210   :  { %1302 = vrot.lane.b32.xlu2 %v3209_v21, %s2486_s12 }
 0x212   :  { %1304 = vrot.lane.b32.xlu0 %v3223_v8, %s2486_s12  ;;  %1300 = vrot.lane.b32.xlu1 %v3221_v15, %s2486_s12  ;;  %v3664_v20 = vpop.permute.xlu2 %1138 }
 0x213   :  { %6056 = vst [vmem:[#allocation83_spill] sm:$0xff] %v3664_v20 }
 0x214   :  { %v3666_v26 = vpop.permute.xlu0 %1085  ;;  %v3668_v47 = vpop.permute.xlu1 %1081 }
 0x215   :  { %6057 = vst [vmem:[#allocation84_spill] sm:$0xff] %v3666_v26 }
 0x216   :  { %6058 = vst [vmem:[#allocation85_spill] sm:$0xff] %v3668_v47  ;;  %v577_v47 = vmul.f32 0.40261996, %v3252_v44 }
 0x218   :  { %1308 = vrot.lane.b32.xlu2 %v3247_v29, %s2486_s12  ;;  %v1036_v4 = vadd.f32 %v1024_v39, %v577_v47  ;;  %v583_v47 = vmul.f32 0.40261996, %v3267_v6 }
 0x21a   :  { %1310 = vrot.lane.b32.xlu0 %v3252_v44, %s2486_s12  ;;  %1306 = vrot.lane.b32.xlu1 %v3250_v43, %s2486_s12  ;;  %v3683_v26 = vpop.permute.xlu2 %1144 }
 0x21b   :  { %6059 = vst [vmem:[#allocation86_spill] sm:$0xff] %v3683_v26  ;;  %v1030_v26 = vmul.f32 0.054488685, %v3695_v59 }
 0x21c   :  { %v1092_v20 = vpop.permute.xlu0 %1091  ;;  %v3687_v13 = vpop.permute.xlu1 %1087 }
 0x21d   :  { %6060 = vst [vmem:[#allocation87_spill] sm:$0xff] %v3687_v13  ;;  %v1096_v60 = vsel %vm1095_vm3, %v3687_v13, %v1092_v20 }
 0x21e   :  { %v1113_v63 = vmul.f32 0.24420135, %v1096_v60 }
 0x220   :  { %v1125_v48 = vadd.f32 %v1113_v63, %v1036_v4  ;;  %1314 = vrot.lane.b32.xlu2 %v3265_v57, %s2486_s12  ;;  %v1042_v4 = vadd.f32 %v1030_v26, %v583_v47 }
 0x222   :  { %1316 = vrot.lane.b32.xlu0 %v3269_v1, %s2486_s12  ;;  %1312 = vrot.lane.b32.xlu1 %v3267_v6, %s2486_s12  ;;  %v3704_v20 = vpop.permute.xlu2 %1150 }
 0x223   :  { %6061 = vst [vmem:[#allocation88_spill] sm:$0xff] %v3704_v20 }
 0x224   :  { %v3706_v60 = vpop.permute.xlu0 %1134  ;;  %v1094_v54 = vpop.permute.xlu1 %1093 }
 0x225   :  { %6062 = vst [vmem:[#allocation89_spill] sm:$0xff] %v3706_v60  ;;  %v1097_v63 = vsel %vm1095_vm3, %v3640_v3, %v1094_v54 }
 0x226   :  { %v1119_v39 = vmul.f32 0.24420135, %v1097_v63 }
 0x228   :  { %v1131_v13 = vadd.f32 %v1119_v39, %v1042_v4  ;;  %1369 = vrot.lane.b32.xlu2 %v3127_v46, %s2487_s13 }
 0x22a   :  { %1371 = vrot.lane.b32.xlu0 %v3115_v23, %s2487_s13  ;;  %1367 = vrot.lane.b32.xlu1 %v3071_v31, %s2487_s13  ;;  %v1157_v20 = vpop.permute.xlu2 %1156 }
 0x22c   :  { %v3718_v60 = vpop.permute.xlu0 %1140  ;;  %v3720_v38 = vpop.permute.xlu1 %1136 }
 0x22d   :  { %6063 = vst [vmem:[#allocation90_spill] sm:$0xff] %v3718_v60 }
 0x22e   :  { %6064 = vst [vmem:[#allocation91_spill] sm:$0xff] %v3720_v38 }
 0x230   :  { %1375 = vrot.lane.b32.xlu2 %v3171_v51, %s2487_s13 }
 0x232   :  { %1377 = vrot.lane.b32.xlu0 %v3165_v25, %s2487_s13  ;;  %1373 = vrot.lane.b32.xlu1 %v3131_v14, %s2487_s13  ;;  %v3728_v26 = vpop.permute.xlu2 %1199 }
 0x234   :  { %v3730_v47 = vpop.permute.xlu0 %1146  ;;  %v3732_v54 = vpop.permute.xlu1 %1142 }
 0x235   :  { %6065 = vst [vmem:[#allocation92_spill] sm:$0xff] %v3730_v47 }
 0x236   :  { %6066 = vst [vmem:[#allocation93_spill] sm:$0xff] %v3732_v54 }
 0x238   :  { %1381 = vrot.lane.b32.xlu2 %v3221_v15, %s2487_s13 }
 0x23a   :  { %1383 = vrot.lane.b32.xlu0 %v3209_v21, %s2487_s13  ;;  %1379 = vrot.lane.b32.xlu1 %v3173_v56, %s2487_s13  ;;  %v3740_v63 = vpop.permute.xlu2 %1205 }
 0x23c   :  { %v3743_v4 = vpop.permute.xlu0 %1152  ;;  %v3745_v39 = vpop.permute.xlu1 %1148 }
 0x23d   :  { %6067 = vst [vmem:[#allocation94_spill] sm:$0xff] %v3743_v4  ;;  %v1161_v3 = vsel %vm1160_vm4, %v3743_v4, %v1157_v20  ;;  %v3782_v4 = vsel %vm1006_vm2, %v3597_v35, %v3547_v17 }
 0x23e   :  { %6068 = vst [vmem:[#allocation95_spill] sm:$0xff] %v3745_v39  ;;  %v1178_v47 = vmul.f32 0.24420135, %v1161_v3  ;;  %v3773_v3 = vsel %vm824_vm5, %v3394_v50, %v3435_v9 }
 0x23f   :  { %6071 = vst [vmem:[#allocation98_spill] sm:$0xff] %v3773_v3  ;;  %v841_v18 = vmul.f32 0.15246914, %v3773_v3 }
 0x240   :  { %v3750_v54 = vadd.f32 %v1178_v47, %v1125_v48  ;;  %1387 = vrot.lane.b32.xlu2 %v3250_v43, %s2487_s13  ;;  %v3767_v48 = vsel %vm824_vm5, %v3435_v9, %v3433_v62  ;;  %6072 = vst [vmem:[#allocation99_spill] sm:$0xff] %v3782_v4  ;;  %v3790_v9 = vsel %vm1006_vm2, %v3599_v32, %v3597_v35 }
 0x241   :  { %6070 = vst [vmem:[#allocation97_spill] sm:$0xff] %v3767_v48  ;;  %v842_v27 = vmul.f32 0.15246914, %v3767_v48  ;;  %v3810_v32 = vsel %vm824_vm5, %v3423_v5, %v3403_v55  ;;  %v3840_v55 = vsel %vm1006_vm2, %v3604_v22, %v3577_v19 }
 0x242   :  { %1389 = vrot.lane.b32.xlu0 %v3247_v29, %s2487_s13  ;;  %1385 = vrot.lane.b32.xlu1 %v3223_v8, %s2487_s13  ;;  %v3758_v60 = vpop.permute.xlu2 %1211  ;;  %6073 = vst [vmem:[#allocation100_spill] sm:$0xff] %v3790_v9 }
 0x243   :  { %6078 = vst [vmem:[#allocation105_spill] sm:$0xff] %v3840_v55 }
 0x244   :  { %v1159_v39 = vpop.permute.xlu0 %1158  ;;  %v3761_v38 = vpop.permute.xlu1 %1154 }
 0x245   :  { %6069 = vst [vmem:[#allocation96_spill] sm:$0xff] %v3761_v38  ;;  %v1162_v20 = vsel %vm1160_vm4, %v3761_v38, %v1159_v39  ;;  %v584_v39 = vmul.f32 0.25137913, %v3115_v23  ;;  %v1044_v38 = vmul.f32 0.22184129, %v3782_v4 }
 0x246   :  { %v1184_v47 = vmul.f32 0.24420135, %v1162_v20  ;;  %v585_v20 = vmul.f32 0.25137913, %v3171_v51 }
 0x248   :  { %v3792_v50 = vadd.f32 %v1184_v47, %v1131_v13  ;;  %1393 = vrot.lane.b32.xlu2 %v3267_v6, %s2487_s13  ;;  %v1043_v13 = vmul.f32 0.22184129, %v3790_v9  ;;  %v853_v47 = vadd.f32 %v841_v18, %v584_v39  ;;  %v854_v4 = vadd.f32 %v842_v27, %v585_v20 }
 0x249   :  { %v847_v27 = vmul.f32 0.15246914, %v3810_v32 }
 0x24a   :  { %1395 = vrot.lane.b32.xlu0 %v3265_v57, %s2487_s13  ;;  %1391 = vrot.lane.b32.xlu1 %v3252_v44, %s2487_s13  ;;  %v3804_v35 = vpop.permute.xlu2 %1217  ;;  %v1056_v39 = vadd.f32 %v1044_v38, %v854_v4  ;;  %v1055_v5 = vadd.f32 %v1043_v13, %v853_v47  ;;  %v849_v38 = vmul.f32 0.15246914, %v3817_v45  ;;  %v3855_v4 = vsel %vm1006_vm2, %v3606_v30, %v3604_v22 }
 0x24b   :  { %6080 = vst [vmem:[#allocation107_spill] sm:$0xff] %v3855_v4  ;;  %v3866_v47 = vsel %vm824_vm5, %v3433_v62, %v3412_v12  ;;  %v592_v22 = vmul.f32 0.25137913, %v3221_v15  ;;  %v1051_v30 = vmul.f32 0.22184129, %v3840_v55 }
 0x24c   :  { %v1202_v48 = vpop.permute.xlu0 %1201  ;;  %v1198_v3 = vpop.permute.xlu1 %1197  ;;  %6082 = vst [vmem:[#allocation109_spill] sm:$0xff] %v3866_v47  ;;  %v1050_v62 = vmul.f32 0.22184129, %v3855_v4  ;;  %v3914_v4 = vsel %vm1006_vm2, %v3613_v0, %v3595_v49 }
 0x24d   :  { %v3828_v9 = vsel %vm1225_vm6, %v1202_v48, %v3740_v63  ;;  %v3832_v18 = vsel %vm1225_vm6, %v1198_v3, %v1202_v48  ;;  %v848_v3 = vmul.f32 0.15246914, %v3823_v24  ;;  %v3892_v24 = vsel %vm824_vm5, %v3459_v36, %v3457_v37 }
 0x24e   :  { %6076 = vst [vmem:[#allocation103_spill] sm:$0xff] %v3828_v9  ;;  %v1263_v20 = vmul.f32 0.22184129, %v3828_v9  ;;  %v1262_v48 = vmul.f32 0.22184129, %v3832_v18 }
 0x24f   :  { %6077 = vst [vmem:[#allocation104_spill] sm:$0xff] %v3832_v18  ;;  %v591_v18 = vmul.f32 0.25137913, %v3165_v25 }
 0x250   :  { %v3857_v13 = vadd.f32 %v1263_v20, %v1056_v39  ;;  %1472 = vrot.lane.b32.xlu2 %v3071_v31, %s2488_s14  ;;  %v3869_v9 = vadd.f32 %v1262_v48, %v1055_v5  ;;  %v1049_v39 = vmul.f32 0.22184129, %v3846_v41  ;;  %v3884_v5 = vsel %vm824_vm5, %v3412_v12, %v3459_v36 }
 0x251   :  { %v859_v48 = vadd.f32 %v847_v27, %v590_v16  ;;  %v861_v41 = vadd.f32 %v849_v38, %v592_v22 }
 0x252   :  { %6081 = vst [vmem:[#allocation108_spill] sm:$0xff] %v3857_v13  ;;  %1474 = vrot.lane.b32.xlu0 %v3127_v46, %s2488_s14  ;;  %1397 = vrot.lane.b32.xlu1 %v3269_v1, %s2487_s13  ;;  %v3878_v20 = vpop.permute.xlu2 %1223  ;;  %v843_v13 = vmul.f32 0.15246914, %v3866_v47 }
 0x253   :  { %6083 = vst [vmem:[#allocation110_spill] sm:$0xff] %v3869_v9  ;;  %v860_v9 = vadd.f32 %v848_v3, %v591_v18  ;;  %v844_v3 = vmul.f32 0.15246914, %v3884_v5  ;;  %v1063_v38 = vadd.f32 %v1051_v30, %v861_v41  ;;  %v1061_v16 = vadd.f32 %v1049_v39, %v859_v48 }
 0x254   :  { %v1208_v55 = vpop.permute.xlu0 %1207  ;;  %v1204_v45 = vpop.permute.xlu1 %1203  ;;  %v586_v41 = vmul.f32 0.25137913, %v3173_v56  ;;  %v1047_v48 = vmul.f32 0.22184129, %v3914_v4 }
 0x255   :  { %v3897_v12 = vsel %vm1225_vm6, %v1208_v55, %v3758_v60  ;;  %v3901_v27 = vsel %vm1225_vm6, %v1204_v45, %v1208_v55  ;;  %v3906_v18 = vsel %vm1225_vm6, %v3728_v26, %v1204_v45  ;;  %v1062_v22 = vadd.f32 %v1050_v62, %v860_v9 }
 0x256   :  { %6084 = vst [vmem:[#allocation111_spill] sm:$0xff] %v3897_v12  ;;  %v1270_v36 = vmul.f32 0.22184129, %v3897_v12  ;;  %v1268_v55 = vmul.f32 0.22184129, %v3906_v18  ;;  %v3923_v26 = vsel %vm1006_vm2, %v3615_v58, %v3613_v0  ;;  %v3929_v9 = vsel %vm1006_vm2, %v3547_v17, %v3615_v58 }
 0x257   :  { %6085 = vst [vmem:[#allocation112_spill] sm:$0xff] %v3901_v27  ;;  %v1269_v47 = vmul.f32 0.22184129, %v3901_v27  ;;  %v845_v45 = vmul.f32 0.15246914, %v3892_v24  ;;  %v3953_v58 = vsel %vm824_vm5, %v3445_v11, %v3421_v40 }
 0x258   :  { %6086 = vst [vmem:[#allocation113_spill] sm:$0xff] %v3906_v18  ;;  %v3931_v49 = vadd.f32 %v1270_v36, %v1063_v38  ;;  %1478 = vrot.lane.b32.xlu2 %v3131_v14, %s2488_s14  ;;  %v3936_v30 = vadd.f32 %v1268_v55, %v1061_v16  ;;  %v587_v0 = vmul.f32 0.25137913, %v3209_v21  ;;  %v588_v62 = vmul.f32 0.25137913, %v3250_v43  ;;  %v6127_v18 = vld [vmem:[#allocation21_spill] sm:$0xff] }
 0x259   :  { %v3938_v39 = vadd.f32 %v1269_v47, %v1062_v22  ;;  %v1045_v47 = vmul.f32 0.22184129, %v3929_v9  ;;  %v1046_v38 = vmul.f32 0.22184129, %v3923_v26  ;;  %v855_v16 = vadd.f32 %v843_v13, %v586_v41 }
 0x25a   :  { %6087 = vst [vmem:[#allocation114_spill] sm:$0xff] %v3931_v49  ;;  %1480 = vrot.lane.b32.xlu0 %v3171_v51, %s2488_s14  ;;  %1476 = vrot.lane.b32.xlu1 %v3115_v23, %s2488_s14  ;;  %v3947_v17 = vpop.permute.xlu2 %1290  ;;  %v856_v36 = vadd.f32 %v844_v3, %v587_v0  ;;  %v857_v22 = vadd.f32 %v845_v45, %v588_v62  ;;  %v850_v3 = vmul.f32 0.15246914, %v3953_v58 }
 0x25b   :  { %6088 = vst [vmem:[#allocation115_spill] sm:$0xff] %v3936_v30  ;;  %v3982_v45 = vsel %vm824_vm5, %v3421_v40, %v3471_v28  ;;  %v1057_v62 = vadd.f32 %v1045_v47, %v855_v16  ;;  %v595_v16 = vmul.f32 0.25137913, %v3267_v6  ;;  %v4192_v30 = vmul.f32 0.40261996, %v3209_v21 }
 0x25c   :  { %6089 = vst [vmem:[#allocation116_spill] sm:$0xff] %v3938_v39  ;;  %v1214_v55 = vpop.permute.xlu0 %1213  ;;  %v1210_v49 = vpop.permute.xlu1 %1209  ;;  %v1059_v41 = vadd.f32 %v1047_v48, %v857_v22  ;;  %v851_v48 = vmul.f32 0.15246914, %v3982_v45  ;;  %v6125_v39 = vld [vmem:[#allocation68_spill] sm:$0xff] }
 0x25d   :  { %6090 = vst [vmem:[#allocation117_spill] sm:$0xff] %v3947_v17  ;;  %v3961_v17 = vsel %vm824_vm5, %v3471_v28, %v3469_v33  ;;  %v3966_v11 = vsel %vm1225_vm6, %v1214_v55, %v3804_v35  ;;  %v3970_v27 = vsel %vm1225_vm6, %v1210_v49, %v1214_v55  ;;  %v3975_v13 = vsel %vm1225_vm6, %v3740_v63, %v1210_v49 }
 0x25e   :  { %6091 = vst [vmem:[#allocation118_spill] sm:$0xff] %v3961_v17  ;;  %v1266_v0 = vmul.f32 0.22184129, %v3966_v11  ;;  %v1058_v33 = vadd.f32 %v1046_v38, %v856_v36  ;;  %v1264_v55 = vmul.f32 0.22184129, %v3975_v13  ;;  %v3992_v49 = vsel %vm1006_vm2, %v3624_v61, %v3622_v52 }
 0x25f   :  { %6092 = vst [vmem:[#allocation119_spill] sm:$0xff] %v3966_v11  ;;  %v1265_v12 = vmul.f32 0.22184129, %v3970_v27  ;;  %v852_v63 = vmul.f32 0.15246914, %v3961_v17  ;;  %v3998_v28 = vsel %vm1006_vm2, %v3577_v19, %v3624_v61 }
 0x260   :  { %6093 = vst [vmem:[#allocation120_spill] sm:$0xff] %v3970_v27  ;;  %v4000_v40 = vadd.f32 %v1266_v0, %v1059_v41  ;;  %1484 = vrot.lane.b32.xlu2 %v3173_v56, %s2488_s14  ;;  %v4005_v47 = vadd.f32 %v1264_v55, %v1057_v62  ;;  %v593_v52 = vmul.f32 0.25137913, %v3223_v8  ;;  %v1054_v36 = vmul.f32 0.22184129, %v3695_v59 }
 0x261   :  { %6094 = vst [vmem:[#allocation121_spill] sm:$0xff] %v3975_v13  ;;  %v4007_v38 = vadd.f32 %v1265_v12, %v1058_v33  ;;  %v594_v61 = vmul.f32 0.25137913, %v3247_v29  ;;  %v1052_v22 = vmul.f32 0.22184129, %v3998_v28  ;;  %v4025_v59 = vsel %vm824_vm5, %v3457_v37, %v3431_v42  ;;  %v6118_v42 = vld [vmem:[#allocation30_spill] sm:$0xff] }
 0x262   :  { %6095 = vst [vmem:[#allocation122_spill] sm:$0xff] %v3992_v49  ;;  %1486 = vrot.lane.b32.xlu0 %v3221_v15, %s2488_s14  ;;  %1482 = vrot.lane.b32.xlu1 %v3165_v25, %s2488_s14  ;;  %v4016_v19 = vpop.permute.xlu2 %1296  ;;  %v1053_v33 = vmul.f32 0.22184129, %v3992_v49  ;;  %v862_v12 = vadd.f32 %v850_v3, %v593_v52  ;;  %v864_v41 = vadd.f32 %v852_v63, %v595_v16  ;;  %v4189_v13 = vmul.f32 0.40261996, %v3173_v56 }
 0x263   :  { %6096 = vst [vmem:[#allocation123_spill] sm:$0xff] %v4000_v40  ;;  %v863_v55 = vadd.f32 %v851_v48, %v594_v61 }
 0x264   :  { %6097 = vst [vmem:[#allocation124_spill] sm:$0xff] %v4005_v47  ;;  %v1220_v0 = vpop.permute.xlu0 %1219  ;;  %v1216_v62 = vpop.permute.xlu1 %1215  ;;  %v1066_v52 = vadd.f32 %v1054_v36, %v864_v41  ;;  %v1064_v63 = vadd.f32 %v1052_v22, %v862_v12  ;;  %v1048_v22 = vmul.f32 0.22184129, %v3674_v53  ;;  %v4176_v47 = vmul.f32 0.40261996, %v3250_v43 }
 0x265   :  { %6098 = vst [vmem:[#allocation125_spill] sm:$0xff] %v4007_v38  ;;  %v4032_v40 = vsel %vm1225_vm6, %v1216_v62, %v1220_v0  ;;  %v4037_v3 = vsel %vm1225_vm6, %v3758_v60, %v1216_v62  ;;  %v1065_v16 = vadd.f32 %v1053_v33, %v863_v55 }
 0x266   :  { %6099 = vst [vmem:[#allocation126_spill] sm:$0xff] %v4016_v19  ;;  %v1227_v19 = vsel %vm1225_vm6, %v1220_v0, %v3878_v20  ;;  %v1271_v48 = vmul.f32 0.22184129, %v4037_v3  ;;  %v1272_v61 = vmul.f32 0.22184129, %v4032_v40 }
 0x267   :  { %6100 = vst [vmem:[#allocation127_spill] sm:$0xff] %v4032_v40  ;;  %v1249_v37 = vmul.f32 0.054488685, %v1227_v19  ;;  %v1273_v17 = vmul.f32 0.22184129, %v1227_v19 }
 0x268   :  { %6101 = vst [vmem:[#allocation128_spill] sm:$0xff] %v4037_v3  ;;  %v846_v20 = vmul.f32 0.15246914, %v4025_v59  ;;  %1490 = vrot.lane.b32.xlu2 %v3223_v8, %s2488_s14  ;;  %v4049_v60 = vadd.f32 %v1271_v48, %v1064_v63  ;;  %v4051_v36 = vadd.f32 %v1272_v61, %v1065_v16  ;;  %v589_v19 = vmul.f32 0.25137913, %v3252_v44 }
 0x269   :  { %v4043_v27 = vadd.f32 %v1249_v37, %v3792_v50  ;;  %v4045_v0 = vadd.f32 %v1273_v17, %v1066_v52  ;;  %v4087_v48 = vmul.f32 0.21260943, %v3165_v25  ;;  %v4090_v61 = vmul.f32 0.21260943, %v3131_v14  ;;  %6120 = vst [vmem:[#allocation145_spill] sm:$0xff] %v4176_v47 }
 0x26a   :  { %6104 = vst [vmem:[#allocation131_spill] sm:$0xff] %v4049_v60  ;;  %1492 = vrot.lane.b32.xlu0 %v3250_v43, %s2488_s14  ;;  %1488 = vrot.lane.b32.xlu1 %v3209_v21, %s2488_s14  ;;  %v4059_v50 = vpop.permute.xlu2 %1302  ;;  %v858_v17 = vadd.f32 %v846_v20, %v589_v19  ;;  %v4093_v20 = vmul.f32 0.21260943, %v3209_v21  ;;  %v4096_v19 = vmul.f32 0.21260943, %v3171_v51 }
 0x26b   :  { %6102 = vst [vmem:[#allocation129_spill] sm:$0xff] %v4043_v27  ;;  %v4123_v27 = vmul.f32 0.21260943, %v3252_v44  ;;  %v4142_v40 = vmul.f32 0.22254893, %v3171_v51 }
 0x26c   :  { %6103 = vst [vmem:[#allocation130_spill] sm:$0xff] %v4045_v0  ;;  %v4061_v33 = vpop.permute.xlu0 %1286  ;;  %v1222_v12 = vpop.permute.xlu1 %1221  ;;  %v1060_v62 = vadd.f32 %v1048_v22, %v858_v17  ;;  %v4099_v22 = vmul.f32 0.21260943, %v3173_v56  ;;  %v4102_v17 = vmul.f32 0.21260943, %v3071_v31 }
 0x26d   :  { %6105 = vst [vmem:[#allocation132_spill] sm:$0xff] %v4051_v36  ;;  %v1226_v41 = vsel %vm1225_vm6, %v3804_v35, %v1222_v12  ;;  %v4080_v35 = vmul.f32 0.21260943, %v3115_v23  ;;  %v4105_v12 = vmul.f32 0.21260943, %v3247_v29 }
 0x26e   :  { %6106 = vst [vmem:[#allocation133_spill] sm:$0xff] %v4061_v33  ;;  %v1243_v55 = vmul.f32 0.054488685, %v1226_v41  ;;  %v1267_v52 = vmul.f32 0.22184129, %v1226_v41 }
 0x26f   :  { %v4108_v41 = vmul.f32 0.21260943, %v3221_v15  ;;  %v4129_v0 = vmul.f32 0.21260943, %v3267_v6  ;;  %6113 = vst [vmem:[#allocation140_spill] sm:$0xff] %v4142_v40 }
 0x270   :  { %v4067_v53 = vadd.f32 %v1243_v55, %v3750_v54  ;;  %v4069_v37 = vadd.f32 %v1267_v52, %v1060_v62  ;;  %1496 = vrot.lane.b32.xlu2 %v3252_v44, %s2488_s14  ;;  %v4111_v62 = vmul.f32 0.21260943, %v3223_v8  ;;  %v4114_v55 = vmul.f32 0.21260943, %v3265_v57  ;;  %6124 = vst [vmem:[#allocation147_spill] sm:$0xff] %v4192_v30  ;;  %v6131_v44 = vld [vmem:[#allocation18_spill] sm:$0xff] }
 0x271   :  { %v4117_v52 = vmul.f32 0.21260943, %v3250_v43  ;;  %6111 = vst [vmem:[#allocation138_spill] sm:$0xff] %v4129_v0  ;;  %v4145_v60 = vmul.f32 0.22254893, %v3127_v46  ;;  %v6130_v43 = vld [vmem:[#allocation27_spill] sm:$0xff] }
 0x272   :  { %6107 = vst [vmem:[#allocation134_spill] sm:$0xff] %v4067_v53  ;;  %1498 = vrot.lane.b32.xlu0 %v3267_v6, %s2488_s14  ;;  %1494 = vrot.lane.b32.xlu1 %v3247_v29, %s2488_s14  ;;  %v4077_v63 = vpop.permute.xlu2 %1308  ;;  %v4126_v53 = vmul.f32 0.21260943, %v3127_v46  ;;  %v4148_v0 = vmul.f32 0.40261996, %v3171_v51  ;;  %v669_v30 = vsel %vm662_vm7, %v6131_v44, %v6130_v43 }
 0x273   :  { %6108 = vst [vmem:[#allocation135_spill] sm:$0xff] %v4069_v37  ;;  %v4132_v37 = vmul.f32 0.21260943, %v3269_v1  ;;  %v4159_v36 = vmul.f32 0.40261996, %v3115_v23 }
 0x274   :  { %v4082_v16 = vpop.permute.xlu0 %1292  ;;  %v4084_v54 = vpop.permute.xlu1 %1288  ;;  %6114 = vst [vmem:[#allocation141_spill] sm:$0xff] %v4145_v60  ;;  %v4162_v40 = vmul.f32 0.40261996, %v3221_v15  ;;  %v4173_v3 = vmul.f32 0.40261996, %v3165_v25 }
 0x275   :  { %6109 = vst [vmem:[#allocation136_spill] sm:$0xff] %v4082_v16 }
 0x276   :  { %6110 = vst [vmem:[#allocation137_spill] sm:$0xff] %v4084_v54 }
 0x277   :  { %6112 = vst [vmem:[#allocation139_spill] sm:$0xff] %v4132_v37 }
 0x278   :  { %1502 = vrot.lane.b32.xlu2 %v3269_v1, %s2488_s14  ;;  %6115 = vst [vmem:[#allocation142_spill] sm:$0xff] %v4162_v40 }
 0x279   :  { %6119 = vst [vmem:[#allocation30_spill] sm:$0xff] %v4173_v3 }
 0x27a   :  { %1553 = vrot.lane.b32.xlu0 %v3071_v31, %s2489_s15  ;;  %1500 = vrot.lane.b32.xlu1 %v3265_v57, %s2488_s14  ;;  %v4139_v16 = vpop.permute.xlu2 %1314  ;;  %v675_v31 = vsel %vm662_vm7, %v3295_v7, %v3300_v34 }
 0x27b   :  { %v1333_v37 = vsel %vm1318_vm8, %v4139_v16, %v4061_v33  ;;  %v674_v33 = vsel %vm662_vm7, %v6118_v42, %v3305_v2  ;;  %v680_v1 = vmul.f32 0.18762717, %v675_v31 }
 0x27c   :  { %v4164_v60 = vpop.permute.xlu0 %1298  ;;  %v4166_v11 = vpop.permute.xlu1 %1294  ;;  %v1342_v49 = vmul.f32 0.21052228, %v1333_v37  ;;  %v689_v57 = vmul.f32 0.18762717, %v674_v33 }
 0x27d   :  { %6116 = vst [vmem:[#allocation143_spill] sm:$0xff] %v4164_v60  ;;  %v4182_v38 = vsel %vm1318_vm8, %v4164_v60, %v4059_v50  ;;  %v4202_v60 = vmul.f32 0.40261996, %v3223_v8 }
 0x27e   :  { %6117 = vst [vmem:[#allocation144_spill] sm:$0xff] %v4166_v11  ;;  %v6122_v11 = vld [vmem:[#allocation31_spill] sm:$0xff]  ;;  %v4195_v6 = vadd.f32 %v1342_v49, %v6125_v39  ;;  %v6132_v39 = vld [vmem:[#allocation24_spill] sm:$0xff]  ;;  %v4216_v49 = vmul.f32 0.40261996, %v3131_v14 }
 0x27f   :  { %6121 = vst [vmem:[#allocation146_spill] sm:$0xff] %v4182_v38  ;;  %v676_v37 = vsel %vm662_vm7, %v6122_v11, %v6118_v42  ;;  %v677_v38 = vsel %vm662_vm7, %v6127_v18, %v3295_v7  ;;  %v4205_v42 = vmul.f32 0.40261996, %v3247_v29  ;;  %v673_v31 = vsel %vm662_vm7, %v3300_v34, %v6132_v39  ;;  %v6140_v29 = vld [vmem:[#allocation37_spill] sm:$0xff] }
 0x280   :  { %6123 = vst [vmem:[#allocation31_spill] sm:$0xff] %v4189_v13  ;;  %1557 = vrot.lane.b32.xlu2 %v3115_v23, %s2489_s15  ;;  %v688_v7 = vmul.f32 0.18762717, %v676_v37  ;;  %v671_v33 = vsel %vm662_vm7, %v6132_v39, %v6131_v44  ;;  %v6136_v13 = vld [vmem:[#allocation14_spill] sm:$0xff]  ;;  %v679_v47 = vmul.f32 0.18762717, %v677_v38 }
 0x281   :  { %6126 = vst [vmem:[#allocation68_spill] sm:$0xff] %v4195_v6  ;;  %v6134_v6 = vld [vmem:[#allocation28_spill] sm:$0xff]  ;;  %v672_v34 = vsel %vm662_vm7, %v3305_v2, %v6136_v13  ;;  %v6137_v23 = vld [vmem:[#allocation45_spill] sm:$0xff]  ;;  %v683_v38 = vmul.f32 0.18762717, %v669_v30 }
 0x282   :  { %6128 = vst [vmem:[#allocation21_spill] sm:$0xff] %v4202_v60  ;;  %v663_v44 = vsel %vm662_vm7, %v6137_v23, %v6127_v18  ;;  %v6138_v39 = vld [vmem:[#allocation25_spill] sm:$0xff]  ;;  %1559 = vrot.lane.b32.xlu0 %v3131_v14, %s2489_s15  ;;  %1555 = vrot.lane.b32.xlu1 %v3127_v46, %s2489_s15  ;;  %v4248_v2 = vpop.permute.xlu2 %1369  ;;  %v682_v3 = vmul.f32 0.18762717, %v671_v33  ;;  %v678_v14 = vsel %vm662_vm7, %v6140_v29, %v6122_v11 }
 0x283   :  { %6129 = vst [vmem:[#allocation148_spill] sm:$0xff] %v4205_v42  ;;  %v6135_v42 = vld [vmem:[#allocation41_spill] sm:$0xff]  ;;  %v665_v18 = vsel %vm662_vm7, %v6138_v39, %v6137_v23  ;;  %v686_v30 = vmul.f32 0.18762717, %v663_v44  ;;  %v695_v33 = vadd.f32 %v679_v47, %v4102_v17 }
 0x284   :  { %6133 = vst [vmem:[#allocation27_spill] sm:$0xff] %v4216_v49  ;;  %v668_v60 = vsel %vm662_vm7, %v6135_v42, %v6134_v6  ;;  %v670_v37 = vsel %vm662_vm7, %v6136_v13, %v6135_v42  ;;  %v667_v49 = vsel %vm662_vm7, %v6130_v43, %v6138_v39  ;;  %v696_v13 = vadd.f32 %v680_v1, %v4080_v35  ;;  %v4259_v46 = vpop.permute.xlu0 %1304 }
 0x285   :  { %6139 = vst [vmem:[#allocation18_spill] sm:$0xff] %v4248_v2  ;;  %v681_v42 = vmul.f32 0.18762717, %v673_v31  ;;  %v692_v40 = vmul.f32 0.18762717, %v668_v60  ;;  %v4261_v2 = vpop.permute.xlu1 %1300  ;;  %v4267_v23 = vsel %vm1318_vm8, %v4259_v46, %v4077_v63  ;;  %v705_v60 = vadd.f32 %v689_v57, %v4087_v48 }
 0x286   :  { %v690_v43 = vmul.f32 0.18762717, %v672_v34  ;;  %6141 = vst [vmem:[#allocation24_spill] sm:$0xff] %v4259_v46  ;;  %v691_v1 = vmul.f32 0.18762717, %v670_v37  ;;  %v704_v31 = vadd.f32 %v688_v7, %v4090_v61  ;;  %v699_v34 = vadd.f32 %v683_v38, %v4093_v20  ;;  %v6144_v37 = vld [vmem:[#allocation38_spill] sm:$0xff] }
 0x287   :  { %6142 = vst [vmem:[#allocation28_spill] sm:$0xff] %v4261_v2  ;;  %v684_v35 = vmul.f32 0.18762717, %v667_v49  ;;  %v685_v11 = vmul.f32 0.18762717, %v665_v18  ;;  %v664_v49 = vsel %vm662_vm7, %v6144_v37, %v6140_v29  ;;  %v666_v44 = vsel %vm662_vm7, %v6134_v6, %v6144_v37  ;;  %v6145_v6 = vld [vmem:[#allocation49_spill] sm:$0xff] }
 0x288   :  { %6143 = vst [vmem:[#allocation41_spill] sm:$0xff] %v4267_v23  ;;  %v687_v39 = vmul.f32 0.18762717, %v678_v14  ;;  %v697_v57 = vadd.f32 %v681_v42, %v4096_v19  ;;  %v698_v48 = vadd.f32 %v682_v3, %v4099_v22  ;;  %v4284_v47 = vadd.f32 %v692_v40, %v4105_v12  ;;  %1563 = vrot.lane.b32.xlu2 %v3165_v25, %s2489_s15  ;;  %v6146_v19 = vld [vmem:[#allocation52_spill] sm:$0xff]  ;;  %v6151_v38 = vld [vmem:[#allocation97_spill] sm:$0xff]  ;;  %v6176_v2 = vld [vmem:[#allocation71_spill] sm:$0xff] }
 0x289   :  { %v706_v61 = vadd.f32 %v690_v43, %v4108_v41  ;;  %v707_v14 = vadd.f32 %v691_v1, %v4111_v62  ;;  %v4291_v29 = vadd.f32 %v686_v30, %v4114_v55  ;;  %v4294_v20 = vadd.f32 %v684_v35, %v4117_v52  ;;  %v6149_v55 = vld [vmem:[#allocation109_spill] sm:$0xff]  ;;  %v6152_v43 = vld [vmem:[#allocation102_spill] sm:$0xff] }
 0x28a   :  { %v840_v3 = vsel %vm824_vm5, %v6146_v19, %v6145_v6  ;;  %v4301_v40 = vadd.f32 %v685_v11, %v4123_v27  ;;  %v4303_v22 = vmul.f32 0.18762717, %v666_v44  ;;  %v4305_v17 = vmul.f32 0.18762717, %v664_v49  ;;  %1565 = vrot.lane.b32.xlu0 %v3173_v56, %s2489_s15  ;;  %1561 = vrot.lane.b32.xlu1 %v3171_v51, %s2489_s15  ;;  %v4312_v41 = vpop.permute.xlu2 %1375  ;;  %v6150_v27 = vld [vmem:[#allocation98_spill] sm:$0xff]  ;;  %v6155_v44 = vld [vmem:[#allocation101_spill] sm:$0xff] }
 0x28b   :  { %v874_v12 = vmul.f32 0.20606813, %v3810_v32  ;;  %v703_v62 = vadd.f32 %v687_v39, %v4126_v53  ;;  %v868_v52 = vmul.f32 0.20606813, %v6149_v55  ;;  %v866_v7 = vmul.f32 0.20606813, %v6150_v27 }
 0x28c   :  { %6147 = vst [vmem:[#allocation14_spill] sm:$0xff] %v4303_v22  ;;  %v867_v42 = vmul.f32 0.20606813, %v6151_v38  ;;  %v877_v18 = vmul.f32 0.20606813, %v3953_v58  ;;  %v6153_v30 = vld [vmem:[#allocation26_spill] sm:$0xff]  ;;  %v1311_v37 = vpop.permute.xlu0 %1310 }
 0x28d   :  { %6148 = vst [vmem:[#allocation45_spill] sm:$0xff] %v4305_v17  ;;  %v875_v32 = vmul.f32 0.20606813, %v6152_v43  ;;  %v873_v1 = vmul.f32 0.20606813, %v840_v3  ;;  %v6154_v35 = vld [vmem:[#allocation58_spill] sm:$0xff]  ;;  %v1307_v49 = vpop.permute.xlu1 %1306  ;;  %v1319_v39 = vsel %vm1318_vm8, %v1311_v37, %v4139_v16  ;;  %v4337_v3 = vadd.f32 %v874_v12, %v704_v31 }
 0x28e   :  { %v839_v11 = vsel %vm824_vm5, %v6154_v35, %v6153_v30  ;;  %v876_v53 = vmul.f32 0.20606813, %v6155_v44  ;;  %v4330_v6 = vsel %vm1318_vm8, %v1307_v49, %v1311_v37  ;;  %v4335_v58 = vsel %vm1318_vm8, %v4059_v50, %v1307_v49  ;;  %v6158_v55 = vld [vmem:[#allocation40_spill] sm:$0xff]  ;;  %v6159_v27 = vld [vmem:[#allocation50_spill] sm:$0xff]  ;;  %v6160_v49 = vld [vmem:[#allocation69_spill] sm:$0xff] }
 0x28f   :  { %6156 = vst [vmem:[#allocation25_spill] sm:$0xff] %v4330_v6  ;;  %v4343_v38 = vsel %vm743_vm0, %v6159_v27, %v6158_v55  ;;  %v869_v43 = vmul.f32 0.20606813, %v3884_v5  ;;  %v1341_v16 = vmul.f32 0.21052228, %v1319_v39  ;;  %v4346_v30 = vadd.f32 %v868_v52, %v698_v48  ;;  %v6163_v52 = vld [vmem:[#allocation100_spill] sm:$0xff] }
 0x290   :  { %6157 = vst [vmem:[#allocation37_spill] sm:$0xff] %v4335_v58  ;;  %v4348_v37 = vadd.f32 %v866_v7, %v696_v13  ;;  %v4350_v44 = vadd.f32 %v867_v42, %v697_v57  ;;  %v865_v51 = vmul.f32 0.20606813, %v839_v11  ;;  %v4352_v50 = vadd.f32 %v877_v18, %v707_v14  ;;  %1569 = vrot.lane.b32.xlu2 %v3209_v21, %s2489_s15  ;;  %v6162_v14 = vld [vmem:[#allocation99_spill] sm:$0xff]  ;;  %v6164_v42 = vld [vmem:[#allocation105_spill] sm:$0xff]  ;;  %v6168_v27 = vld [vmem:[#allocation76_spill] sm:$0xff] }
 0x291   :  { %v4354_v31 = vadd.f32 %v875_v32, %v705_v60  ;;  %v4356_v12 = vadd.f32 %v873_v1, %v703_v62  ;;  %v4359_v25 = vadd.f32 %v1341_v16, %v6160_v49  ;;  %v4363_v5 = vadd.f32 %v876_v53, %v706_v61  ;;  %v6167_v39 = vld [vmem:[#allocation73_spill] sm:$0xff]  ;;  %v6169_v16 = vld [vmem:[#allocation74_spill] sm:$0xff]  ;;  %v6172_v58 = vld [vmem:[#allocation72_spill] sm:$0xff] }
 0x292   :  { %v4366_v13 = vmul.f32 0.20606813, %v4025_v59  ;;  %v4369_v57 = vmul.f32 0.20606813, %v3892_v24  ;;  %v4372_v48 = vmul.f32 0.20606813, %v3982_v45  ;;  %v4374_v60 = vadd.f32 %v869_v43, %v699_v34  ;;  %1571 = vrot.lane.b32.xlu0 %v3223_v8, %s2489_s15  ;;  %1567 = vrot.lane.b32.xlu1 %v3221_v15, %s2489_s15  ;;  %v4383_v59 = vpop.permute.xlu2 %1381 }
 0x293   :  { %6161 = vst [vmem:[#allocation38_spill] sm:$0xff] %v4359_v25  ;;  %v1020_v62 = vmul.f32 0.054488685, %v6162_v14  ;;  %v1019_v7 = vmul.f32 0.054488685, %v6163_v52  ;;  %v4385_v24 = vadd.f32 %v865_v51, %v695_v33  ;;  %v6165_v45 = vld [vmem:[#allocation106_spill] sm:$0xff]  ;;  %v1106_v43 = vsel %vm1095_vm3, %v6168_v27, %v6167_v39 }
 0x294   :  { %v1027_v18 = vmul.f32 0.054488685, %v6164_v42  ;;  %v1025_v61 = vmul.f32 0.054488685, %v6165_v45  ;;  %v6166_v34 = vld [vmem:[#allocation107_spill] sm:$0xff]  ;;  %v6170_v49 = vld [vmem:[#allocation78_spill] sm:$0xff]  ;;  %v1317_v33 = vpop.permute.xlu0 %1316 }
 0x295   :  { %v1026_v32 = vmul.f32 0.054488685, %v6166_v34  ;;  %v1023_v1 = vmul.f32 0.054488685, %v3914_v4  ;;  %v1021_v11 = vmul.f32 0.054488685, %v3929_v9  ;;  %v1105_v51 = vsel %vm1095_vm3, %v6170_v49, %v6169_v16  ;;  %v1313_v14 = vpop.permute.xlu1 %1312 }
 0x296   :  { %v1022_v53 = vmul.f32 0.054488685, %v3923_v26  ;;  %v6171_v52 = vld [vmem:[#allocation79_spill] sm:$0xff]  ;;  %v1334_v26 = vsel %vm1318_vm8, %v1317_v33, %v4084_v54  ;;  %v1320_v9 = vsel %vm1318_vm8, %v1313_v14, %v1317_v33  ;;  %v1322_v42 = vsel %vm1318_vm8, %v4077_v63, %v1313_v14  ;;  %v6174_v33 = vld [vmem:[#allocation66_spill] sm:$0xff]  ;;  %v6204_v55 = vld [vmem:[#allocation84_spill] sm:$0xff] }
 0x297   :  { %v1107_v4 = vsel %vm1095_vm3, %v6171_v52, %v6170_v49  ;;  %v1032_v45 = vadd.f32 %v1020_v62, %v4148_v0  ;;  %v1350_v34 = vmul.f32 0.21052228, %v1334_v26  ;;  %v1348_v27 = vmul.f32 0.21052228, %v1322_v42  ;;  %v6178_v0 = vld [vmem:[#allocation13_spill] sm:$0xff]  ;;  %v6179_v62 = vld [vmem:[#allocation142_spill] sm:$0xff] }
 0x298   :  { %v1349_v25 = vmul.f32 0.21052228, %v1320_v9  ;;  %v1031_v23 = vadd.f32 %v1019_v7, %v4159_v36  ;;  %v1028_v49 = vmul.f32 0.054488685, %v3998_v28  ;;  %v1108_v52 = vmul.f32 0.24420135, %v1106_v43  ;;  %1575 = vrot.lane.b32.xlu2 %v6178_v0, %s2489_s15 }
 0x299   :  { %v1115_v8 = vmul.f32 0.24420135, %v1105_v51  ;;  %v1114_v6 = vmul.f32 0.24420135, %v1107_v4  ;;  %v4416_v21 = vadd.f32 %v1350_v34, %v6172_v58  ;;  %v4419_v56 = vadd.f32 %v1348_v27, %v6174_v33  ;;  %v6180_v36 = vld [vmem:[#allocation30_spill] sm:$0xff]  ;;  %v6181_v7 = vld [vmem:[#allocation27_spill] sm:$0xff] }
 0x29a   :  { %v4422_v63 = vadd.f32 %v1349_v25, %v6176_v2  ;;  %v4427_v14 = vadd.f32 %v1027_v18, %v6179_v62  ;;  %v1038_v28 = vadd.f32 %v1026_v32, %v6180_v36  ;;  %v1037_v43 = vadd.f32 %v1025_v61, %v6181_v7  ;;  %v6182_v51 = vld [vmem:[#allocation82_spill] sm:$0xff]  ;;  %v6183_v4 = vld [vmem:[#allocation145_spill] sm:$0xff]  ;;  %v6184_v25 = vld [vmem:[#allocation31_spill] sm:$0xff]  ;;  %v4448_v32 = vpop.permute.xlu2 %1387 }
 0x29b   :  { %6173 = vst [vmem:[#allocation49_spill] sm:$0xff] %v4416_v21  ;;  %v1104_v58 = vsel %vm1095_vm3, %v6167_v39, %v6182_v51  ;;  %v4436_v26 = vadd.f32 %v1023_v1, %v6183_v4  ;;  %v1033_v2 = vadd.f32 %v1021_v11, %v6184_v25  ;;  %v6185_v9 = vld [vmem:[#allocation81_spill] sm:$0xff]  ;;  %v6186_v42 = vld [vmem:[#allocation44_spill] sm:$0xff]  ;;  %v6187_v61 = vld [vmem:[#allocation39_spill] sm:$0xff]  ;;  %v1120_v27 = vadd.f32 %v1108_v52, %v1031_v23 }
 0x29c   :  { %6175 = vst [vmem:[#allocation52_spill] sm:$0xff] %v4419_v56  ;;  %v1102_v18 = vsel %vm1095_vm3, %v6182_v51, %v6185_v9  ;;  %1577 = vrot.lane.b32.xlu0 %v6186_v42, %s2489_s15  ;;  %1573 = vrot.lane.b32.xlu1 %v6187_v61, %s2489_s15  ;;  %v6188_v39 = vld [vmem:[#allocation147_spill] sm:$0xff]  ;;  %v6189_v34 = vld [vmem:[#allocation21_spill] sm:$0xff]  ;;  %v4456_v33 = vadd.f32 %v1115_v8, %v1038_v28  ;;  %v1109_v36 = vmul.f32 0.24420135, %v1104_v58  ;;  %v6193_v42 = vld [vmem:[#allocation80_spill] sm:$0xff] }
 0x29d   :  { %6177 = vst [vmem:[#allocation109_spill] sm:$0xff] %v4422_v63  ;;  %v4451_v1 = vadd.f32 %v1022_v53, %v6188_v39  ;;  %v4454_v11 = vadd.f32 %v1028_v49, %v6189_v34  ;;  %v1126_v62 = vadd.f32 %v1114_v6, %v1037_v43  ;;  %v6190_v7 = vld [vmem:[#allocation83_spill] sm:$0xff]  ;;  %v6191_v51 = vld [vmem:[#allocation89_spill] sm:$0xff]  ;;  %v1372_v53 = vpop.permute.xlu0 %1371  ;;  %v4466_v39 = vpop.permute.xlu1 %1367  ;;  %v1110_v49 = vmul.f32 0.24420135, %v1102_v18  ;;  %v6195_v34 = vld [vmem:[#allocation90_spill] sm:$0xff] }
 0x29e   :  { %v1172_v4 = vsel %vm1160_vm4, %v6191_v51, %v6190_v7  ;;  %v6192_v25 = vld [vmem:[#allocation91_spill] sm:$0xff]  ;;  %6194 = vst [vmem:[#allocation98_spill] sm:$0xff] %v4466_v39  ;;  %v1410_v23 = vsel %vm1399_vm9, %v1372_v53, %v4312_v41  ;;  %v1412_v6 = vsel %vm1399_vm9, %v4466_v39, %v1372_v53  ;;  %v6197_v51 = vld [vmem:[#allocation85_spill] sm:$0xff]  ;;  %v6198_v56 = vld [vmem:[#allocation86_spill] sm:$0xff] }
 0x29f   :  { %v1171_v0 = vsel %vm1160_vm4, %v6193_v42, %v6192_v25  ;;  %v1169_v8 = vsel %vm1160_vm4, %v6192_v25, %v6195_v34  ;;  %v6196_v52 = vld [vmem:[#allocation75_spill] sm:$0xff]  ;;  %v1416_v43 = vmul.f32 0.15246914, %v1410_v23  ;;  %v1441_v58 = vmul.f32 0.20606813, %v1410_v23  ;;  %v6199_v46 = vld [vmem:[#allocation110_spill] sm:$0xff] }
 0x2a0   :  { %v1100_v28 = vsel %vm1095_vm3, %v6185_v9, %v6196_v52  ;;  %v1440_v18 = vmul.f32 0.20606813, %v1412_v6  ;;  %v1103_v25 = vsel %vm1095_vm3, %v6169_v16, %v6197_v51  ;;  %v1179_v42 = vmul.f32 0.24420135, %v1172_v4  ;;  %v6203_v6 = vld [vmem:[#allocation11_spill] sm:$0xff]  ;;  %v6215_v22 = vld [vmem:[#allocation116_spill] sm:$0xff] }
 0x2a1   :  { %v1167_v63 = vsel %vm1160_vm4, %v6195_v34, %v6198_v56  ;;  %v1173_v53 = vmul.f32 0.24420135, %v1171_v0  ;;  %v1174_v21 = vmul.f32 0.24420135, %v1169_v8  ;;  %v4491_v61 = vadd.f32 %v1416_v43, %v6199_v46  ;;  %1581 = vrot.lane.b32.xlu2 %v6203_v6, %s2489_s15  ;;  %v6205_v34 = vld [vmem:[#allocation87_spill] sm:$0xff]  ;;  %v6211_v6 = vld [vmem:[#allocation88_spill] sm:$0xff] }
 0x2a2   :  { %v4494_v9 = vadd.f32 %v1441_v58, %v4348_v37  ;;  %v4497_v23 = vadd.f32 %v1440_v18, %v4385_v24  ;;  %v4501_v16 = vmul.f32 0.24420135, %v1100_v28  ;;  %v1121_v4 = vadd.f32 %v1109_v36, %v1032_v45  ;;  %v6206_v24 = vld [vmem:[#allocation93_spill] sm:$0xff]  ;;  %v6208_v45 = vld [vmem:[#allocation36_spill] sm:$0xff]  ;;  %v4520_v36 = vpop.permute.xlu2 %1393  ;;  %v6217_v39 = vld [vmem:[#allocation115_spill] sm:$0xff] }
 0x2a3   :  { %6200 = vst [vmem:[#allocation97_spill] sm:$0xff] %v4491_v61  ;;  %v1122_v15 = vadd.f32 %v1110_v49, %v1033_v2  ;;  %v1101_v0 = vsel %vm1095_vm3, %v6197_v51, %v6204_v55  ;;  %v1116_v46 = vmul.f32 0.24420135, %v1103_v25  ;;  %v1098_v37 = vsel %vm1095_vm3, %v6196_v52, %v6205_v34  ;;  %v6207_v28 = vld [vmem:[#allocation113_spill] sm:$0xff]  ;;  %v6209_v2 = vld [vmem:[#allocation23_spill] sm:$0xff]  ;;  %v6212_v34 = vld [vmem:[#allocation92_spill] sm:$0xff] }
 0x2a4   :  { %6201 = vst [vmem:[#allocation102_spill] sm:$0xff] %v4494_v9  ;;  %v1170_v8 = vsel %vm1160_vm4, %v6190_v7, %v6206_v24  ;;  %v1244_v43 = vmul.f32 0.054488685, %v6207_v28  ;;  %1583 = vrot.lane.b32.xlu0 %v6208_v45, %s2489_s15  ;;  %1579 = vrot.lane.b32.xlu1 %v6209_v2, %s2489_s15  ;;  %v1191_v49 = vadd.f32 %v1179_v42, %v1126_v62  ;;  %v1175_v58 = vmul.f32 0.24420135, %v1167_v63  ;;  %v6210_v51 = vld [vmem:[#allocation103_spill] sm:$0xff] }
 0x2a5   :  { %6202 = vst [vmem:[#allocation26_spill] sm:$0xff] %v4497_v23  ;;  %v1185_v18 = vadd.f32 %v1173_v53, %v1120_v27  ;;  %v1239_v52 = vmul.f32 0.054488685, %v6210_v51  ;;  %v1186_v25 = vadd.f32 %v1174_v21, %v1121_v4  ;;  %v1166_v7 = vsel %vm1160_vm4, %v6212_v34, %v6211_v6  ;;  %v6213_v45 = vld [vmem:[#allocation104_spill] sm:$0xff]  ;;  %v1378_v61 = vpop.permute.xlu0 %1377  ;;  %v1374_v9 = vpop.permute.xlu1 %1373  ;;  %v6214_v27 = vld [vmem:[#allocation18_spill] sm:$0xff] }
 0x2a6   :  { %v1168_v28 = vsel %vm1160_vm4, %v6206_v24, %v6212_v34  ;;  %v1238_v2 = vmul.f32 0.054488685, %v6213_v45  ;;  %v1180_v62 = vmul.f32 0.24420135, %v1170_v8  ;;  %v1409_v63 = vsel %vm1399_vm9, %v1378_v61, %v4383_v59 }
 0x2a7   :  { %v1411_v21 = vsel %vm1399_vm9, %v1374_v9, %v1378_v61  ;;  %v1413_v42 = vsel %vm1399_vm9, %v6214_v27, %v1374_v9  ;;  %v4540_v53 = vadd.f32 %v1244_v43, %v1191_v49  ;;  %v1423_v4 = vmul.f32 0.15246914, %v1409_v63  ;;  %v6218_v43 = vld [vmem:[#allocation77_spill] sm:$0xff] }
 0x2a8   :  { %v1450_v24 = vmul.f32 0.20606813, %v1409_v63  ;;  %v1422_v51 = vmul.f32 0.15246914, %v1411_v21  ;;  %v1181_v34 = vmul.f32 0.24420135, %v1168_v28  ;;  %v4542_v45 = vadd.f32 %v1239_v52, %v1186_v25 }
 0x2a9   :  { %v1448_v8 = vmul.f32 0.20606813, %v1413_v42  ;;  %v1449_v23 = vmul.f32 0.20606813, %v1411_v21  ;;  %v4544_v17 = vadd.f32 %v1238_v2, %v1185_v18  ;;  %v4547_v54 = vadd.f32 %v1423_v4, %v6215_v22  ;;  %1644 = vrot.lane.b32.xlu2 %v4540_v53, %s2490_s16  ;;  %v6219_v18 = vld [vmem:[#allocation95_spill] sm:$0xff]  ;;  %v6220_v28 = vld [vmem:[#allocation94_spill] sm:$0xff] }
 0x2aa   :  { %v4550_v61 = vadd.f32 %v1450_v24, %v4354_v31  ;;  %v4553_v9 = vadd.f32 %v1422_v51, %v6217_v39  ;;  %v1099_v49 = vsel %vm1095_vm3, %v6204_v55, %v6218_v43  ;;  %v1165_v22 = vsel %vm1160_vm4, %v6198_v56, %v6219_v18  ;;  %v6221_v55 = vld [vmem:[#allocation121_spill] sm:$0xff]  ;;  %v4581_v56 = vpop.permute.xlu2 %1472  ;;  %v6223_v4 = vld [vmem:[#allocation112_spill] sm:$0xff] }
 0x2ab   :  { %6216 = vst [vmem:[#allocation58_spill] sm:$0xff] %v4547_v54  ;;  %v4566_v31 = vadd.f32 %v1448_v8, %v4356_v12  ;;  %v4569_v39 = vadd.f32 %v1449_v23, %v4337_v3  ;;  %v1117_v52 = vmul.f32 0.24420135, %v1101_v0  ;;  %v1128_v25 = vadd.f32 %v1116_v46, %v4427_v14  ;;  %v6222_v0 = vld [vmem:[#allocation111_spill] sm:$0xff] }
 0x2ac   :  { %v1163_v2 = vsel %vm1160_vm4, %v6219_v18, %v6220_v28  ;;  %v1240_v63 = vmul.f32 0.054488685, %v6221_v55  ;;  %1646 = vrot.lane.b32.xlu0 %v4542_v45, %s2490_s16  ;;  %1642 = vrot.lane.b32.xlu1 %v4544_v17, %s2490_s16  ;;  %v1112_v3 = vmul.f32 0.24420135, %v1098_v37  ;;  %v1187_v12 = vadd.f32 %v1175_v58, %v1122_v15  ;;  %v6224_v55 = vld [vmem:[#allocation125_spill] sm:$0xff] }
 0x2ad   :  { %v1182_v23 = vmul.f32 0.24420135, %v1166_v7  ;;  %v1246_v14 = vmul.f32 0.054488685, %v6222_v0  ;;  %v1192_v46 = vadd.f32 %v1180_v62, %v4456_v33  ;;  %v1193_v21 = vadd.f32 %v1181_v34, %v1128_v25  ;;  %v1384_v51 = vpop.permute.xlu0 %1383  ;;  %v1380_v8 = vpop.permute.xlu1 %1379 }
 0x2ae   :  { %v1176_v42 = vmul.f32 0.24420135, %v1165_v22  ;;  %v1245_v24 = vmul.f32 0.054488685, %v6223_v4  ;;  %v1177_v43 = vmul.f32 0.24420135, %v1163_v2  ;;  %v1404_v18 = vsel %vm1399_vm9, %v1384_v51, %v4448_v32 }
 0x2af   :  { %v1406_v37 = vsel %vm1399_vm9, %v1380_v8, %v1384_v51  ;;  %v1408_v15 = vsel %vm1399_vm9, %v4312_v41, %v1380_v8  ;;  %v4594_v58 = vadd.f32 %v1240_v63, %v1187_v12  ;;  %v1419_v33 = vmul.f32 0.15246914, %v1404_v18  ;;  %v6227_v51 = vld [vmem:[#allocation108_spill] sm:$0xff] }
 0x2b0   :  { %v1444_v7 = vmul.f32 0.20606813, %v1404_v18  ;;  %v1417_v62 = vmul.f32 0.15246914, %v1408_v15  ;;  %v4596_v34 = vadd.f32 %v1246_v14, %v1193_v21  ;;  %v1418_v22 = vmul.f32 0.15246914, %v1406_v37 }
 0x2b1   :  { %v1442_v25 = vmul.f32 0.20606813, %v1408_v15  ;;  %v1443_v28 = vmul.f32 0.20606813, %v1406_v37  ;;  %v4598_v2 = vadd.f32 %v1245_v24, %v1192_v46  ;;  %v4601_v0 = vadd.f32 %v1419_v33, %v6224_v55  ;;  %1650 = vrot.lane.b32.xlu2 %v4594_v58, %s2490_s16  ;;  %v6229_v12 = vld [vmem:[#allocation124_spill] sm:$0xff] }
 0x2b2   :  { %v4604_v4 = vadd.f32 %v1444_v7, %v4374_v60  ;;  %v4607_v41 = vadd.f32 %v1417_v62, %v6227_v51  ;;  %v894_v63 = vadd.f32 %v4372_v48, %v4284_v47  ;;  %v4614_v14 = vadd.f32 %v1418_v22, %v6229_v12  ;;  %v6231_v18 = vld [vmem:[#allocation128_spill] sm:$0xff]  ;;  %v4631_v47 = vpop.permute.xlu2 %1478  ;;  %v6233_v48 = vld [vmem:[#allocation122_spill] sm:$0xff] }
 0x2b3   :  { %6225 = vst [vmem:[#allocation101_spill] sm:$0xff] %v4601_v0  ;;  %v4617_v46 = vadd.f32 %v1442_v25, %v4350_v44  ;;  %v4620_v21 = vadd.f32 %v1443_v28, %v4346_v30  ;;  %v1123_v60 = vadd.f32 %v4501_v16, %v4451_v1  ;;  %v1129_v24 = vadd.f32 %v1117_v52, %v4454_v11  ;;  %v6232_v30 = vld [vmem:[#allocation51_spill] sm:$0xff]  ;;  %v6235_v33 = vld [vmem:[#allocation120_spill] sm:$0xff] }
 0x2b4   :  { %6226 = vst [vmem:[#allocation50_spill] sm:$0xff] %v4604_v4  ;;  %v1124_v8 = vadd.f32 %v1112_v3, %v4436_v26  ;;  %v1247_v37 = vmul.f32 0.054488685, %v6231_v18  ;;  %1652 = vrot.lane.b32.xlu0 %v4596_v34, %s2490_s16  ;;  %1648 = vrot.lane.b32.xlu1 %v4598_v2, %s2490_s16  ;;  %v825_v44 = vsel %vm824_vm5, %v6232_v30, %v6154_v35  ;;  %v1029_v1 = vmul.f32 0.054488685, %v6233_v48  ;;  %v6234_v16 = vld [vmem:[#allocation119_spill] sm:$0xff] }
 0x2b5   :  { %6228 = vst [vmem:[#allocation69_spill] sm:$0xff] %v4607_v41  ;;  %v1118_v11 = vmul.f32 0.24420135, %v1099_v49  ;;  %v1242_v26 = vmul.f32 0.054488685, %v6234_v16  ;;  %v1194_v52 = vadd.f32 %v1182_v23, %v1129_v24  ;;  %v1188_v3 = vadd.f32 %v1176_v42, %v1123_v60  ;;  %v1390_v62 = vpop.permute.xlu0 %1389  ;;  %v1386_v22 = vpop.permute.xlu1 %1385  ;;  %v6236_v25 = vld [vmem:[#allocation96_spill] sm:$0xff] }
 0x2b6   :  { %6230 = vst [vmem:[#allocation99_spill] sm:$0xff] %v4614_v14  ;;  %v1189_v15 = vadd.f32 %v1177_v43, %v1124_v8  ;;  %v1241_v7 = vmul.f32 0.054488685, %v6235_v33  ;;  %v1164_v28 = vsel %vm1160_vm4, %v6211_v6, %v6236_v25  ;;  %v1403_v35 = vsel %vm1399_vm9, %v1390_v62, %v4520_v36  ;;  %v6237_v18 = vld [vmem:[#allocation132_spill] sm:$0xff]  ;;  %v6240_v16 = vld [vmem:[#allocation114_spill] sm:$0xff] }
 0x2b7   :  { %v1405_v49 = vsel %vm1399_vm9, %v1386_v22, %v1390_v62  ;;  %v1407_v23 = vsel %vm1399_vm9, %v4383_v59, %v1386_v22  ;;  %v4652_v42 = vadd.f32 %v1247_v37, %v1194_v52  ;;  %v1426_v43 = vmul.f32 0.15246914, %v1403_v35  ;;  %v6242_v37 = vld [vmem:[#allocation131_spill] sm:$0xff]  ;;  %v6246_v62 = vld [vmem:[#allocation8_spill] sm:$0xff] }
 0x2b8   :  { %v1453_v55 = vmul.f32 0.20606813, %v1403_v35  ;;  %v1424_v51 = vmul.f32 0.15246914, %v1407_v23  ;;  %v4654_v12 = vadd.f32 %v1242_v26, %v1189_v15  ;;  %v1425_v60 = vmul.f32 0.15246914, %v1405_v49 }
 0x2b9   :  { %v1451_v6 = vmul.f32 0.20606813, %v1407_v23  ;;  %v1452_v24 = vmul.f32 0.20606813, %v1405_v49  ;;  %v4656_v8 = vadd.f32 %v1241_v7, %v1188_v3  ;;  %v4659_v30 = vadd.f32 %v1426_v43, %v6237_v18  ;;  %1656 = vrot.lane.b32.xlu2 %v4652_v42, %s2490_s16  ;;  %v6244_v15 = vld [vmem:[#allocation15_spill] sm:$0xff]  ;;  %v6247_v22 = vld [vmem:[#allocation48_spill] sm:$0xff] }
 0x2ba   :  { %v4661_v48 = vadd.f32 %v1453_v55, %v894_v63  ;;  %v4664_v33 = vadd.f32 %v1424_v51, %v6240_v16  ;;  %v872_v59 = vmul.f32 0.20606813, %v825_v44  ;;  %v4669_v26 = vadd.f32 %v1425_v60, %v6242_v37  ;;  %v6245_v7 = vld [vmem:[#allocation19_spill] sm:$0xff]  ;;  %v6248_v44 = vld [vmem:[#allocation148_spill] sm:$0xff] }
 0x2bb   :  { %6238 = vst [vmem:[#allocation100_spill] sm:$0xff] %v4659_v30  ;;  %v4672_v52 = vadd.f32 %v1451_v6, %v4363_v5  ;;  %v4675_v3 = vadd.f32 %v1452_v24, %v4352_v50  ;;  %v754_v63 = vsel %vm743_vm0, %v6245_v7, %v6244_v15  ;;  %v758_v25 = vsel %vm743_vm0, %v6247_v22, %v6246_v62  ;;  %v4690_v50 = vpop.permute.xlu2 %1484  ;;  %v6249_v55 = vld [vmem:[#allocation55_spill] sm:$0xff]  ;;  %v6251_v60 = vld [vmem:[#allocation60_spill] sm:$0xff]  ;;  %v6252_v6 = vld [vmem:[#allocation70_spill] sm:$0xff] }
 0x2bc   :  { %6239 = vst [vmem:[#allocation105_spill] sm:$0xff] %v4661_v48  ;;  %v1041_v35 = vadd.f32 %v1029_v1, %v6248_v44  ;;  %v1183_v49 = vmul.f32 0.24420135, %v1164_v28  ;;  %1658 = vrot.lane.b32.xlu0 %v4654_v12, %s2490_s16  ;;  %1654 = vrot.lane.b32.xlu1 %v4656_v8, %s2490_s16  ;;  %v768_v5 = vmul.f32 0.17820325, %v4343_v38  ;;  %v887_v23 = vadd.f32 %v4366_v13, %v4301_v40  ;;  %v6250_v28 = vld [vmem:[#allocation118_spill] sm:$0xff] }
 0x2bd   :  { %6241 = vst [vmem:[#allocation106_spill] sm:$0xff] %v4664_v33  ;;  %v886_v43 = vadd.f32 %v4369_v57, %v4294_v20  ;;  %v826_v1 = vsel %vm824_vm5, %v6249_v55, %v6146_v19  ;;  %v879_v51 = vmul.f32 0.20606813, %v6250_v28  ;;  %v945_v24 = vsel %vm929_vm1, %v6252_v6, %v6251_v60  ;;  %v6253_v38 = vld [vmem:[#allocation127_spill] sm:$0xff]  ;;  %v1396_v37 = vpop.permute.xlu0 %1395  ;;  %v1392_v40 = vpop.permute.xlu1 %1391  ;;  %v6254_v20 = vld [vmem:[#allocation98_spill] sm:$0xff]  ;;  %v6255_v6 = vld [vmem:[#allocation136_spill] sm:$0xff] }
 0x2be   :  { %6243 = vst [vmem:[#allocation107_spill] sm:$0xff] %v4669_v26  ;;  %v1130_v18 = vadd.f32 %v1118_v11, %v1041_v35  ;;  %v1248_v16 = vmul.f32 0.054488685, %v6253_v38  ;;  %v888_v13 = vadd.f32 %v872_v59, %v4291_v29  ;;  %v1414_v57 = vsel %vm1399_vm9, %v1396_v37, %v6254_v20  ;;  %v6256_v38 = vld [vmem:[#allocation137_spill] sm:$0xff] }
 0x2bf   :  { %v1400_v19 = vsel %vm1399_vm9, %v1392_v40, %v1396_v37  ;;  %v1402_v22 = vsel %vm1399_vm9, %v4448_v32, %v1392_v40  ;;  %v1447_v55 = vmul.f32 0.20606813, %v1414_v57  ;;  %v954_v28 = vmul.f32 0.21052228, %v945_v24  ;;  %v6257_v37 = vld [vmem:[#allocation123_spill] sm:$0xff]  ;;  %v6261_v24 = vld [vmem:[#allocation138_spill] sm:$0xff] }
 0x2c0   :  { %v1195_v44 = vadd.f32 %v1183_v49, %v1130_v18  ;;  %v1420_v11 = vmul.f32 0.15246914, %v1402_v22  ;;  %v1421_v35 = vmul.f32 0.15246914, %v1400_v19  ;;  %v1332_v29 = vsel %vm1318_vm8, %v6256_v38, %v6255_v6  ;;  %v6259_v32 = vld [vmem:[#allocation135_spill] sm:$0xff]  ;;  %v6262_v18 = vld [vmem:[#allocation14_spill] sm:$0xff] }
 0x2c1   :  { %v1445_v59 = vmul.f32 0.20606813, %v1402_v22  ;;  %v1446_v62 = vmul.f32 0.20606813, %v1400_v19  ;;  %v4722_v7 = vadd.f32 %v1447_v55, %v888_v13  ;;  %1687 = vrot.lane.b32.xlu2 %v4544_v17, %s2491_s17  ;;  %v709_v40 = vadd.f32 %v6262_v18, %v6261_v24  ;;  %v6263_v57 = vld [vmem:[#allocation46_spill] sm:$0xff]  ;;  %v6265_v13 = vld [vmem:[#allocation139_spill] sm:$0xff] }
 0x2c2   :  { %v4720_v20 = vadd.f32 %v1248_v16, %v1195_v44  ;;  %v4725_v26 = vadd.f32 %v1420_v11, %v6257_v37  ;;  %v4728_v49 = vadd.f32 %v1421_v35, %v6259_v32  ;;  %v596_v22 = vmul.f32 0.22254893, %v6263_v57  ;;  %v6266_v44 = vld [vmem:[#allocation45_spill] sm:$0xff] }
 0x2c3   :  { %v4735_v19 = vadd.f32 %v1445_v59, %v886_v43  ;;  %v4737_v16 = vadd.f32 %v1446_v62, %v887_v23  ;;  %v710_v55 = vadd.f32 %v6266_v44, %v6265_v13  ;;  %v6267_v11 = vld [vmem:[#allocation141_spill] sm:$0xff]  ;;  %v1343_v35 = vmul.f32 0.21052228, %v1332_v29  ;;  %v4747_v17 = vpop.permute.xlu2 %1490  ;;  %v6268_v59 = vld [vmem:[#allocation32_spill] sm:$0xff]  ;;  %v6270_v29 = vld [vmem:[#allocation63_spill] sm:$0xff] }
 0x2c4   :  { %6258 = vst [vmem:[#allocation73_spill] sm:$0xff] %v4725_v26  ;;  %v784_v38 = vadd.f32 %v768_v5, %v6267_v11  ;;  %1689 = vrot.lane.b32.xlu0 %v4540_v53, %s2491_s17  ;;  %1660 = vrot.lane.b32.xlu1 %v4720_v20, %s2490_s16  ;;  %v762_v43 = vmul.f32 0.17820325, %v754_v63  ;;  %v6269_v62 = vld [vmem:[#allocation9_spill] sm:$0xff]  ;;  %v760_v37 = vmul.f32 0.17820325, %v758_v25  ;;  %v895_v5 = vadd.f32 %v879_v51, %v709_v40 }
 0x2c5   :  { %6260 = vst [vmem:[#allocation76_spill] sm:$0xff] %v4728_v49  ;;  %v753_v23 = vsel %vm743_vm0, %v6269_v62, %v6268_v59  ;;  %v880_v32 = vmul.f32 0.20606813, %v826_v1  ;;  %v6271_v24 = vld [vmem:[#allocation53_spill] sm:$0xff]  ;;  %v4761_v63 = vpop.permute.xlu0 %1474  ;;  %v1398_v11 = vpop.permute.xlu1 %1397 }
 0x2c6   :  { %6264 = vst [vmem:[#allocation74_spill] sm:$0xff] %v4735_v19  ;;  %v940_v53 = vsel %vm929_vm1, %v6271_v24, %v6270_v29  ;;  %v6272_v18 = vld [vmem:[#allocation57_spill] sm:$0xff]  ;;  %v970_v44 = vadd.f32 %v954_v28, %v784_v38  ;;  %v1518_v1 = vsel %vm1504_vm10, %v4761_v63, %v4631_v47  ;;  %v1401_v51 = vsel %vm1399_vm9, %v4520_v36, %v1398_v11  ;;  %v6279_v36 = vld [vmem:[#allocation130_spill] sm:$0xff] }
 0x2c7   :  { %v6273_v57 = vld [vmem:[#allocation61_spill] sm:$0xff]  ;;  %v1415_v28 = vsel %vm1399_vm9, %v1398_v11, %v6214_v27  ;;  %v1529_v38 = vmul.f32 0.17820325, %v1518_v1  ;;  %v1454_v62 = vmul.f32 0.20606813, %v1401_v51  ;;  %v6280_v27 = vld [vmem:[#allocation12_spill] sm:$0xff] }
 0x2c8   :  { %v944_v13 = vsel %vm929_vm1, %v6273_v57, %v6272_v18  ;;  %v6274_v49 = vld [vmem:[#allocation117_spill] sm:$0xff]  ;;  %v1359_v40 = vadd.f32 %v1343_v35, %v970_v44  ;;  %v1427_v57 = vmul.f32 0.15246914, %v1401_v51  ;;  %v896_v18 = vadd.f32 %v880_v32, %v710_v55  ;;  %v6281_v55 = vld [vmem:[#allocation40_spill] sm:$0xff]  ;;  %v6283_v1 = vld [vmem:[#allocation35_spill] sm:$0xff] }
 0x2c9   :  { %v6275_v26 = vld [vmem:[#allocation133_spill] sm:$0xff]  ;;  %v946_v24 = vmul.f32 0.21052228, %v944_v13  ;;  %v1455_v14 = vmul.f32 0.20606813, %v1415_v28  ;;  %v4786_v19 = vadd.f32 %v1454_v62, %v895_v5  ;;  %1693 = vrot.lane.b32.xlu2 %v4598_v2, %s2491_s17  ;;  %v757_v35 = vsel %vm743_vm0, %v6281_v55, %v6280_v27 }
 0x2ca   :  { %v1331_v25 = vsel %vm1318_vm8, %v6275_v26, %v6274_v49  ;;  %v6276_v26 = vld [vmem:[#allocation143_spill] sm:$0xff]  ;;  %v6277_v49 = vld [vmem:[#allocation144_spill] sm:$0xff]  ;;  %v948_v30 = vmul.f32 0.21052228, %v940_v53  ;;  %v4781_v4 = vadd.f32 %v1529_v38, %v1359_v40  ;;  %v4784_v33 = vadd.f32 %v1427_v57, %v6279_v36  ;;  %v6287_v57 = vld [vmem:[#allocation65_spill] sm:$0xff] }
 0x2cb   :  { %v1327_v48 = vsel %vm1318_vm8, %v6277_v49, %v6276_v26  ;;  %v776_v32 = vadd.f32 %v760_v37, %v596_v22  ;;  %v1335_v13 = vmul.f32 0.21052228, %v1331_v25  ;;  %v4794_v44 = vadd.f32 %v1455_v14, %v896_v18  ;;  %v6282_v53 = vld [vmem:[#allocation140_spill] sm:$0xff]  ;;  %v4802_v62 = vpop.permute.xlu2 %1496  ;;  %v6285_v22 = vld [vmem:[#allocation39_spill] sm:$0xff]  ;;  %v6288_v26 = vld [vmem:[#allocation54_spill] sm:$0xff] }
 0x2cc   :  { %6278 = vst [vmem:[#allocation78_spill] sm:$0xff] %v4781_v4  ;;  %v778_v11 = vadd.f32 %v762_v43, %v6282_v53  ;;  %v607_v51 = vmul.f32 0.22254893, %v6283_v1  ;;  %v1337_v28 = vmul.f32 0.21052228, %v1327_v48  ;;  %1695 = vrot.lane.b32.xlu0 %v4594_v58, %s2491_s17  ;;  %1691 = vrot.lane.b32.xlu1 %v4542_v45, %s2491_s17  ;;  %v6284_v40 = vld [vmem:[#allocation20_spill] sm:$0xff]  ;;  %v939_v36 = vsel %vm929_vm1, %v6288_v26, %v6287_v57 }
 0x2cd   :  { %v771_v5 = vmul.f32 0.17820325, %v753_v23  ;;  %v605_v38 = vmul.f32 0.22254893, %v6284_v40  ;;  %v4806_v37 = vmul.f32 0.22254893, %v6285_v22  ;;  %v962_v14 = vadd.f32 %v946_v24, %v776_v32  ;;  %v1481_v55 = vpop.permute.xlu0 %1480  ;;  %v1477_v23 = vpop.permute.xlu1 %1476 }
 0x2ce   :  { %v769_v18 = vmul.f32 0.17820325, %v757_v35  ;;  %v6286_v43 = vld [vmem:[#allocation59_spill] sm:$0xff]  ;;  %v964_v25 = vadd.f32 %v948_v30, %v778_v11  ;;  %v1513_v40 = vsel %vm1504_vm10, %v1481_v55, %v4690_v50  ;;  %v4821_v24 = vsel %vm1504_vm10, %v1477_v23, %v1481_v55  ;;  %v6292_v1 = vld [vmem:[#allocation33_spill] sm:$0xff]  ;;  %v6295_v26 = vld [vmem:[#allocation28_spill] sm:$0xff] }
 0x2cf   :  { %v943_v48 = vsel %vm929_vm1, %v6251_v60, %v6286_v43  ;;  %v1351_v53 = vadd.f32 %v1335_v13, %v962_v14  ;;  %6289 = vst [vmem:[#allocation79_spill] sm:$0xff] %v4821_v24  ;;  %v1517_v30 = vsel %vm1504_vm10, %v4581_v56, %v1477_v23  ;;  %v6290_v60 = vld [vmem:[#allocation126_spill] sm:$0xff]  ;;  %v1523_v11 = vmul.f32 0.17820325, %v1513_v40  ;;  %v6293_v4 = vld [vmem:[#allocation43_spill] sm:$0xff]  ;;  %v6294_v23 = vld [vmem:[#allocation24_spill] sm:$0xff] }
 0x2d0   :  { %v1330_v35 = vsel %vm1318_vm8, %v6255_v6, %v6290_v60  ;;  %v1353_v32 = vadd.f32 %v1337_v28, %v964_v25  ;;  %v1521_v13 = vmul.f32 0.17820325, %v1517_v30  ;;  %v6291_v14 = vld [vmem:[#allocation42_spill] sm:$0xff]  ;;  %v752_v55 = vsel %vm743_vm0, %v6244_v15, %v6293_v4 }
 0x2d1   :  { %v748_v22 = vsel %vm743_vm0, %v6292_v1, %v6291_v14  ;;  %v955_v43 = vmul.f32 0.21052228, %v943_v48  ;;  %v1326_v24 = vsel %vm1318_vm8, %v6295_v26, %v6294_v23  ;;  %v750_v6 = vsel %vm743_vm0, %v6293_v4, %v6292_v1  ;;  %1699 = vrot.lane.b32.xlu2 %v4656_v8, %s2491_s17  ;;  %v6298_v48 = vld [vmem:[#allocation22_spill] sm:$0xff] }
 0x2d2   :  { %v957_v28 = vmul.f32 0.21052228, %v939_v36  ;;  %v4846_v25 = vadd.f32 %v1523_v11, %v1353_v32  ;;  %v4848_v40 = vadd.f32 %v1521_v13, %v1351_v53  ;;  %v785_v15 = vadd.f32 %v769_v18, %v605_v38  ;;  %v6299_v14 = vld [vmem:[#allocation62_spill] sm:$0xff]  ;;  %v6300_v53 = vld [vmem:[#allocation56_spill] sm:$0xff] }
 0x2d3   :  { %v599_v30 = vmul.f32 0.22254893, %v6298_v48  ;;  %v938_v23 = vsel %vm929_vm1, %v6270_v29, %v6299_v14  ;;  %v1344_v60 = vmul.f32 0.21052228, %v1330_v35  ;;  %v787_v26 = vadd.f32 %v771_v5, %v607_v51  ;;  %v4861_v36 = vpop.permute.xlu2 %1502  ;;  %v6305_v48 = vld [vmem:[#allocation146_spill] sm:$0xff] }
 0x2d4   :  { %6296 = vst [vmem:[#allocation72_spill] sm:$0xff] %v4846_v25  ;;  %v765_v27 = vmul.f32 0.17820325, %v748_v22  ;;  %v763_v4 = vmul.f32 0.17820325, %v752_v55  ;;  %1701 = vrot.lane.b32.xlu0 %v4652_v42, %s2491_s17  ;;  %1697 = vrot.lane.b32.xlu1 %v4596_v34, %s2491_s17  ;;  %v971_v18 = vadd.f32 %v955_v43, %v785_v15  ;;  %v936_v29 = vsel %vm929_vm1, %v6299_v14, %v6300_v53  ;;  %v6302_v14 = vld [vmem:[#allocation49_spill] sm:$0xff] }
 0x2d5   :  { %6297 = vst [vmem:[#allocation66_spill] sm:$0xff] %v4848_v40  ;;  %v1346_v1 = vmul.f32 0.21052228, %v1326_v24  ;;  %v764_v38 = vmul.f32 0.17820325, %v750_v6  ;;  %v1520_v51 = vsel %vm1504_vm10, %v4861_v36, %v4761_v63  ;;  %v973_v22 = vadd.f32 %v957_v28, %v787_v26  ;;  %v6301_v24 = vld [vmem:[#allocation67_spill] sm:$0xff]  ;;  %v1487_v32 = vpop.permute.xlu0 %1486  ;;  %v1483_v11 = vpop.permute.xlu1 %1482 }
 0x2d6   :  { %v949_v5 = vmul.f32 0.21052228, %v938_v23  ;;  %v934_v35 = vsel %vm929_vm1, %v6300_v53, %v6301_v24  ;;  %v1536_v43 = vmul.f32 0.17820325, %v1520_v51  ;;  %v1360_v13 = vadd.f32 %v1344_v60, %v971_v18  ;;  %v6304_v53 = vld [vmem:[#allocation34_spill] sm:$0xff] }
 0x2d7   :  { %v1512_v55 = vsel %vm1504_vm10, %v1487_v32, %v4747_v17  ;;  %v4880_v6 = vsel %vm1504_vm10, %v1483_v11, %v1487_v32  ;;  %v1516_v63 = vsel %vm1504_vm10, %v4631_v47, %v1483_v11  ;;  %v1362_v26 = vadd.f32 %v1346_v1, %v973_v22  ;;  %v6306_v1 = vld [vmem:[#allocation47_spill] sm:$0xff]  ;;  %v6307_v11 = vld [vmem:[#allocation37_spill] sm:$0xff] }
 0x2d8   :  { %v1532_v28 = vmul.f32 0.17820325, %v1512_v55  ;;  %v1530_v15 = vmul.f32 0.17820325, %v1516_v63  ;;  %v4886_v23 = vadd.f32 %v1536_v43, %v6302_v14  ;;  %v600_v60 = vmul.f32 0.22254893, %v6304_v53 }
 0x2d9   :  { %v779_v18 = vadd.f32 %v763_v4, %v599_v30  ;;  %v950_v51 = vmul.f32 0.21052228, %v936_v29  ;;  %v951_v24 = vmul.f32 0.21052228, %v934_v35  ;;  %v1338_v25 = vmul.f32 0.21052228, %v6305_v48  ;;  %1705 = vrot.lane.b32.xlu2 %v4720_v20, %s2491_s17 }
 0x2da   :  { %6303 = vst [vmem:[#allocation71_spill] sm:$0xff] %v4886_v23  ;;  %v4890_v40 = vadd.f32 %v1532_v28, %v1362_v26  ;;  %v4892_v32 = vadd.f32 %v1530_v15, %v1360_v13  ;;  %v780_v47 = vadd.f32 %v764_v38, %v600_v60  ;;  %v751_v22 = vsel %vm743_vm0, %v6268_v59, %v6306_v1  ;;  %v6308_v29 = vld [vmem:[#allocation25_spill] sm:$0xff]  ;;  %v6309_v55 = vld [vmem:[#allocation64_spill] sm:$0xff] }
 0x2db   :  { %v1339_v43 = vmul.f32 0.21052228, %v6307_v11  ;;  %v781_v30 = vadd.f32 %v765_v27, %v4806_v37  ;;  %v965_v4 = vadd.f32 %v949_v5, %v779_v18  ;;  %v1340_v48 = vmul.f32 0.21052228, %v6308_v29  ;;  %v4907_v38 = vpop.permute.xlu2 %1557 }
 0x2dc   :  { %1732 = vrot.lane.b32.xlu0 %v4542_v45, %s2492_s18  ;;  %1703 = vrot.lane.b32.xlu1 %v4654_v12, %s2491_s17  ;;  %v966_v35 = vadd.f32 %v950_v51, %v780_v47  ;;  %v772_v13 = vmul.f32 0.17820325, %v751_v22  ;;  %v937_v59 = vsel %vm929_vm1, %v6287_v57, %v6309_v55 }
 0x2dd   :  { %v967_v27 = vadd.f32 %v951_v24, %v781_v30  ;;  %v1354_v37 = vadd.f32 %v1338_v25, %v965_v4  ;;  %v1493_v5 = vpop.permute.xlu0 %1492  ;;  %v1489_v63 = vpop.permute.xlu1 %1488  ;;  %v6310_v24 = vld [vmem:[#allocation17_spill] sm:$0xff]  ;;  %v958_v47 = vmul.f32 0.21052228, %v937_v59 }
 0x2de   :  { %v1355_v26 = vadd.f32 %v1339_v43, %v966_v35  ;;  %v1507_v28 = vsel %vm1504_vm10, %v1493_v5, %v4802_v62  ;;  %v1509_v15 = vsel %vm1504_vm10, %v1489_v63, %v1493_v5  ;;  %v1511_v14 = vsel %vm1504_vm10, %v4690_v50, %v1489_v63  ;;  %v6311_v30 = vld [vmem:[#allocation41_spill] sm:$0xff] }
 0x2df   :  { %v1356_v60 = vadd.f32 %v1340_v48, %v967_v27  ;;  %v1526_v18 = vmul.f32 0.17820325, %v1507_v28  ;;  %v1524_v51 = vmul.f32 0.17820325, %v1511_v14  ;;  %v1525_v57 = vmul.f32 0.17820325, %v1509_v15 }
 0x2e0   :  { %v608_v25 = vmul.f32 0.22254893, %v6310_v24  ;;  %v1347_v4 = vmul.f32 0.21052228, %v6311_v30  ;;  %v6313_v14 = vld [vmem:[#allocation52_spill] sm:$0xff] }
 0x2e1   :  { %v4922_v1 = vadd.f32 %v1526_v18, %v1356_v60  ;;  %v4924_v22 = vadd.f32 %v1524_v51, %v1354_v37  ;;  %v4926_v11 = vadd.f32 %v1525_v57, %v1355_v26  ;;  %1736 = vrot.lane.b32.xlu2 %v4594_v58, %s2492_s18  ;;  %v6312_v26 = vld [vmem:[#allocation109_spill] sm:$0xff] }
 0x2e2   :  { %v788_v43 = vadd.f32 %v772_v13, %v608_v25 }
 0x2e3   :  { %v4935_v50 = vpop.permute.xlu2 %1563 }
 0x2e4   :  { %1738 = vrot.lane.b32.xlu0 %v4596_v34, %s2492_s18  ;;  %1734 = vrot.lane.b32.xlu1 %v4598_v2, %s2492_s18  ;;  %v974_v29 = vadd.f32 %v958_v47, %v788_v43 }
 0x2e5   :  { %v1499_v48 = vpop.permute.xlu0 %1498  ;;  %v1495_v35 = vpop.permute.xlu1 %1494 }
 0x2e6   :  { %v1506_v55 = vsel %vm1504_vm10, %v1499_v48, %v4861_v36  ;;  %v1508_v13 = vsel %vm1504_vm10, %v1495_v35, %v1499_v48  ;;  %v1510_v59 = vsel %vm1504_vm10, %v4747_v17, %v1495_v35  ;;  %v1363_v27 = vadd.f32 %v1347_v4, %v974_v29  ;;  %v6314_v4 = vld [vmem:[#allocation26_spill] sm:$0xff] }
 0x2e7   :  { %v1535_v37 = vmul.f32 0.17820325, %v1506_v55  ;;  %v1533_v5 = vmul.f32 0.17820325, %v1510_v59  ;;  %v1534_v63 = vmul.f32 0.17820325, %v1508_v13 }
 0x2e8   :  { %v6315_v48 = vld [vmem:[#allocation38_spill] sm:$0xff]  ;;  %v6317_v55 = vld [vmem:[#allocation68_spill] sm:$0xff] }
 0x2e9   :  { %v4946_v28 = vadd.f32 %v1535_v37, %v6312_v26  ;;  %v4948_v15 = vadd.f32 %v1533_v5, %v1363_v27  ;;  %v4951_v60 = vadd.f32 %v1534_v63, %v6313_v14  ;;  %1742 = vrot.lane.b32.xlu2 %v4652_v42, %s2492_s18  ;;  %v6319_v59 = vld [vmem:[#allocation134_spill] sm:$0xff] }
 0x2eb   :  { %v4960_v17 = vpop.permute.xlu2 %1569 }
 0x2ec   :  { %1744 = vrot.lane.b32.xlu0 %v4654_v12, %s2492_s18  ;;  %1740 = vrot.lane.b32.xlu1 %v4656_v8, %s2492_s18 }
 0x2ed   :  { %v1554_v36 = vpop.permute.xlu0 %1553  ;;  %v1501_v18 = vpop.permute.xlu1 %1500 }
 0x2ee   :  { %v1598_v51 = vsel %vm1585_vm11, %v1554_v36, %v4907_v38  ;;  %v1505_v57 = vsel %vm1504_vm10, %v4802_v62, %v1501_v18  ;;  %v1519_v25 = vsel %vm1504_vm10, %v1501_v18, %v4581_v56  ;;  %v6320_v62 = vld [vmem:[#allocation129_spill] sm:$0xff]  ;;  %v4997_v18 = vld [vmem:[%s5650_s2] sm:$0xff] }
 0x2ef   :  { %v1602_v47 = vmul.f32 0.18762717, %v1598_v51  ;;  %v1527_v43 = vmul.f32 0.17820325, %v1505_v57  ;;  %v1528_v30 = vmul.f32 0.17820325, %v1519_v25 }
 0x2f1   :  { %v1618_v29 = vadd.f32 %v1602_v47, %v6314_v4  ;;  %v4973_v35 = vadd.f32 %v1527_v43, %v6315_v48  ;;  %v4976_v13 = vadd.f32 %v1528_v30, %v6317_v55  ;;  %1748 = vrot.lane.b32.xlu2 %v6319_v59, %s2492_s18 }
 0x2f3   :  { %6316 = vst [vmem:[#allocation142_spill] sm:$0xff] %v4973_v35  ;;  %v4984_v56 = vpop.permute.xlu2 %1575 }
 0x2f4   :  { %6318 = vst [vmem:[#allocation30_spill] sm:$0xff] %v4976_v13  ;;  %1750 = vrot.lane.b32.xlu0 %v6320_v62, %s2492_s18  ;;  %1746 = vrot.lane.b32.xlu1 %v4720_v20, %s2492_s18 }
 0x2f5   :  { %v1560_v27 = vpop.permute.xlu0 %1559  ;;  %v4986_v37 = vpop.permute.xlu1 %1555 }
 0x2f6   :  { %v1597_v5 = vsel %vm1585_vm11, %v1560_v27, %v4935_v50  ;;  %v1599_v63 = vsel %vm1585_vm11, %v4986_v37, %v1560_v27 }
 0x2f7   :  { %v1611_v26 = vmul.f32 0.18762717, %v1597_v5  ;;  %v1610_v14 = vmul.f32 0.18762717, %v1599_v63  ;;  %v6321_v63 = vld [vmem:[#allocation102_spill] sm:$0xff] }
 0x2f9   :  { %v1627_v51 = vadd.f32 %v1611_v26, %v4569_v39  ;;  %v1626_v57 = vadd.f32 %v1610_v14, %v4566_v31  ;;  %1779 = vrot.lane.b32.xlu2 %v6320_v62, %s2490_s16 }
 0x2fb   :  { %v5006_v25 = vpop.permute.xlu2 %1581 }
 0x2fc   :  { %1797 = vperm.xlu0 %2375, %v4997_v18   ;;  %1777 = vrot.lane.b32.xlu1 %v6319_v59, %s2490_s16  ;;  %v1600_v47 = vsel %vm1585_vm11, %v5006_v25, %v1554_v36  ;;  %v5025_v36 = vld [vmem:[%s5650_s2 + $0x8] sm:$0xff] }
 0x2fd   :  { %v1566_v43 = vpop.permute.xlu0 %1565  ;;  %v1562_v30 = vpop.permute.xlu1 %1561  ;;  %v1609_v4 = vmul.f32 0.18762717, %v1600_v47 }
 0x2fe   :  { %v1592_v31 = vsel %vm1585_vm11, %v1566_v43, %v4960_v17  ;;  %v1594_v39 = vsel %vm1585_vm11, %v1562_v30, %v1566_v43  ;;  %v1596_v48 = vsel %vm1585_vm11, %v4907_v38, %v1562_v30  ;;  %v6322_v38 = vld [vmem:[#allocation97_spill] sm:$0xff]  ;;  %v2145_v43 = vmul.f32 0.18762717, %v1618_v29 }
 0x2ff   :  { %v1605_v55 = vmul.f32 0.18762717, %v1592_v31  ;;  %v1603_v59 = vmul.f32 0.18762717, %v1596_v48  ;;  %v1604_v62 = vmul.f32 0.18762717, %v1594_v39  ;;  %v5020_v27 = vadd.f32 %v1609_v4, %v4722_v7 }
 0x300   :  { %v6323_v4 = vmov 1  }
 0x301   :  { %v5028_v5 = vadd.f32 %v1605_v55, %v4620_v21  ;;  %v1619_v26 = vadd.f32 %v1603_v59, %v6321_v63  ;;  %v5032_v14 = vadd.f32 %v1604_v62, %v4617_v46  ;;  %1845 = vrot.lane.b32.xlu2 %v6322_v38, %s2490_s16 }
 0x303   :  { %v2138_v47 = vmul.f32 0.21260943, %v5028_v5  ;;  %v5040_v7 = vpop.permute.xlu2 %1644  ;;  %v2137_v21 = vmul.f32 0.21260943, %v5032_v14  ;;  %v2146_v30 = vmul.f32 0.18762717, %v1619_v26 }
 0x304   :  { %1851 = vrot.lane.b32.xlu0 %v4547_v54, %s2490_s16  ;;  %1802 = vperm.xlu1 %2377, %v5025_v36   ;;  %v2161_v46 = vmul.f32 0.20606813, %v1619_v26  ;;  %v2162_v31 = vmul.f32 0.20606813, %v5032_v14  ;;  %v5054_v26 = vmul.f32 0.20606813, %v5028_v5 }
 0x305   :  { %2378 = vset.pattern.permute.xlu0 %v6323_v4  ;;  %v1572_v39 = vpop.permute.xlu0 %1571  ;;  %v1568_v48 = vpop.permute.xlu1 %1567  ;;  %v2153_v55 = vadd.f32 %v2145_v43, %v2137_v21  ;;  %v2154_v59 = vadd.f32 %v2146_v30, %v2138_v47  ;;  %v2150_v30 = vmul.f32 0.18762717, %v1627_v51 }
 0x306   :  { %v1591_v62 = vsel %vm1585_vm11, %v1572_v39, %v4984_v56  ;;  %v1593_v63 = vsel %vm1585_vm11, %v1568_v48, %v1572_v39  ;;  %v1595_v24 = vsel %vm1585_vm11, %v4935_v50, %v1568_v48  ;;  %v2165_v48 = vmul.f32 0.20606813, %v1627_v51 }
 0x307   :  { %v1614_v29 = vmul.f32 0.18762717, %v1591_v62  ;;  %v1613_v53 = vmul.f32 0.18762717, %v1593_v63  ;;  %v2169_v13 = vadd.f32 %v2161_v46, %v2153_v55  ;;  %v1612_v23 = vmul.f32 0.18762717, %v1595_v24 }
 0x308   :  { %v5056_v43 = vadd.f32 %v2162_v31, %v2154_v59 }
 0x309   :  { %v1630_v47 = vadd.f32 %v1614_v29, %v4675_v3  ;;  %v5060_v21 = vadd.f32 %v1613_v53, %v4672_v52  ;;  %1849 = vrot.lane.b32.xlu2 %v4607_v41, %s2490_s16  ;;  %v1628_v39 = vadd.f32 %v1612_v23, %v4550_v61  ;;  %v2181_v50 = vadd.f32 %v2169_v13, %v5054_v26 }
 0x30a   :  { %v2149_v3 = vmul.f32 0.18762717, %v1626_v57 }
 0x30b   :  { %v2143_v62 = vmul.f32 0.21260943, %v1630_v47  ;;  %v2142_v46 = vmul.f32 0.21260943, %v5060_v21  ;;  %v5071_v52 = vpop.permute.xlu2 %1650  ;;  %v2141_v53 = vmul.f32 0.21260943, %v1628_v39 }
 0x30c   :  { %1857 = vrot.lane.b32.xlu0 %v4601_v0, %s2490_s16  ;;  %1847 = vrot.lane.b32.xlu1 %v4553_v9, %s2490_s16  ;;  %v2151_v24 = vmul.f32 0.18762717, %v1628_v39  ;;  %v5074_v61 = vmul.f32 0.20606813, %v1630_v47  ;;  %v2166_v13 = vmul.f32 0.20606813, %v1628_v39 }
 0x30d   :  { %2379 = vset.pattern.permute.xlu1 %v6323_v4  ;;  %v2158_v23 = vadd.f32 %v2150_v30, %v2142_v46  ;;  %v2167_v51 = vmul.f32 0.20606813, %v5060_v21  ;;  %v2157_v59 = vadd.f32 %v2149_v3, %v2141_v53  ;;  %v2193_v35 = vmul.f32 0.18762717, %v1630_v47 }
 0x30e   :  { %v1578_v31 = vpop.permute.xlu0 %1577  ;;  %v1574_v55 = vpop.permute.xlu1 %1573  ;;  %v2159_v63 = vadd.f32 %v2151_v24, %v2143_v62  ;;  %v6324_v62 = vld [vmem:[#allocation74_spill] sm:$0xff] }
 0x30f   :  { %v1586_v29 = vsel %vm1585_vm11, %v1578_v31, %v5006_v25  ;;  %v1588_v57 = vsel %vm1585_vm11, %v1574_v55, %v1578_v31  ;;  %v1590_v4 = vsel %vm1585_vm11, %v4960_v17, %v1574_v55  ;;  %v2174_v39 = vadd.f32 %v2166_v13, %v2158_v23  ;;  %v6325_v24 = vld [vmem:[#allocation106_spill] sm:$0xff] }
 0x310   :  { %v1608_v38 = vmul.f32 0.18762717, %v1586_v29  ;;  %v1607_v30 = vmul.f32 0.18762717, %v1588_v57  ;;  %v1606_v46 = vmul.f32 0.18762717, %v1590_v4  ;;  %v2173_v0 = vadd.f32 %v2165_v48, %v2157_v59 }
 0x311   :  { %v2175_v41 = vadd.f32 %v2167_v51, %v2159_v63  ;;  %1855 = vrot.lane.b32.xlu2 %v6325_v24, %s2490_s16  ;;  %v2186_v25 = vadd.f32 %v2174_v39, %v5074_v61  ;;  %v6326_v31 = vld [vmem:[#allocation50_spill] sm:$0xff]  ;;  %v2148_v17 = vmul.f32 0.18762717, %v5028_v5  ;;  %v2192_v23 = vmul.f32 0.18762717, %v5020_v27  ;;  %v6327_v48 = vld [vmem:[#allocation100_spill] sm:$0xff] }
 0x312   :  { %v1624_v3 = vadd.f32 %v1608_v38, %v4737_v16  ;;  %v1623_v53 = vadd.f32 %v1607_v30, %v6324_v62  ;;  %v1622_v29 = vadd.f32 %v1606_v46, %v6326_v31  ;;  %v2185_v54 = vadd.f32 %v2173_v0, %v2167_v51  ;;  %v6328_v16 = vld [vmem:[#allocation99_spill] sm:$0xff] }
 0x313   :  { %v5097_v38 = vpop.permute.xlu2 %1656  ;;  %v2147_v55 = vmul.f32 0.18762717, %v5032_v14 }
 0x314   :  { %v2140_v13 = vmul.f32 0.21260943, %v1623_v53  ;;  %1863 = vrot.lane.b32.xlu0 %v6327_v48, %s2490_s16  ;;  %1853 = vrot.lane.b32.xlu1 %v6328_v16, %s2490_s16  ;;  %v2139_v59 = vmul.f32 0.21260943, %v1622_v29  ;;  %v2164_v63 = vmul.f32 0.20606813, %v1622_v29  ;;  %v5100_v57 = vadd.f32 %v2193_v35, %v2185_v54 }
 0x315   :  { %v2178_v0 = vmul.f32 0.20606813, %v1624_v3  ;;  %v2177_v5 = vmul.f32 0.20606813, %v1623_v53  ;;  %v2189_v4 = vmul.f32 0.18762717, %v1622_v29 }
 0x316   :  { %6329 = vst [vmem:[#allocation27_spill] sm:$0xff] %v5100_v57  ;;  %v2156_v47 = vadd.f32 %v2148_v17, %v2140_v13  ;;  %v1584_v51 = vpop.permute.xlu0 %1583  ;;  %v1580_v27 = vpop.permute.xlu1 %1579  ;;  %v2155_v30 = vadd.f32 %v2147_v55, %v2139_v59  ;;  %v2182_v29 = vadd.f32 %v5056_v43, %v2164_v63  ;;  %v2190_v13 = vmul.f32 0.18762717, %v1623_v53  ;;  %v6330_v59 = vld [vmem:[#allocation105_spill] sm:$0xff] }
 0x317   :  { %v1601_v39 = vsel %vm1585_vm11, %v1584_v51, %v4986_v37  ;;  %v1587_v46 = vsel %vm1585_vm11, %v1580_v27, %v1584_v51  ;;  %v1589_v14 = vsel %vm1585_vm11, %v4984_v56, %v1580_v27  ;;  %v5112_v55 = vadd.f32 %v2189_v4, %v2181_v50  ;;  %v6331_v48 = vld [vmem:[#allocation73_spill] sm:$0xff] }
 0x318   :  { %v1617_v54 = vmul.f32 0.18762717, %v1601_v39  ;;  %v1615_v35 = vmul.f32 0.18762717, %v1589_v14  ;;  %v1616_v62 = vmul.f32 0.18762717, %v1587_v46  ;;  %v2172_v31 = vadd.f32 %v2164_v63, %v2156_v47 }
 0x319   :  { %v2171_v17 = vadd.f32 %v5054_v26, %v2155_v30  ;;  %1861 = vrot.lane.b32.xlu2 %v6331_v48, %s2490_s16  ;;  %v2191_v27 = vmul.f32 0.18762717, %v1624_v3  ;;  %v5120_v26 = vadd.f32 %v2190_v13, %v2182_v29  ;;  %v2152_v43 = vmul.f32 0.18762717, %v5060_v21  ;;  %v6335_v13 = vld [vmem:[#allocation76_spill] sm:$0xff] }
 0x31a   :  { %v1633_v37 = vadd.f32 %v1617_v54, %v4794_v44  ;;  %v1631_v57 = vadd.f32 %v1615_v35, %v6330_v59  ;;  %v1632_v51 = vadd.f32 %v1616_v62, %v4786_v19  ;;  %v2184_v56 = vadd.f32 %v2178_v0, %v2172_v31  ;;  %v6332_v44 = vld [vmem:[#allocation107_spill] sm:$0xff]  ;;  %v6338_v59 = vld [vmem:[#allocation57_spill] sm:$0xff] }
 0x31b   :  { %v2183_v47 = vadd.f32 %v2177_v5, %v2171_v17  ;;  %v5126_v19 = vpop.permute.xlu2 %1687  ;;  %v6333_v31 = vld [vmem:[#allocation19_spill] sm:$0xff]  ;;  %v6334_v17 = vld [vmem:[#allocation8_spill] sm:$0xff] }
 0x31c   :  { %v2144_v50 = vmul.f32 0.21260943, %v1631_v57  ;;  %v2179_v53 = vmul.f32 0.20606813, %v1631_v57  ;;  %1918 = vperm.xlu0 %2378, %v4997_v18   ;;  %1859 = vrot.lane.b32.xlu1 %v6332_v44, %s2490_s16  ;;  %v5128_v63 = vadd.f32 %v2192_v23, %v2184_v56  ;;  %v2194_v3 = vmul.f32 0.18762717, %v1631_v57 }
 0x31d   :  { %v5130_v0 = vadd.f32 %v2191_v27, %v2183_v47  ;;  %v2195_v5 = vmul.f32 0.18762717, %v1632_v51  ;;  %v2180_v23 = vmul.f32 0.20606813, %v1632_v51  ;;  %v2196_v62 = vmul.f32 0.18762717, %v1633_v37 }
 0x31e   :  { %v2160_v4 = vadd.f32 %v2152_v43, %v2144_v50  ;;  %v1647_v30 = vpop.permute.xlu0 %1646  ;;  %v1643_v39 = vpop.permute.xlu1 %1642  ;;  %v2187_v46 = vadd.f32 %v2179_v53, %v2175_v41  ;;  %v5141_v54 = vadd.f32 %v2194_v3, %v2186_v25  ;;  %v756_v29 = vsel %vm743_vm0, %v6334_v17, %v6333_v31  ;;  %v6337_v37 = vld [vmem:[#allocation53_spill] sm:$0xff] }
 0x31f   :  { %v5135_v21 = vsel %vm1662_vm12, %v1647_v30, %v5071_v52  ;;  %v5139_v14 = vsel %vm1662_vm12, %v1643_v39, %v1647_v30  ;;  %v942_v51 = vsel %vm929_vm1, %v6338_v59, %v6337_v37  ;;  %v6339_v56 = vmov 2   ;;  %v6340_v50 = vld [vmem:[#allocation117_spill] sm:$0xff]  ;;  %v6341_v30 = vld [vmem:[#allocation10_spill] sm:$0xff] }
 0x320   :  { %v2176_v35 = vadd.f32 %v5074_v61, %v2160_v4  ;;  %v5144_v57 = vadd.f32 %v2195_v5, %v2187_v46  ;;  %v761_v27 = vmul.f32 0.17820325, %v756_v29  ;;  %v1329_v53 = vsel %vm1318_vm8, %v6340_v50, %v6277_v49  ;;  %v6342_v49 = vld [vmem:[#allocation66_spill] sm:$0xff]  ;;  %v6345_v29 = vld [vmem:[#allocation79_spill] sm:$0xff] }
 0x321   :  { %1891 = vrot.lane.b32.xlu2 %v4784_v33, %s2490_s16  ;;  %v597_v39 = vmul.f32 0.22254893, %v6341_v30  ;;  %v947_v46 = vmul.f32 0.21052228, %v942_v51  ;;  %v1522_v37 = vmul.f32 0.17820325, %v6345_v29 }
 0x322   :  { %v2188_v41 = vadd.f32 %v2180_v23, %v2176_v35  ;;  %v1336_v35 = vmul.f32 0.21052228, %v1329_v53  ;;  %v6346_v59 = vld [vmem:[#allocation54_spill] sm:$0xff]  ;;  %v6347_v51 = vld [vmem:[#allocation59_spill] sm:$0xff]  ;;  %v6348_v30 = vld [vmem:[#allocation28_spill] sm:$0xff] }
 0x323   :  { %v5156_v25 = vpop.permute.xlu2 %1693  ;;  %v777_v23 = vadd.f32 %v761_v27, %v597_v39  ;;  %v941_v27 = vsel %vm929_vm1, %v6347_v51, %v6346_v59  ;;  %v6349_v39 = vld [vmem:[#allocation126_spill] sm:$0xff]  ;;  %v1531_v51 = vmul.f32 0.17820325, %v4880_v6 }
 0x324   :  { %1889 = vrot.lane.b32.xlu1 %v6335_v13, %s2490_s16  ;;  %1955 = vrot.lane.b32.xlu0 %v4892_v32, %s2490_s16  ;;  %v5158_v61 = vadd.f32 %v2196_v62, %v2188_v41  ;;  %v6343_v62 = vld [vmem:[#allocation9_spill] sm:$0xff]  ;;  %v6344_v41 = vld [vmem:[#allocation12_spill] sm:$0xff] }
 0x325   :  { %2380 = vset.pattern.permute.xlu0 %v6339_v56  ;;  %v755_v31 = vsel %vm743_vm0, %v6344_v41, %v6343_v62  ;;  %v963_v17 = vadd.f32 %v947_v46, %v777_v23  ;;  %v1328_v46 = vsel %vm1318_vm8, %v6349_v39, %v6348_v30  ;;  %v6350_v62 = vld [vmem:[#allocation16_spill] sm:$0xff]  ;;  %v6351_v39 = vld [vmem:[#allocation78_spill] sm:$0xff] }
 0x326   :  { %6336 = vst [vmem:[#allocation82_spill] sm:$0xff] %v5158_v61  ;;  %v1653_v47 = vpop.permute.xlu0 %1652  ;;  %v1649_v43 = vpop.permute.xlu1 %1648  ;;  %v606_v41 = vmul.f32 0.22254893, %v6350_v62  ;;  %v1345_v29 = vmul.f32 0.21052228, %v1328_v46 }
 0x327   :  { %v5172_v3 = vsel %vm1662_vm12, %v1653_v47, %v5097_v38  ;;  %v5176_v4 = vsel %vm1662_vm12, %v1649_v43, %v1653_v47  ;;  %v1670_v5 = vsel %vm1662_vm12, %v5040_v7, %v1649_v43  ;;  %v770_v47 = vmul.f32 0.17820325, %v755_v31 }
 0x328   :  { %v1352_v43 = vadd.f32 %v1336_v35, %v963_v17  ;;  %v956_v35 = vmul.f32 0.21052228, %v941_v27  ;;  %v1675_v30 = vmul.f32 0.054488685, %v1670_v5  ;;  %v1638_v27 = vmul.f32 0.40261996, %v4598_v2 }
 0x329   :  { %1949 = vrot.lane.b32.xlu2 %v6342_v49, %s2490_s16  ;;  %v786_v17 = vadd.f32 %v770_v47, %v606_v41 }
 0x32a   :  { %v5213_v31 = vadd.f32 %v1522_v37, %v1352_v43  ;;  %v1683_v46 = vadd.f32 %v1675_v30, %v1638_v27  ;;  %v1636_v30 = vmul.f32 0.40261996, %v4656_v8  ;;  %v1677_v8 = vmul.f32 0.054488685, %v5172_v3 }
 0x32b   :  { %v5192_v7 = vpop.permute.xlu2 %1699  ;;  %v972_v59 = vadd.f32 %v956_v35, %v786_v17  ;;  %v1671_v35 = vmul.f32 0.054488685, %v5139_v14  ;;  %v1635_v17 = vmul.f32 0.40261996, %v4594_v58 }
 0x32c   :  { %1922 = vperm.xlu1 %2379, %v5025_v36   ;;  %1961 = vrot.lane.b32.xlu0 %v4924_v22, %s2490_s16 }
 0x32d   :  { %v1361_v37 = vadd.f32 %v1345_v29, %v972_v59 }
 0x32e   :  { %v5198_v50 = vpop.permute.xlu0 %1658  ;;  %v1655_v53 = vpop.permute.xlu1 %1654 }
 0x32f   :  { %v5207_v23 = vsel %vm1662_vm12, %v1655_v53, %v5198_v50  ;;  %v1665_v49 = vsel %vm1662_vm12, %v5071_v52, %v1655_v53  ;;  %v5234_v53 = vadd.f32 %v1531_v51, %v1361_v37 }
 0x330   :  { %v5245_v29 = vmul.f32 0.054488685, %v1665_v49 }
 0x331   :  { %1953 = vrot.lane.b32.xlu2 %v5213_v31, %s2490_s16 }
 0x333   :  { %v1706_v52 = vpop.permute.xlu2 %1705 }
 0x334   :  { %1967 = vrot.lane.b32.xlu0 %v4948_v15, %s2490_s16  ;;  %1951 = vrot.lane.b32.xlu1 %v6351_v39, %s2490_s16 }
 0x335   :  { %2381 = vset.pattern.permute.xlu1 %v6339_v56  ;;  %v5237_v56 = vmul.f32 0.054488685, %v5135_v21  ;;  %v1634_v21 = vmul.f32 0.40261996, %v4542_v45  ;;  %v1681_v45 = vadd.f32 %v5245_v29, %v1636_v30 }
 0x336   :  { %v1690_v47 = vpop.permute.xlu0 %1689  ;;  %v5225_v43 = vpop.permute.xlu1 %1660 }
 0x337   :  { %v1715_v6 = vsel %vm1707_vm13, %v1690_v47, %v5156_v25  ;;  %v1664_v5 = vsel %vm1662_vm12, %v5097_v38, %v5225_v43  ;;  %v6352_v38 = vld [vmem:[#allocation72_spill] sm:$0xff]  ;;  %v1680_v51 = vadd.f32 %v5237_v56, %v1635_v17  ;;  %v1679_v37 = vadd.f32 %v1671_v35, %v1634_v21 }
 0x338   :  { %v1720_v41 = vmul.f32 0.24420135, %v1715_v6  ;;  %v1676_v21 = vmul.f32 0.054488685, %v5176_v4 }
 0x339   :  { %1959 = vrot.lane.b32.xlu2 %v5234_v53, %s2490_s16 }
 0x33a   :  { %v5239_v2 = vadd.f32 %v1720_v41, %v1683_v46 }
 0x33b   :  { %v5251_v59 = vpop.permute.xlu2 %1736 }
 0x33c   :  { %1997 = vrot.lane.b32.xlu0 %v6352_v38, %s2492_s18  ;;  %1957 = vrot.lane.b32.xlu1 %v6352_v38, %s2490_s16 }
 0x33e   :  { %v1696_v39 = vpop.permute.xlu0 %1695  ;;  %v1692_v14 = vpop.permute.xlu1 %1691 }
 0x33f   :  { %v1710_v58 = vsel %vm1707_vm13, %v1696_v39, %v5192_v7  ;;  %v1712_v49 = vsel %vm1707_vm13, %v1692_v14, %v1696_v39  ;;  %v1714_v27 = vsel %vm1707_vm13, %v5126_v19, %v1692_v14  ;;  %v1640_v39 = vmul.f32 0.40261996, %v4652_v42 }
 0x340   :  { %v1718_v47 = vmul.f32 0.24420135, %v1710_v58  ;;  %v1716_v6 = vmul.f32 0.24420135, %v1714_v27  ;;  %v1717_v46 = vmul.f32 0.24420135, %v1712_v49 }
 0x341   :  { %1965 = vrot.lane.b32.xlu2 %v4926_v11, %s2490_s16  ;;  %v5274_v19 = vmul.f32 0.054488685, %v1664_v5  ;;  %v1685_v30 = vadd.f32 %v1677_v8, %v1640_v39  ;;  %v1641_v14 = vmul.f32 0.40261996, %v4720_v20  ;;  %v1637_v39 = vmul.f32 0.40261996, %v4654_v12 }
 0x342   :  { %v5266_v41 = vadd.f32 %v1718_v47, %v1681_v45  ;;  %v1724_v35 = vadd.f32 %v1716_v6, %v1679_v37  ;;  %v5268_v17 = vadd.f32 %v1717_v46, %v1680_v51  ;;  %v1639_v51 = vmul.f32 0.40261996, %v4596_v34 }
 0x343   :  { %v5280_v3 = vpop.permute.xlu2 %1742  ;;  %v1686_v27 = vadd.f32 %v5274_v19, %v1641_v14 }
 0x344   :  { %2003 = vrot.lane.b32.xlu0 %v4890_v40, %s2492_s18  ;;  %1963 = vrot.lane.b32.xlu1 %v4890_v40, %s2490_s16  ;;  %v1684_v4 = vadd.f32 %v1676_v21, %v1639_v51 }
 0x346   :  { %v1702_v37 = vpop.permute.xlu0 %1701  ;;  %v1698_v58 = vpop.permute.xlu1 %1697 }
 0x347   :  { %v1709_v42 = vsel %vm1707_vm13, %v1702_v37, %v1706_v52  ;;  %v1711_v5 = vsel %vm1707_vm13, %v1698_v58, %v1702_v37  ;;  %v1713_v49 = vsel %vm1707_vm13, %v5156_v25, %v1698_v58  ;;  %v1674_v52 = vmul.f32 0.054488685, %v5207_v23 }
 0x348   :  { %v1723_v45 = vmul.f32 0.24420135, %v1709_v42  ;;  %v1721_v34 = vmul.f32 0.24420135, %v1713_v49  ;;  %v1722_v47 = vmul.f32 0.24420135, %v1711_v5 }
 0x349   :  { %1995 = vrot.lane.b32.xlu2 %v4892_v32, %s2492_s18  ;;  %v1682_v23 = vadd.f32 %v1674_v52, %v1637_v39 }
 0x34a   :  { %v5292_v6 = vadd.f32 %v1723_v45, %v1686_v27  ;;  %v1729_v20 = vadd.f32 %v1721_v34, %v1684_v4  ;;  %v1730_v46 = vadd.f32 %v1722_v47, %v1685_v30 }
 0x34b   :  { %v1749_v25 = vpop.permute.xlu2 %1748 }
 0x34c   :  { %2009 = vrot.lane.b32.xlu0 %v4922_v1, %s2492_s18  ;;  %1993 = vrot.lane.b32.xlu1 %v5213_v31, %s2492_s18 }
 0x34e   :  { %v1733_v51 = vpop.permute.xlu0 %1732  ;;  %v1704_v14 = vpop.permute.xlu1 %1703 }
 0x34f   :  { %v1759_v30 = vsel %vm1752_vm14, %v1733_v51, %v5251_v59  ;;  %v1708_v32 = vsel %vm1707_vm13, %v5192_v7, %v1704_v14 }
 0x350   :  { %v1761_v37 = vmul.f32 0.24420135, %v1759_v30  ;;  %v1719_v58 = vmul.f32 0.24420135, %v1708_v32 }
 0x351   :  { %2001 = vrot.lane.b32.xlu2 %v4924_v22, %s2492_s18 }
 0x352   :  { %v1769_v4 = vadd.f32 %v1761_v37, %v1724_v35  ;;  %v1727_v31 = vadd.f32 %v1719_v58, %v1682_v23 }
 0x353   :  { %v1780_v42 = vpop.permute.xlu2 %1779 }
 0x354   :  { %v1785_v12 = vadd.f32 %v1769_v4, %v5237_v56  ;;  %2039 = vrot.lane.b32.xlu0 %v5234_v53, %s2491_s17  ;;  %1999 = vrot.lane.b32.xlu1 %v5234_v53, %s2492_s18  ;;  %v1782_v7 = vsel %vm1662_vm12, %v5225_v43, %v1780_v42 }
 0x356   :  { %v1739_v5 = vpop.permute.xlu0 %1738  ;;  %v1735_v49 = vpop.permute.xlu1 %1734 }
 0x357   :  { %v1758_v35 = vsel %vm1752_vm14, %v1739_v5, %v5280_v3  ;;  %v1760_v56 = vsel %vm1752_vm14, %v1735_v49, %v1739_v5 }
 0x358   :  { %v1766_v27 = vmul.f32 0.24420135, %v1758_v35  ;;  %v1765_v45 = vmul.f32 0.24420135, %v1760_v56  ;;  %v1784_v35 = vmul.f32 0.054488685, %v1782_v7 }
 0x359   :  { %2007 = vrot.lane.b32.xlu2 %v4948_v15, %s2492_s18 }
 0x35a   :  { %v1774_v34 = vadd.f32 %v1766_v27, %v1729_v20  ;;  %v1773_v47 = vadd.f32 %v1765_v45, %v5239_v2 }
 0x35b   :  { %v1846_v43 = vpop.permute.xlu2 %1845 }
 0x35c   :  { %v1790_v39 = vadd.f32 %v1774_v34, %v1677_v8  ;;  %v1789_v51 = vadd.f32 %v1773_v47, %v1676_v21  ;;  %2045 = vrot.lane.b32.xlu0 %v4926_v11, %s2491_s17  ;;  %2005 = vrot.lane.b32.xlu1 %v4926_v11, %s2492_s18 }
 0x35e   :  { %v1745_v14 = vpop.permute.xlu0 %1744  ;;  %v1741_v30 = vpop.permute.xlu1 %1740 }
 0x35f   :  { %v1753_v32 = vsel %vm1752_vm14, %v1745_v14, %v1749_v25  ;;  %v1755_v2 = vsel %vm1752_vm14, %v1741_v30, %v1745_v14  ;;  %v1757_v8 = vsel %vm1752_vm14, %v5251_v59, %v1741_v30 }
 0x360   :  { %v1764_v21 = vmul.f32 0.24420135, %v1753_v32  ;;  %v1762_v20 = vmul.f32 0.24420135, %v1757_v8  ;;  %v1763_v23 = vmul.f32 0.24420135, %v1755_v2 }
 0x361   :  { %2037 = vrot.lane.b32.xlu2 %v6352_v38, %s2491_s17 }
 0x362   :  { %v1772_v37 = vadd.f32 %v1764_v21, %v1727_v31  ;;  %v1770_v58 = vadd.f32 %v1762_v20, %v5268_v17  ;;  %v1771_v4 = vadd.f32 %v1763_v23, %v5266_v41 }
 0x363   :  { %v5347_v59 = vpop.permute.xlu2 %1849 }
 0x364   :  { %v1786_v25 = vadd.f32 %v1770_v58, %v5245_v29  ;;  %v1787_v42 = vadd.f32 %v1771_v4, %v1674_v52  ;;  %2051 = vrot.lane.b32.xlu0 %v4951_v60, %s2491_s17  ;;  %2011 = vrot.lane.b32.xlu1 %v4951_v60, %s2492_s18  ;;  %v1871_v17 = vsel %vm1662_vm12, %v1846_v43, %v5347_v59  ;;  %v1833_v58 = vmul.f32 0.15246914, %v4553_v9  ;;  %v6353_v4 = vld [vmem:[#allocation142_spill] sm:$0xff]  ;;  %v6355_v9 = vld [vmem:[#allocation69_spill] sm:$0xff] }
 0x366   :  { %v1751_v31 = vpop.permute.xlu0 %1750  ;;  %v1747_v41 = vpop.permute.xlu1 %1746 }
 0x367   :  { %v1754_v5 = vsel %vm1752_vm14, %v1747_v41, %v1751_v31  ;;  %v1756_v29 = vsel %vm1752_vm14, %v5280_v3, %v1747_v41 }
 0x368   :  { %v1767_v52 = vmul.f32 0.24420135, %v1756_v29  ;;  %v1768_v49 = vmul.f32 0.24420135, %v1754_v5 }
 0x369   :  { %2043 = vrot.lane.b32.xlu2 %v4890_v40, %s2491_s17 }
 0x36a   :  { %v1775_v56 = vadd.f32 %v1767_v52, %v1730_v46  ;;  %v1776_v27 = vadd.f32 %v1768_v49, %v5292_v6  ;;  %v1821_v52 = vmul.f32 0.25137913, %v6355_v9  ;;  %v1822_v49 = vmul.f32 0.25137913, %v6328_v16 }
 0x36b   :  { %v5365_v47 = vpop.permute.xlu2 %1855 }
 0x36c   :  { %v1791_v45 = vadd.f32 %v1775_v56, %v5274_v19  ;;  %v1792_v34 = vadd.f32 %v1784_v35, %v1776_v27  ;;  %2081 = vrot.lane.b32.xlu0 %v4922_v1, %s2490_s16  ;;  %2041 = vrot.lane.b32.xlu1 %v4924_v22, %s2491_s17  ;;  %v6356_v35 = vld [vmem:[#allocation101_spill] sm:$0xff] }
 0x36d   :  { %v1823_v56 = vmul.f32 0.25137913, %v6356_v35 }
 0x36e   :  { %v1798_v3 = vpop.permute.xlu0 %1797  ;;  %v1778_v43 = vpop.permute.xlu1 %1777 }
 0x36f   :  { %v5367_v7 = vmul.f32 %v1798_v3, %v1785_v12  ;;  %v5369_v46 = vmul.f32 %v1798_v3, %v1786_v25  ;;  %v5371_v6 = vmul.f32 %v1798_v3, %v1787_v42  ;;  %v1781_v19 = vsel %vm1662_vm12, %v5198_v50, %v1778_v43  ;;  %v6354_v25 = vld [vmem:[#allocation58_spill] sm:$0xff]  ;;  %v6357_v43 = vld [vmem:[#allocation97_spill] sm:$0xff] }
 0x370   :  { %v1783_v14 = vmul.f32 0.054488685, %v1781_v19  ;;  %v1825_v42 = vmul.f32 0.25137913, %v6354_v25  ;;  %v1829_v19 = vmul.f32 0.15246914, %v6357_v43 }
 0x371   :  { %2049 = vrot.lane.b32.xlu2 %v4922_v1, %s2491_s17 }
 0x372   :  { %v1788_v30 = vadd.f32 %v1783_v14, %v1772_v37  ;;  %v1873_v14 = vmul.f32 0.22184129, %v1871_v17 }
 0x373   :  { %v5384_v12 = vpop.permute.xlu2 %1861 }
 0x374   :  { %v5378_v32 = vmul.f32 %v1798_v3, %v1788_v30  ;;  %2087 = vrot.lane.b32.xlu0 %v4946_v28, %s2490_s16  ;;  %2047 = vrot.lane.b32.xlu1 %v4948_v15, %s2491_s17  ;;  %v1831_v3 = vmul.f32 0.15246914, %v6328_v16 }
 0x376   :  { %v1852_v2 = vpop.permute.xlu0 %1851  ;;  %v1803_v8 = vpop.permute.xlu1 %1802 }
 0x377   :  { %v1870_v50 = vsel %vm1662_vm12, %v1852_v2, %v5365_v47  ;;  %v5389_v21 = vmul.f32 %v1803_v8, %v1789_v51  ;;  %v5391_v20 = vmul.f32 %v1803_v8, %v1790_v39  ;;  %v5393_v23 = vmul.f32 %v1803_v8, %v1791_v45 }
 0x378   :  { %v5395_v37 = vmul.f32 %v1803_v8, %v1792_v34  ;;  %v1878_v27 = vmul.f32 0.22184129, %v1870_v50  ;;  %v1830_v34 = vmul.f32 0.15246914, %v6355_v9  ;;  %v6358_v8 = vmov 3  }
 0x379   :  { %2055 = vrot.lane.b32.xlu2 %v4946_v28, %s2491_s17  ;;  %v1841_v28 = vadd.f32 %v1833_v58, %v1825_v42  ;;  %v1837_v50 = vadd.f32 %v1829_v19, %v1821_v52  ;;  %v6359_v52 = vld [vmem:[#allocation100_spill] sm:$0xff] }
 0x37a   :  { %v1838_v42 = vadd.f32 %v1830_v34, %v1822_v49  ;;  %v1828_v43 = vmul.f32 0.25137913, %v6359_v52  ;;  %v1827_v49 = vmul.f32 0.25137913, %v6332_v44  ;;  %v1836_v34 = vmul.f32 0.15246914, %v6332_v44 }
 0x37b   :  { %v1892_v51 = vpop.permute.xlu2 %1891 }
 0x37c   :  { %2114 = vperm.xlu0 %2380, %v4997_v18   ;;  %2053 = vrot.lane.b32.xlu1 %v6353_v4, %s2491_s17 }
 0x37e   :  { %v1858_v31 = vpop.permute.xlu0 %1857  ;;  %v1848_v39 = vpop.permute.xlu1 %1847 }
 0x37f   :  { %v1865_v41 = vsel %vm1662_vm12, %v1858_v31, %v5384_v12  ;;  %v1872_v5 = vsel %vm1662_vm12, %v1848_v39, %v1852_v2  ;;  %v1839_v39 = vadd.f32 %v1831_v3, %v1823_v56  ;;  %v1835_v56 = vmul.f32 0.15246914, %v6325_v24 }
 0x380   :  { %v1877_v29 = vmul.f32 0.22184129, %v1872_v5  ;;  %v1826_v5 = vmul.f32 0.25137913, %v6325_v24  ;;  %v1876_v19 = vmul.f32 0.22184129, %v1865_v41 }
 0x381   :  { %2085 = vrot.lane.b32.xlu2 %v6353_v4, %s2490_s16  ;;  %v6361_v24 = vld [vmem:[#allocation30_spill] sm:$0xff] }
 0x382   :  { %v1885_v45 = vadd.f32 %v1877_v29, %v1841_v28  ;;  %v1881_v29 = vadd.f32 %v1873_v14, %v1837_v50  ;;  %v1832_v14 = vmul.f32 0.15246914, %v6356_v35  ;;  %v1905_v50 = vmul.f32 0.15246914, %v6331_v48 }
 0x383   :  { %v1950_v2 = vpop.permute.xlu2 %1949  ;;  %v1843_v35 = vadd.f32 %v1835_v56, %v1827_v49 }
 0x384   :  { %v5417_v30 = vadd.f32 %v1885_v45, %v1878_v27  ;;  %2083 = vrot.lane.b32.xlu1 %v4951_v60, %s2490_s16  ;;  %2384 = vset.pattern.permute.xlu0 %v6358_v8 }
 0x386   :  { %v1864_v58 = vpop.permute.xlu0 %1863  ;;  %v1854_v4 = vpop.permute.xlu1 %1853 }
 0x387   :  { %v1894_v16 = vsel %vm1662_vm12, %v1864_v58, %v1892_v51  ;;  %v1867_v17 = vsel %vm1662_vm12, %v1854_v4, %v1858_v31  ;;  %v1869_v28 = vsel %vm1662_vm12, %v5347_v59, %v1854_v4  ;;  %v6360_v31 = vld [vmem:[#allocation71_spill] sm:$0xff]  ;;  %v1834_v59 = vmul.f32 0.15246914, %v6354_v25 }
 0x388   :  { %v1874_v9 = vmul.f32 0.22184129, %v1869_v28  ;;  %v1875_v45 = vmul.f32 0.22184129, %v1867_v17 }
 0x389   :  { %2091 = vrot.lane.b32.xlu2 %v6360_v31, %s2490_s16  ;;  %v1842_v41 = vadd.f32 %v1834_v59, %v1826_v5 }
 0x38a   :  { %v1882_v51 = vadd.f32 %v1874_v9, %v1838_v42  ;;  %v1883_v62 = vadd.f32 %v1875_v45, %v1839_v39  ;;  %v1897_v61 = vadd.f32 %v1881_v29, %v1874_v9  ;;  %v1844_v9 = vadd.f32 %v1836_v34, %v1828_v43 }
 0x38b   :  { %v5441_v44 = vpop.permute.xlu2 %1953 }
 0x38c   :  { %v1898_v4 = vadd.f32 %v1882_v51, %v1875_v45  ;;  %v1899_v17 = vadd.f32 %v1883_v62, %v1876_v19  ;;  %v1909_v28 = vadd.f32 %v1897_v61, %v1831_v3  ;;  %2089 = vrot.lane.b32.xlu1 %v6361_v24, %s2490_s16  ;;  %v5446_v42 = vsel %vm1662_vm12, %v1950_v2, %v5441_v44 }
 0x38d   :  { %v1886_v45 = vadd.f32 %v1878_v27, %v1842_v41  ;;  %v1896_v24 = vmul.f32 0.22184129, %v1894_v16 }
 0x38e   :  { %v1910_v39 = vadd.f32 %v1898_v4, %v1832_v14  ;;  %v1919_v25 = vpop.permute.xlu0 %1918  ;;  %v1911_v29 = vadd.f32 %v1905_v50, %v1899_v17  ;;  %v1860_v31 = vpop.permute.xlu1 %1859  ;;  %v1824_v4 = vmul.f32 0.25137913, %v6331_v48 }
 0x38f   :  { %v1925_v62 = vmul.f32 %v1919_v25, %v1909_v28  ;;  %v1866_v61 = vsel %vm1662_vm12, %v1860_v31, %v1864_v58  ;;  %v1868_v3 = vsel %vm1662_vm12, %v5365_v47, %v1860_v31  ;;  %v1907_v31 = vmul.f32 0.15246914, %v6359_v52 }
 0x390   :  { %v1926_v5 = vmul.f32 %v1919_v25, %v1910_v39  ;;  %v1927_v51 = vmul.f32 %v1919_v25, %v1911_v29  ;;  %v1879_v59 = vmul.f32 0.22184129, %v1868_v3  ;;  %v1880_v2 = vmul.f32 0.22184129, %v1866_v61 }
 0x391   :  { %v5455_v49 = vadd.f32 %v1925_v62, %v5367_v7  ;;  %2206 = vperm.xlu2 %2382, %v4997_v18   ;;  %v1840_v16 = vadd.f32 %v1832_v14, %v1824_v4 }
 0x392   :  { %v1887_v43 = vadd.f32 %v1879_v59, %v1843_v35  ;;  %v1888_v27 = vadd.f32 %v1880_v2, %v1844_v9  ;;  %v1902_v50 = vadd.f32 %v1886_v45, %v1879_v59  ;;  %v5459_v58 = vadd.f32 %v1926_v5, %v5369_v46 }
 0x393   :  { %v5462_v47 = vadd.f32 %v1927_v51, %v5371_v6  ;;  %v1960_v48 = vpop.permute.xlu2 %1959  ;;  %v1884_v46 = vadd.f32 %v1876_v19, %v1840_v16  ;;  %v1906_v6 = vmul.f32 0.15246914, %v6335_v13  ;;  %v1908_v9 = vmul.f32 0.15246914, %v4784_v33 }
 0x394   :  { %v1903_v17 = vadd.f32 %v1887_v43, %v1880_v2  ;;  %v1904_v28 = vadd.f32 %v1896_v24, %v1888_v27  ;;  %2118 = vperm.xlu1 %2381, %v5025_v36   ;;  %v1914_v62 = vadd.f32 %v1902_v50, %v1836_v34 }
 0x396   :  { %v1956_v41 = vpop.permute.xlu0 %1955  ;;  %v1890_v7 = vpop.permute.xlu1 %1889  ;;  %v1915_v61 = vadd.f32 %v1907_v31, %v1903_v17  ;;  %v1916_v19 = vadd.f32 %v1908_v9, %v1904_v28  ;;  %v1947_v28 = vmul.f32 0.22254893, %v4948_v15 }
 0x397   :  { %v1893_v39 = vsel %vm1662_vm12, %v5384_v12, %v1890_v7  ;;  %v1974_v18 = vsel %vm1662_vm12, %v1956_v41, %v1960_v48  ;;  %v1913_v12 = vadd.f32 %v5417_v30, %v1835_v56 }
 0x398   :  { %v1895_v29 = vmul.f32 0.22184129, %v1893_v39 }
 0x39a   :  { %v1900_v35 = vadd.f32 %v1895_v29, %v1884_v46 }
 0x39b   :  { %v5474_v14 = vpop.permute.xlu2 %1965 }
 0x39c   :  { %v1912_v45 = vadd.f32 %v1906_v6, %v1900_v35  ;;  %2383 = vset.pattern.permute.xlu1 %v6358_v8  ;;  %v1982_v35 = vmul.f32 0.17820325, %v1974_v18 }
 0x39d   :  { %2210 = vperm.xlu1 %2383, %v5025_v36  }
 0x39e   :  { %v1928_v3 = vmul.f32 %v1919_v25, %v1912_v45  ;;  %v5478_v5 = vpop.permute.xlu0 %1961  ;;  %v1923_v13 = vpop.permute.xlu1 %1922  ;;  %v1945_v45 = vmul.f32 0.22254893, %v5234_v53 }
 0x39f   :  { %v1929_v51 = vmul.f32 %v1923_v13, %v1913_v12  ;;  %v1930_v33 = vmul.f32 %v1923_v13, %v1914_v62  ;;  %v1931_v59 = vmul.f32 %v1923_v13, %v1915_v61  ;;  %v1932_v52 = vmul.f32 %v1923_v13, %v1916_v19 }
 0x3a0   :  { %v5484_v8 = vsel %vm1662_vm12, %v5478_v5, %v5474_v14  ;;  %v5487_v34 = vadd.f32 %v1928_v3, %v5378_v32 }
 0x3a1   :  { %v5490_v36 = vadd.f32 %v1929_v51, %v5389_v21  ;;  %v5493_v30 = vadd.f32 %v1930_v33, %v5391_v20  ;;  %v5496_v56 = vadd.f32 %v1931_v59, %v5393_v23  ;;  %v5499_v25 = vadd.f32 %v1932_v52, %v5395_v37 }
 0x3a3   :  { %v1996_v2 = vpop.permute.xlu2 %1995 }
 0x3a6   :  { %v5501_v4 = vpop.permute.xlu0 %1967  ;;  %v1952_v24 = vpop.permute.xlu1 %1951 }
 0x3a7   :  { %v1976_v32 = vsel %vm1662_vm12, %v1952_v24, %v1956_v41 }
 0x3a8   :  { %v1981_v9 = vmul.f32 0.17820325, %v1976_v32 }
 0x3aa   :  { %v1989_v3 = vadd.f32 %v1981_v9, %v1945_v45 }
 0x3ab   :  { %v5505_v43 = vpop.permute.xlu2 %2001 }
 0x3ae   :  { %v1998_v21 = vpop.permute.xlu0 %1997  ;;  %v1958_v27 = vpop.permute.xlu1 %1957 }
 0x3af   :  { %v2017_v9 = vsel %vm1752_vm14, %v1998_v21, %v5505_v43 }
 0x3b3   :  { %v2008_v50 = vpop.permute.xlu2 %2007 }
 0x3b6   :  { %v2004_v20 = vpop.permute.xlu0 %2003  ;;  %v1964_v17 = vpop.permute.xlu1 %1963 }
 0x3b7   :  { %v1972_v23 = vsel %vm1662_vm12, %v1960_v48, %v1964_v17  ;;  %v2016_v37 = vsel %vm1752_vm14, %v2004_v20, %v2008_v50  ;;  %v1946_v48 = vmul.f32 0.22254893, %v4890_v40  ;;  %v1970_v40 = vsel %vm1662_vm12, %v1964_v17, %v5501_v4 }
 0x3b8   :  { %v1983_v16 = vmul.f32 0.17820325, %v1972_v23  ;;  %v2027_v7 = vmul.f32 0.21052228, %v2016_v37  ;;  %v1984_v52 = vmul.f32 0.17820325, %v1970_v40  ;;  %v1973_v37 = vsel %vm1662_vm12, %v5441_v44, %v1958_v27 }
 0x3b9   :  { %v1990_v15 = vadd.f32 %v1982_v35, %v1946_v48  ;;  %v1948_v17 = vmul.f32 0.22254893, %v4951_v60  ;;  %v1977_v60 = vmul.f32 0.17820325, %v5446_v42 }
 0x3ba   :  { %v1991_v39 = vadd.f32 %v1983_v16, %v1947_v28 }
 0x3bb   :  { %v2038_v41 = vpop.permute.xlu2 %2037  ;;  %v1992_v48 = vadd.f32 %v1984_v52, %v1948_v17  ;;  %v1943_v17 = vmul.f32 0.22254893, %v4926_v11 }
 0x3bc   :  { %v5512_v46 = vadd.f32 %v2027_v7, %v1991_v39  ;;  %v1978_v39 = vmul.f32 0.17820325, %v1973_v37 }
 0x3be   :  { %v5514_v29 = vpop.permute.xlu0 %2009  ;;  %v1994_v6 = vpop.permute.xlu1 %1993 }
 0x3bf   :  { %v2019_v44 = vsel %vm1752_vm14, %v1994_v6, %v1998_v21 }
 0x3c3   :  { %v5516_v31 = vpop.permute.xlu2 %2043 }
 0x3c6   :  { %v2040_v62 = vpop.permute.xlu0 %2039  ;;  %v2000_v61 = vpop.permute.xlu1 %1999 }
 0x3c7   :  { %v2018_v12 = vsel %vm1752_vm14, %v2000_v61, %v2004_v20  ;;  %v2020_v19 = vsel %vm1752_vm14, %v1996_v2, %v2000_v61  ;;  %v2064_v18 = vsel %vm1707_vm13, %v2040_v62, %v5516_v31  ;;  %v1942_v62 = vmul.f32 0.22254893, %v4924_v22 }
 0x3c8   :  { %v2025_v13 = vmul.f32 0.21052228, %v2020_v19  ;;  %v2026_v51 = vmul.f32 0.21052228, %v2018_v12  ;;  %v2069_v33 = vmul.f32 0.21052228, %v2064_v18 }
 0x3c9   :  { %v2022_v12 = vmul.f32 0.21052228, %v2017_v9  ;;  %v1941_v19 = vmul.f32 0.22254893, %v6352_v38 }
 0x3ca   :  { %v2033_v53 = vadd.f32 %v2025_v13, %v1989_v3  ;;  %v5530_v59 = vadd.f32 %v2026_v51, %v1990_v15  ;;  %v1986_v15 = vadd.f32 %v1978_v39, %v1942_v62  ;;  %v1971_v13 = vsel %vm1662_vm12, %v1958_v27, %v5478_v5 }
 0x3cb   :  { %v5532_v32 = vpop.permute.xlu2 %2049  ;;  %v1985_v3 = vadd.f32 %v1977_v60, %v1941_v19 }
 0x3cc   :  { %v2077_v24 = vadd.f32 %v2069_v33, %v2033_v53  ;;  %v2030_v33 = vadd.f32 %v2022_v12, %v1986_v15  ;;  %v1979_v53 = vmul.f32 0.17820325, %v1971_v13 }
 0x3ce   :  { %v5534_v2 = vadd.f32 %v2077_v24, %v1984_v52  ;;  %v2046_v20 = vpop.permute.xlu0 %2045  ;;  %v5536_v23 = vpop.permute.xlu1 %2005  ;;  %v1980_v52 = vmul.f32 0.17820325, %v5484_v8 }
 0x3cf   :  { %v2015_v40 = vsel %vm1752_vm14, %v5505_v43, %v5536_v23 }
 0x3d3   :  { %v5541_v28 = vpop.permute.xlu2 %2055 }
 0x3d6   :  { %v5544_v16 = vpop.permute.xlu0 %2051  ;;  %v2012_v7 = vpop.permute.xlu1 %2011 }
 0x3d7   :  { %v2014_v35 = vsel %vm1752_vm14, %v2008_v50, %v2012_v7  ;;  %v2021_v50 = vmul.f32 0.21052228, %v2019_v44  ;;  %v2023_v7 = vmul.f32 0.21052228, %v2015_v40 }
 0x3d8   :  { %v2028_v45 = vmul.f32 0.21052228, %v2014_v35 }
 0x3d9   :  { %v2029_v6 = vadd.f32 %v2021_v50, %v1985_v3 }
 0x3da   :  { %v5555_v61 = vadd.f32 %v2028_v45, %v1992_v48  ;;  %v1987_v48 = vadd.f32 %v1979_v53, %v1943_v17 }
 0x3db   :  { %v5558_v18 = vpop.permute.xlu2 %2085 }
 0x3dc   :  { %v2031_v62 = vadd.f32 %v2023_v7, %v1987_v48 }
 0x3de   :  { %v2082_v22 = vpop.permute.xlu0 %2081  ;;  %v2042_v51 = vpop.permute.xlu1 %2041 }
 0x3df   :  { %v2097_v42 = vsel %vm1662_vm12, %v5474_v14, %v2082_v22  ;;  %v2061_v21 = vsel %vm1707_vm13, %v2042_v51, %v2046_v20  ;;  %v2063_v38 = vsel %vm1707_vm13, %v2038_v41, %v2042_v51  ;;  %v2059_v41 = vsel %vm1707_vm13, %v2046_v20, %v5532_v32 }
 0x3e0   :  { %v2065_v5 = vmul.f32 0.21052228, %v2063_v38  ;;  %v2066_v27 = vmul.f32 0.21052228, %v2061_v21  ;;  %v2099_v24 = vmul.f32 0.17820325, %v2097_v42  ;;  %v2095_v43 = vsel %vm1662_vm12, %v2082_v22, %v5558_v18 }
 0x3e1   :  { %v2067_v44 = vmul.f32 0.21052228, %v2059_v41  ;;  %v2100_v60 = vmul.f32 0.17820325, %v2095_v43 }
 0x3e2   :  { %v2073_v37 = vadd.f32 %v2065_v5, %v2029_v6  ;;  %v2074_v14 = vadd.f32 %v2066_v27, %v2030_v33 }
 0x3e3   :  { %v2092_v39 = vpop.permute.xlu2 %2091  ;;  %v2075_v15 = vadd.f32 %v2067_v44, %v2031_v62 }
 0x3e4   :  { %v2105_v35 = vadd.f32 %v2073_v37, %v1980_v52  ;;  %v2106_v9 = vadd.f32 %v2099_v24, %v2074_v14 }
 0x3e5   :  { %v2107_v12 = vadd.f32 %v2100_v60, %v2075_v15 }
 0x3e6   :  { %v2088_v45 = vpop.permute.xlu0 %2087  ;;  %v2048_v8 = vpop.permute.xlu1 %2047 }
 0x3eb   :  { %v5582_v11 = vpop.permute.xlu2 %2206 }
 0x3ec   :  { %v2213_v20 = vmul.f32 %v5582_v11, %v5112_v55  ;;  %v2214_v3 = vmul.f32 %v5582_v11, %v5120_v26  ;;  %v2215_v33 = vmul.f32 %v5582_v11, %v5130_v0  ;;  %v2013_v26 = vsel %vm1752_vm14, %v5536_v23, %v5514_v29 }
 0x3ed   :  { %v1944_v0 = vmul.f32 0.22254893, %v4922_v1  ;;  %v2062_v29 = vsel %vm1707_vm13, %v5516_v31, %v2048_v8  ;;  %v2060_v1 = vsel %vm1707_vm13, %v2048_v8, %v5544_v16  ;;  %v2094_v23 = vsel %vm1662_vm12, %v2088_v45, %v2092_v39 }
 0x3ee   :  { %v2115_v19 = vpop.permute.xlu0 %2114  ;;  %v2054_v50 = vpop.permute.xlu1 %2053  ;;  %v2104_v43 = vmul.f32 0.17820325, %v2094_v23 }
 0x3ef   :  { %v2121_v13 = vmul.f32 %v2115_v19, %v2105_v35  ;;  %v2122_v51 = vmul.f32 %v2115_v19, %v2106_v9  ;;  %v2123_v22 = vmul.f32 %v2115_v19, %v2107_v12  ;;  %v1988_v37 = vadd.f32 %v1980_v52, %v1944_v0 }
 0x3f0   :  { %v2070_v35 = vmul.f32 0.21052228, %v2062_v29 }
 0x3f1   :  { %v2129_v42 = vadd.f32 %v2121_v13, %v5455_v49  ;;  %v2130_v21 = vadd.f32 %v2122_v51, %v5459_v58  ;;  %v2131_v38 = vadd.f32 %v2123_v22, %v5462_v47  ;;  %v2024_v49 = vmul.f32 0.21052228, %v2013_v26 }
 0x3f2   :  { %v2057_v58 = vsel %vm1707_vm13, %v5532_v32, %v2054_v50  ;;  %v2058_v47 = vsel %vm1707_vm13, %v5544_v16, %v5541_v28  ;;  %v2071_v16 = vmul.f32 0.21052228, %v2060_v1  ;;  %v2078_v22 = vadd.f32 %v2070_v35, %v5530_v59 }
 0x3f3   :  { %v2221_v6 = vadd.f32 %v2213_v20, %v2129_v42  ;;  %v2222_v40 = vadd.f32 %v2214_v3, %v2130_v21  ;;  %v2223_v5 = vadd.f32 %v2215_v33, %v2131_v38  ;;  %v2068_v14 = vmul.f32 0.21052228, %v2057_v58  ;;  %v6362_v3 = vld [vmem:[#allocation29_spill] sm:$0xff]  ;;  %v6363_v42 = vld [vmem:[#allocation22_spill] sm:$0xff] }
 0x3f4   :  { %v2032_v17 = vadd.f32 %v2024_v49, %v1988_v37  ;;  %v2072_v7 = vmul.f32 0.21052228, %v2058_v47  ;;  %v2079_v33 = vadd.f32 %v2071_v16, %v5512_v46 }
 0x3f5   :  { %v2229_v27 = vmul.f32 0.5, %v2221_v6  ;;  %v2230_v55 = vmul.f32 0.5, %v2222_v40  ;;  %v2231_v53 = vmul.f32 0.5, %v2223_v5 }
 0x3f6   :  { %v2084_v24 = vpop.permute.xlu1 %2083  ;;  %v2076_v62 = vadd.f32 %v2068_v14, %v2032_v17  ;;  %v2080_v51 = vadd.f32 %v2072_v7, %v5555_v61 }
 0x3f7   :  { %2385 = vtanh.f32 %v2229_v27  ;;  %v2096_v28 = vsel %vm1662_vm12, %v2084_v24, %v2088_v45  ;;  %v2098_v31 = vsel %vm1662_vm12, %v5501_v4, %v2084_v24 }
 0x3f8   :  { %2387 = vtanh.f32 %v2230_v55  ;;  %v2102_v50 = vmul.f32 0.17820325, %v2098_v31  ;;  %v2103_v45 = vmul.f32 0.17820325, %v2096_v28  ;;  %v2112_v40 = vadd.f32 %v2104_v43, %v2080_v51  ;;  %v6366_v28 = vld [vmem:[#allocation82_spill] sm:$0xff] }
 0x3f9   :  { %2389 = vtanh.f32 %v2231_v53  ;;  %v2216_v53 = vmul.f32 %v5582_v11, %v5128_v63 }
 0x3fa   :  { %v2110_v27 = vadd.f32 %v2102_v50, %v2078_v22  ;;  %v2111_v55 = vadd.f32 %v2103_v45, %v2079_v33 }
 0x3fd   :  { %v2386_v32 = vpop.eup %2385 }
 0x3fe   :  { %v2388_v41 = vpop.eup %2387  ;;  %v2245_v9 = vmul.f32 0.5, %v2386_v32  ;;  %v2090_v52 = vpop.permute.xlu1 %2089 }
 0x3ff   :  { %v2390_v48 = vpop.eup %2389  ;;  %v2246_v8 = vmul.f32 0.5, %v2388_v41  ;;  %v2093_v39 = vsel %vm1662_vm12, %v5558_v18, %v2090_v52  ;;  %v6364_v18 = vld [vmem:[#allocation34_spill] sm:$0xff]  ;;  %v6365_v41 = vld [vmem:[#allocation27_spill] sm:$0xff] }
 0x400   :  { %v2247_v44 = vmul.f32 0.5, %v2390_v48  ;;  %v2253_v60 = vadd.f32 1.5, %v2245_v9  ;;  %v2101_v15 = vmul.f32 0.17820325, %v2093_v39 }
 0x401   :  { %v2254_v12 = vadd.f32 1.5, %v2246_v8 }
 0x402   :  { %v2255_v20 = vadd.f32 1.5, %v2247_v44  ;;  %v2261_v13 = vmul.f32 %v2253_v60, %v6362_v3  ;;  %v2108_v4 = vadd.f32 %v2101_v15, %v2076_v62 }
 0x403   :  { %v2262_v10 = vmul.f32 %v2254_v12, %v6363_v42  ;;  %v6367_v12 = vld [vmem:[#allocation39_spill] sm:$0xff] }
 0x404   :  { %v2263_v21 = vmul.f32 %v2255_v20, %v6364_v18  ;;  %v2269_v38 = vmul.f32 0.5, %v2261_v13  ;;  %v2124_v6 = vmul.f32 %v2115_v19, %v2108_v4 }
 0x405   :  { %v2270_v5 = vmul.f32 0.5, %v2262_v10 }
 0x406   :  { %v2271_v26 = vmul.f32 0.5, %v2263_v21  ;;  %2391 = vtanh.f32 %v2269_v38  ;;  %v2132_v61 = vadd.f32 %v2124_v6, %v5487_v34  ;;  %v2119_v59 = vpop.permute.xlu1 %2118  ;;  %v6368_v6 = vld [vmem:[#allocation16_spill] sm:$0xff] }
 0x407   :  { %2393 = vtanh.f32 %v2270_v5  ;;  %v2125_v46 = vmul.f32 %v2119_v59, %v5534_v2  ;;  %v2126_v24 = vmul.f32 %v2119_v59, %v2110_v27  ;;  %v2127_v0 = vmul.f32 %v2119_v59, %v2111_v55  ;;  %v6369_v55 = vld [vmem:[#allocation35_spill] sm:$0xff] }
 0x408   :  { %2395 = vtanh.f32 %v2271_v26  ;;  %v2224_v49 = vadd.f32 %v2216_v53, %v2132_v61  ;;  %v2128_v19 = vmul.f32 %v2119_v59, %v2112_v40  ;;  %v6370_v26 = vld [vmem:[#allocation17_spill] sm:$0xff] }
 0x409   :  { %v2133_v58 = vadd.f32 %v2125_v46, %v5490_v36  ;;  %v2134_v47 = vadd.f32 %v2126_v24, %v5493_v30  ;;  %v2135_v37 = vadd.f32 %v2127_v0, %v5496_v56  ;;  %v6371_v24 = vld [vmem:[#allocation13_spill] sm:$0xff] }
 0x40a   :  { %v2232_v63 = vmul.f32 0.5, %v2224_v49  ;;  %v2136_v11 = vadd.f32 %v2128_v19, %v5499_v25 }
 0x40c   :  { %v2392_v29 = vpop.eup %2391  ;;  %2397 = vtanh.f32 %v2232_v63 }
 0x40d   :  { %v2394_v34 = vpop.eup %2393  ;;  %v2285_v1 = vmul.f32 0.5, %v2392_v29 }
 0x40e   :  { %v2396_v23 = vpop.eup %2395  ;;  %v2286_v2 = vmul.f32 0.5, %v2394_v34 }
 0x40f   :  { %v2287_v14 = vmul.f32 0.5, %v2396_v23  ;;  %v2293_v32 = vadd.f32 0.5, %v2285_v1  ;;  %v2211_v17 = vpop.permute.xlu1 %2210 }
 0x410   :  { %v2294_v7 = vadd.f32 0.5, %v2286_v2  ;;  %v2217_v35 = vmul.f32 %v2211_v17, %v6365_v41  ;;  %v2218_v36 = vmul.f32 %v2211_v17, %v5141_v54  ;;  %v2219_v30 = vmul.f32 %v2211_v17, %v5144_v57 }
 0x411   :  { %v2295_v56 = vadd.f32 0.5, %v2287_v14  ;;  %v2301_v9 = vmul.f32 %v2293_v32, %v2261_v13  ;;  %v2220_v25 = vmul.f32 %v2211_v17, %v6366_v28 }
 0x412   :  { %v2398_v31 = vpop.eup %2397  ;;  %v2302_v52 = vmul.f32 %v2294_v7, %v2262_v10  ;;  %v2225_v48 = vadd.f32 %v2217_v35, %v2133_v58  ;;  %v2226_v16 = vadd.f32 %v2218_v36, %v2134_v47  ;;  %v2227_v43 = vadd.f32 %v2219_v30, %v2135_v37 }
 0x413   :  { %v2303_v8 = vmul.f32 %v2295_v56, %v2263_v21  ;;  %2309 = vst [vmem:[#allocation5] sm:$0xff] %v2301_v9  ;;  %v2248_v39 = vmul.f32 0.5, %v2398_v31  ;;  %v2228_v62 = vadd.f32 %v2220_v25, %v2136_v11 }
 0x414   :  { %2310 = vst [vmem:[#allocation5 + $0x8] sm:$0xff] %v2302_v52  ;;  %v2233_v44 = vmul.f32 0.5, %v2225_v48  ;;  %v2234_v60 = vmul.f32 0.5, %v2226_v16  ;;  %v2235_v15 = vmul.f32 0.5, %v2227_v43 }
 0x415   :  { %2311 = vst [vmem:[#allocation5 + $0x10] sm:$0xff] %v2303_v8  ;;  %v2256_v54 = vadd.f32 1.5, %v2248_v39  ;;  %v2236_v57 = vmul.f32 0.5, %v2228_v62 }
 0x416   :  { %2399 = vtanh.f32 %v2233_v44 }
 0x417   :  { %v2264_v50 = vmul.f32 %v2256_v54, %v6367_v12  ;;  %2401 = vtanh.f32 %v2234_v60 }
 0x418   :  { %2403 = vtanh.f32 %v2235_v15 }
 0x419   :  { %v2272_v45 = vmul.f32 0.5, %v2264_v50  ;;  %2405 = vtanh.f32 %v2236_v57 }
 0x41b   :  { %2407 = vtanh.f32 %v2272_v45 }
 0x41c   :  { %v2400_v20 = vpop.eup %2399 }
 0x41d   :  { %v2402_v3 = vpop.eup %2401  ;;  %v2249_v13 = vmul.f32 0.5, %v2400_v20 }
 0x41e   :  { %v2404_v4 = vpop.eup %2403  ;;  %v2250_v51 = vmul.f32 0.5, %v2402_v3 }
 0x41f   :  { %v2406_v22 = vpop.eup %2405  ;;  %v2251_v33 = vmul.f32 0.5, %v2404_v4  ;;  %v2257_v42 = vadd.f32 1.5, %v2249_v13 }
 0x420   :  { %v2252_v10 = vmul.f32 0.5, %v2406_v22  ;;  %v2258_v18 = vadd.f32 1.5, %v2250_v51 }
 0x421   :  { %v2408_v21 = vpop.eup %2407  ;;  %v2259_v38 = vadd.f32 1.5, %v2251_v33  ;;  %v2265_v40 = vmul.f32 %v2257_v42, %v6368_v6 }
 0x422   :  { %v2288_v5 = vmul.f32 0.5, %v2408_v21  ;;  %v2260_v27 = vadd.f32 1.5, %v2252_v10  ;;  %v2266_v53 = vmul.f32 %v2258_v18, %v6369_v55 }
 0x423   :  { %v2267_v61 = vmul.f32 %v2259_v38, %v6370_v26  ;;  %v2273_v59 = vmul.f32 0.5, %v2265_v40 }
 0x424   :  { %v2296_v46 = vadd.f32 0.5, %v2288_v5  ;;  %v2268_v0 = vmul.f32 %v2260_v27, %v6371_v24  ;;  %v2274_v49 = vmul.f32 0.5, %v2266_v53 }
 0x425   :  { %v2275_v19 = vmul.f32 0.5, %v2267_v61  ;;  %2409 = vtanh.f32 %v2273_v59 }
 0x426   :  { %v2304_v58 = vmul.f32 %v2296_v46, %v2264_v50  ;;  %v2276_v47 = vmul.f32 0.5, %v2268_v0  ;;  %2411 = vtanh.f32 %v2274_v49 }
 0x427   :  { %2413 = vtanh.f32 %v2275_v19 }
 0x428   :  { %2312 = vst [vmem:[#allocation5 + $0x18] sm:$0xff] %v2304_v58  ;;  %2415 = vtanh.f32 %v2276_v47 }
 0x42b   :  { %v2410_v37 = vpop.eup %2409 }
 0x42c   :  { %v2412_v63 = vpop.eup %2411  ;;  %v2289_v11 = vmul.f32 0.5, %v2410_v37 }
 0x42d   :  { %v2414_v29 = vpop.eup %2413  ;;  %v2290_v34 = vmul.f32 0.5, %v2412_v63 }
 0x42e   :  { %v2416_v1 = vpop.eup %2415  ;;  %v2291_v23 = vmul.f32 0.5, %v2414_v29  ;;  %v2297_v2 = vadd.f32 0.5, %v2289_v11 }
 0x42f   :  { %v2292_v14 = vmul.f32 0.5, %v2416_v1  ;;  %v2298_v32 = vadd.f32 0.5, %v2290_v34 }
 0x430   :  { %v2299_v17 = vadd.f32 0.5, %v2291_v23  ;;  %v2305_v7 = vmul.f32 %v2297_v2, %v2265_v40 }
 0x431   :  { %v2300_v41 = vadd.f32 0.5, %v2292_v14  ;;  %v2306_v35 = vmul.f32 %v2298_v32, %v2266_v53 }
 0x432   :  { %v2307_v36 = vmul.f32 %v2299_v17, %v2267_v61  ;;  %2313 = vst [vmem:[#allocation5 + $0x20] sm:$0xff] %v2305_v7 }
 0x433   :  { %v2308_v30 = vmul.f32 %v2300_v41, %v2268_v0  ;;  %2314 = vst [vmem:[#allocation5 + $0x28] sm:$0xff] %v2306_v35 }
 0x434   :  { %2315 = vst [vmem:[#allocation5 + $0x30] sm:$0xff] %v2307_v36 }
 0x435   :  { %2316 = vst [vmem:[#allocation5 + $0x38] sm:$0xff] %v2308_v30 }
 0x436   :  { %2329 = dma.vmem_to_hbm [thread:$0]  %s2322_s25, 1024, %s2324_s24, [#allocation4], %s2494_s26, %s2494_s26, %s2491_s17  }
 0x437   :  { %2467 = dma.done.wait [#allocation4], 1024  }
 0x438   :  { %2468 = vsyncadd [#allocation4], 4294966272 }
 0x439   :  { %2334 = vsyncpa [#allocation3], 1 }
 0x43a   :  { %2335 = vsyncpa [#allocation4], 1 }

</bundles_post_ra>
